<compile_context>
chip_gen: v7x
topology: tpu7x:2x2x1
jax: 0.10.0
libtpu: 0.0.40
codegen_flags: <defaults>
</compile_context>

<pallas_src>
import functools

import jax
import jax.numpy as jnp
import numpy as np
from jax.experimental import pallas as pl
from jax.experimental.pallas import tpu as pltpu


# ------------------------------ fused kernel ------------------------------- #

def _fused_net_kernel(x_ref, w1, s1, w2, s2, w3, s3, wf1, bf1, wf2, bf2,
                      out_ref, ybuf, buf2, buf3, fbuf, *, H, W, B_blk):
    f32 = jnp.float32
    HW = H * W
    H2, W2 = H // 2, W // 2
    H3, W3 = H // 4, W // 4
    W3p = W3 // 2
    S2 = H2 * W2 + 2 * W2          # per-image row stride in buf2 (incl. pad gap)
    S3 = H3 * W3 + 2 * W3          # per-image row stride in buf3
    off2, off3 = 2 * W2, 2 * W3    # leading zero-pad rows
    M1 = B_blk * HW                # conv1 output rows (no gaps)
    M2 = (B_blk - 1) * S2 + H2 * W2
    M3 = (B_blk - 1) * S3 + H3 * W3
    MC = 128                       # M-chunk so the f32 accumulator stays in vregs

    # ---- zero only the padding rows (valid rows are fully overwritten) ----
    zpad2 = jnp.zeros((2 * W2, 128), f32)
    zpad3 = jnp.zeros((2 * W3, 128), f32)
    for k in range(B_blk + 1):
        buf2[pl.ds(k * S2, 2 * W2), :] = zpad2
        buf3[pl.ds(k * S3, 2 * W3), :] = zpad3
    fbuf[...] = jnp.zeros(fbuf.shape, f32)

    # ---------------- stage 1: conv1 (im2col) + BN + ReLU ----------------
    w1v = w1[...]
    s1v = s1[...]
    for m0 in range(0, M1, MC):
        m = min(MC, M1 - m0)
        acc = jnp.dot(x_ref[pl.ds(m0, m), :], w1v, preferred_element_type=f32)
        ybuf[pl.ds(m0, m), :] = jnp.maximum(acc + s1v, 0.0)

    # -------------- 2x2 / stride-2 max-pool over ybuf rows ---------------
    def pool(src_stride, hh, ww, store):
        pw, ph = ww // 2, hh // 2
        for b in range(B_blk):
            for i in range(ph):
                r = b * src_stride + 2 * i * ww
                t0 = ybuf[pl.ds(r, pw, 2), :]
                t1 = ybuf[pl.ds(r + 1, pw, 2), :]
                b0 = ybuf[pl.ds(r + ww, pw, 2), :]
                b1 = ybuf[pl.ds(r + ww + 1, pw, 2), :]
                store(b, i, jnp.maximum(jnp.maximum(t0, t1),
                                        jnp.maximum(b0, b1)))

    def store2(b, i, v):
        buf2[pl.ds(off2 + b * S2 + i * W2, W2), :] = v

    def store3(b, i, v):
        buf3[pl.ds(off3 + b * S3 + i * W3, W3), :] = v

    def store_f(b, i, v):
        # scatter pooled position q into lanes [128q, 128(q+1)) of fbuf row b
        for jx in range(W3p):
            q = i * W3p + jx
            fbuf[pl.ds(b, 1), pl.ds(q * 128, 128)] = v[jx:jx + 1, :]

    # -------- stages 2 & 3: 9-tap conv + BN + ReLU over flat rows ---------
    def conv_taps(src, wtaps, shift, ww, off, m_total):
        sh = shift[...]
        for m0 in range(0, m_total, MC):
            m = min(MC, m_total - m0)
            col = (jax.lax.broadcasted_iota(jnp.int32, (m, 1), 0) + m0) % ww
            not_left = col != 0
            not_right = col != (ww - 1)
            acc = jnp.zeros((m, 128), f32)
            for kh in range(3):
                for kw in range(3):
                    dh, dw = kh - 1, kw - 1
                    slab = src[pl.ds(off + dh * ww + dw + m0, m), :]
                    if dw == -1:
                        slab = jnp.where(not_left, slab, 0.0)
                    elif dw == 1:
                        slab = jnp.where(not_right, slab, 0.0)
                    acc = acc + jnp.dot(slab.astype(jnp.bfloat16),
                                        wtaps[kh * 3 + kw],
                                        preferred_element_type=f32)
            ybuf[pl.ds(m0, m), :] = jnp.maximum(acc + sh, 0.0)

    pool(HW, H, W, store2)                 # pool1 -> buf2
    conv_taps(buf2, w2, s2, W2, off2, M2)  # conv2 + BN + ReLU -> ybuf
    pool(S2, H2, W2, store3)               # pool2 -> buf3
    conv_taps(buf3, w3, s3, W3, off3, M3)  # conv3 + BN + ReLU -> ybuf
    pool(S3, H3, W3, store_f)              # pool3 -> fbuf (lane-packed features)

    # -------------- head: fc1 + ReLU + fc2 + L2 normalize -----------------
    feats = fbuf[...].astype(jnp.bfloat16)                      # (FB, nq*128)
    h = jnp.dot(feats, wf1[...], preferred_element_type=f32) + bf1[...]
    h = jnp.maximum(h, 0.0)
    z = jnp.dot(h.astype(jnp.bfloat16), wf2[...],
                preferred_element_type=f32) + bf2[...]
    ss = jnp.sum(z * z, axis=1, keepdims=True)
    # F.normalize(p=2, dim=1, eps=1e-12) == z * rsqrt(max(||z||^2, eps^2))
    zn = z * jax.lax.rsqrt(jnp.maximum(ss, 1e-24))
    out_ref[...] = zn[:B_blk, :]


# ------------------------------- JAX wrapper -------------------------------- #

def _round_up(n, m):
    return ((n + m - 1) // m) * m


def forward(params, x_nchw):
    B, Cin, H, W = x_nchw.shape
    assert H % 8 == 0 and W % 8 == 0, "H and W must be multiples of 8"
    D = params['fc2_w'].shape[0]
    c2_in = params['conv2_w'].shape[1]
    c3_in = params['conv3_w'].shape[1]
    c3_out = params['conv3_w'].shape[0]

    # batch blocking: B_blk images per grid step, >=2 steps whenever B >= 2
    B_blk = min(8, max(1, B // 2))
    nsteps = -(-B // B_blk)
    B_pad = nsteps * B_blk
    if B_pad != B:
        x_nchw = jnp.pad(x_nchw, ((0, B_pad - B), (0, 0), (0, 0), (0, 0)))

    HW = H * W
    H2, W2 = H // 2, W // 2
    H3, W3 = H // 4, W // 4
    nq = (H // 8) * (W // 8)
    K1 = _round_up(9 * Cin, 8)

    # conv1 im2col: 9 shifted channels-last slices -> (nsteps, B_blk*HW, K1) bf16
    xp = jnp.transpose(x_nchw, (0, 2, 3, 1))
    xp = jnp.pad(xp, ((0, 0), (1, 1), (1, 1), (0, 0)))
    cols = [xp[:, kh:kh + H, kw:kw + W, :] for kh in range(3) for kw in range(3)]
    xim = jnp.concatenate(cols, axis=-1).reshape(B_pad, HW, 9 * Cin)
    xim = jnp.pad(xim, ((0, 0), (0, 0), (0, K1 - 9 * Cin)))
    xim = xim.reshape(nsteps, B_blk * HW, K1).astype(jnp.bfloat16)

    # fold BN (running stats) into conv weights
    def fold_bn(i):
        w = params[f'conv{i}_w']
        scale = params[f'bn{i}_gamma'] * jax.lax.rsqrt(params[f'bn{i}_var'] + 1e-5)
        shift = (params[f'conv{i}_b'] - params[f'bn{i}_mean']) * scale \
            + params[f'bn{i}_beta']
        return w * scale[:, None, None, None], shift

    w1f, sh1 = fold_bn(1)
    cout1 = w1f.shape[0]
    w1 = jnp.transpose(w1f, (2, 3, 1, 0)).reshape(9 * Cin, cout1)
    w1 = jnp.pad(w1, ((0, K1 - 9 * Cin), (0, 128 - cout1))).astype(jnp.bfloat16)
    s1 = jnp.pad(sh1, (0, 128 - cout1))[None, :].astype(jnp.float32)

    def tap_prep(i, cin):
        wf, sh = fold_bn(i)
        cout = wf.shape[0]
        taps = jnp.transpose(wf, (2, 3, 1, 0)).reshape(9, cin, cout)
        taps = jnp.pad(taps, ((0, 0), (0, 128 - cin), (0, 128 - cout)))
        s = jnp.pad(sh, (0, 128 - cout))[None, :]
        return taps.astype(jnp.bfloat16), s.astype(jnp.float32)

    w2, s2 = tap_prep(2, c2_in)
    w3, s3 = tap_prep(3, c3_in)

    # fc1: PyTorch flatten order (c, ho, wo) -> fbuf lane order q*128 + c
    wf1 = params['fc1_w'].reshape(128, c3_out, nq)        # [out, c, q]
    wf1 = jnp.transpose(wf1, (2, 1, 0))                   # [q, c, out]
    wf1 = jnp.pad(wf1, ((0, 0), (0, 128 - c3_out), (0, 0)))
    wf1 = wf1.reshape(nq * 128, 128).astype(jnp.bfloat16)
    bf1 = params['fc1_b'][None, :].astype(jnp.float32)

    # fc2 padded to 128 output lanes (lane-dense output store)
    wf2 = jnp.pad(params['fc2_w'].T, ((0, 0), (0, 128 - D))).astype(jnp.bfloat16)
    bf2 = jnp.pad(params['fc2_b'], (0, 128 - D))[None, :].astype(jnp.float32)

    # scratch sizes (flat row-padded activations, channels/features in lanes)
    S2 = H2 * W2 + 2 * W2
    S3 = H3 * W3 + 2 * W3
    R2 = B_blk * S2 + 2 * W2
    R3 = B_blk * S3 + 2 * W3
    FB = _round_up(B_blk, 8)

    kernel = functools.partial(_fused_net_kernel, H=H, W=W, B_blk=B_blk)
    out = pl.pallas_call(
        kernel,
        out_shape=jax.ShapeDtypeStruct((nsteps, B_blk, 128), jnp.float32),
        grid=(nsteps,),
        in_specs=[
            pl.BlockSpec((None, B_blk * HW, K1), lambda g: (g, 0, 0)),
            pl.BlockSpec((K1, 128), lambda g: (0, 0)),
            pl.BlockSpec((1, 128), lambda g: (0, 0)),
            pl.BlockSpec((9, 128, 128), lambda g: (0, 0, 0)),
            pl.BlockSpec((1, 128), lambda g: (0, 0)),
            pl.BlockSpec((9, 128, 128), lambda g: (0, 0, 0)),
            pl.BlockSpec((1, 128), lambda g: (0, 0)),
            pl.BlockSpec((nq * 128, 128), lambda g: (0, 0)),
            pl.BlockSpec((1, 128), lambda g: (0, 0)),
            pl.BlockSpec((128, 128), lambda g: (0, 0)),
            pl.BlockSpec((1, 128), lambda g: (0, 0)),
        ],
        out_specs=pl.BlockSpec((None, B_blk, 128), lambda g: (g, 0, 0)),
        scratch_shapes=[
            pltpu.VMEM((B_blk * HW, 128), jnp.float32),   # conv-output staging
            pltpu.VMEM((R2, 128), jnp.float32),           # conv2 padded input
            pltpu.VMEM((R3, 128), jnp.float32),           # conv3 padded input
            pltpu.VMEM((FB, nq * 128), jnp.float32),      # head features
        ],
        compiler_params=pltpu.CompilerParams(dimension_semantics=("parallel",)),
    )(xim, w1, s1, w2, s2, w3, s3, wf1, bf1, wf2, bf2)
    return out.reshape(B_pad, 128)[:B, :D]


# --------------------------------- params ----------------------------------- #

def init_params(key, image_size):
    c_in = image_size['channels']
    D = image_size['output_dim']
    H, W = image_size['height'], image_size['width']
    ks = jax.random.split(key, 16)
    params = {}
    chans = [c_in, 16, 32, 64]
    for i in range(3):
        cin, cout = chans[i], chans[i + 1]
        params[f'conv{i+1}_w'] = 0.1 * jax.random.normal(ks[4 * i], (cout, cin, 3, 3), jnp.float32)
        params[f'conv{i+1}_b'] = 0.05 * jax.random.normal(ks[4 * i + 1], (cout,), jnp.float32)
        params[f'bn{i+1}_gamma'] = 1.0 + 0.1 * jax.random.normal(ks[4 * i + 2], (cout,), jnp.float32)
        params[f'bn{i+1}_beta'] = 0.05 * jax.random.normal(ks[4 * i + 3], (cout,), jnp.float32)
        params[f'bn{i+1}_mean'] = jnp.zeros((cout,), jnp.float32)
        params[f'bn{i+1}_var'] = jnp.ones((cout,), jnp.float32)
    flat = 64 * (H // 8) * (W // 8)       # three 2x2 pools
    params['fc1_w'] = jax.random.normal(ks[12], (128, flat), jnp.float32) / np.sqrt(flat)
    params['fc1_b'] = 0.05 * jax.random.normal(ks[13], (128,), jnp.float32)
    params['fc2_w'] = jax.random.normal(ks[14], (D, 128), jnp.float32) / np.sqrt(128)
    params['fc2_b'] = 0.05 * jax.random.normal(ks[15], (D,), jnp.float32)
    return params


# ---------------------------------- main ------------------------------------ #

if __name__ == "__main__":
    image_size = {'channels': 3, 'height': 16, 'width': 16, 'output_dim': 8}
    key = jax.random.PRNGKey(0)
    k_params, k_x = jax.random.split(key)
    params = init_params(k_params, image_size)
    x = jax.random.normal(
        k_x, (2, image_size['channels'], image_size['height'], image_size['width']),
        jnp.float32)
    out = jax.jit(forward)(params, x)
    out = jax.block_until_ready(out)
    assert out.shape == (2, image_size['output_dim'])
    assert bool(jnp.all(jnp.isfinite(out)))
    print("KERNEL_OK")
</pallas_src>

<mosaic_0001>
module attributes {stable_mosaic.version = 11 : i64} {
  func.func @_fused_net_kernel(%arg0: i32, %arg1: memref<1x256x32xbf16, #tpu.memory_space<vmem>>, %arg2: memref<32x128xbf16, #tpu.memory_space<vmem>>, %arg3: memref<1x128xf32, #tpu.memory_space<vmem>>, %arg4: memref<9x128x128xbf16, #tpu.memory_space<vmem>>, %arg5: memref<1x128xf32, #tpu.memory_space<vmem>>, %arg6: memref<9x128x128xbf16, #tpu.memory_space<vmem>>, %arg7: memref<1x128xf32, #tpu.memory_space<vmem>>, %arg8: memref<512x128xbf16, #tpu.memory_space<vmem>>, %arg9: memref<1x128xf32, #tpu.memory_space<vmem>>, %arg10: memref<128x128xbf16, #tpu.memory_space<vmem>>, %arg11: memref<1x128xf32, #tpu.memory_space<vmem>>, %arg12: memref<1x1x128xf32, #tpu.memory_space<vmem>>, %arg13: memref<256x128xf32, #tpu.memory_space<vmem>>, %arg14: memref<96x128xf32, #tpu.memory_space<vmem>>, %arg15: memref<32x128xf32, #tpu.memory_space<vmem>>, %arg16: memref<8x512xf32, #tpu.memory_space<vmem>>) attributes {dimension_semantics = [#tpu.dimension_semantics<parallel>], iteration_bounds = array<i64: 2>, scalar_prefetch = 0 : i64, scratch_operands = 4 : i64, tpu.core_type = #tpu.core_type<tc>, window_params = [{transform_indices = @transform_0, window_bounds = array<i64: 1, 256, 32>}, {pipeline_mode = #tpu.pipeline_mode<synchronous>, transform_indices = @transform_1, window_bounds = array<i64: 32, 128>}, {pipeline_mode = #tpu.pipeline_mode<synchronous>, transform_indices = @transform_2, window_bounds = array<i64: 1, 128>}, {pipeline_mode = #tpu.pipeline_mode<synchronous>, transform_indices = @transform_3, window_bounds = array<i64: 9, 128, 128>}, {pipeline_mode = #tpu.pipeline_mode<synchronous>, transform_indices = @transform_4, window_bounds = array<i64: 1, 128>}, {pipeline_mode = #tpu.pipeline_mode<synchronous>, transform_indices = @transform_5, window_bounds = array<i64: 9, 128, 128>}, {pipeline_mode = #tpu.pipeline_mode<synchronous>, transform_indices = @transform_6, window_bounds = array<i64: 1, 128>}, {pipeline_mode = #tpu.pipeline_mode<synchronous>, transform_indices = @transform_7, window_bounds = array<i64: 512, 128>}, {pipeline_mode = #tpu.pipeline_mode<synchronous>, transform_indices = @transform_8, window_bounds = array<i64: 1, 128>}, {pipeline_mode = #tpu.pipeline_mode<synchronous>, transform_indices = @transform_9, window_bounds = array<i64: 128, 128>}, {pipeline_mode = #tpu.pipeline_mode<synchronous>, transform_indices = @transform_10, window_bounds = array<i64: 1, 128>}, {transform_indices = @transform_11, window_bounds = array<i64: 1, 1, 128>}]} {
    %cst = arith.constant 0.000000e+00 : f32
    %0 = vector.broadcast %cst : f32 to vector<16x128xf32>
    %cst_0 = arith.constant 0.000000e+00 : f32
    %1 = vector.broadcast %cst_0 : f32 to vector<8x128xf32>
    %c0 = arith.constant 0 : index
    %c0_1 = arith.constant 0 : index
    %2 = vector.load %arg14[%c0, %c0_1] : memref<96x128xf32, #tpu.memory_space<vmem>>, vector<16x128xf32>
    tpu.vector_store %arg14[%c0, %c0_1], %0 {strides = array<i32>} : memref<96x128xf32, #tpu.memory_space<vmem>>, vector<16x128xf32>,
    %c0_2 = arith.constant 0 : index
    %c0_3 = arith.constant 0 : index
    %3 = vector.load %arg15[%c0_2, %c0_3] : memref<32x128xf32, #tpu.memory_space<vmem>>, vector<8x128xf32>
    tpu.vector_store %arg15[%c0_2, %c0_3], %1 {strides = array<i32>} : memref<32x128xf32, #tpu.memory_space<vmem>>, vector<8x128xf32>,
    %c80 = arith.constant 80 : index
    %c0_4 = arith.constant 0 : index
    %4 = vector.load %arg14[%c80, %c0_4] : memref<96x128xf32, #tpu.memory_space<vmem>>, vector<16x128xf32>
    tpu.vector_store %arg14[%c80, %c0_4], %0 {strides = array<i32>} : memref<96x128xf32, #tpu.memory_space<vmem>>, vector<16x128xf32>,
    %c24 = arith.constant 24 : index
    %c0_5 = arith.constant 0 : index
    %5 = vector.load %arg15[%c24, %c0_5] : memref<32x128xf32, #tpu.memory_space<vmem>>, vector<8x128xf32>
    tpu.vector_store %arg15[%c24, %c0_5], %1 {strides = array<i32>} : memref<32x128xf32, #tpu.memory_space<vmem>>, vector<8x128xf32>,
    %cst_6 = arith.constant 0.000000e+00 : f32
    %6 = vector.broadcast %cst_6 : f32 to vector<8x512xf32>
    %c0_7 = arith.constant 0 : index
    %c0_8 = arith.constant 0 : index
    %7 = vector.load %arg16[%c0_7, %c0_8] : memref<8x512xf32, #tpu.memory_space<vmem>>, vector<8x512xf32>
    tpu.vector_store %arg16[%c0_7, %c0_8], %6 {strides = array<i32>} : memref<8x512xf32, #tpu.memory_space<vmem>>, vector<8x512xf32>,
    %c0_9 = arith.constant 0 : index
    %c0_10 = arith.constant 0 : index
    %8 = vector.load %arg2[%c0_9, %c0_10] : memref<32x128xbf16, #tpu.memory_space<vmem>>, vector<32x128xbf16>
    %c0_11 = arith.constant 0 : index
    %c0_12 = arith.constant 0 : index
    %9 = vector.load %arg3[%c0_11, %c0_12] : memref<1x128xf32, #tpu.memory_space<vmem>>, vector<1x128xf32>
    %c0_13 = arith.constant 0 : index
    %c0_14 = arith.constant 0 : index
    %c0_15 = arith.constant 0 : index
    %10 = vector.load %arg1[%c0_13, %c0_14, %c0_15] : memref<1x256x32xbf16, #tpu.memory_space<vmem>>, vector<1x128x32xbf16>
    %11 = vector.shape_cast %10 : vector<1x128x32xbf16> to vector<128x32xbf16>
    %cst_16 = arith.constant dense<0.000000e+00> : vector<128x128xf32>
    %12 = tpu.matmul %11, %8, %cst_16 {dimension_numbers = #tpu.dot_dimension_numbers<[1], [0], [0], [1], [0, 0, 1, 1], [], []>} : vector<128x32xbf16>, vector<32x128xbf16>, vector<128x128xf32> -> vector<128x128xf32>
    %13 = vector.broadcast %9 : vector<1x128xf32> to vector<128x128xf32>
    %14 = arith.addf %12, %13 : vector<128x128xf32>
    %cst_17 = arith.constant 0.000000e+00 : f32
    %15 = vector.broadcast %cst_17 : f32 to vector<128x128xf32>
    %16 = arith.maximumf %14, %15 : vector<128x128xf32>
    %c0_18 = arith.constant 0 : index
    %c0_19 = arith.constant 0 : index
    %17 = vector.load %arg13[%c0_18, %c0_19] : memref<256x128xf32, #tpu.memory_space<vmem>>, vector<128x128xf32>
    tpu.vector_store %arg13[%c0_18, %c0_19], %16 {strides = array<i32>} : memref<256x128xf32, #tpu.memory_space<vmem>>, vector<128x128xf32>,
    %c0_20 = arith.constant 0 : index
    %c128 = arith.constant 128 : index
    %c0_21 = arith.constant 0 : index
    %18 = vector.load %arg1[%c0_20, %c128, %c0_21] : memref<1x256x32xbf16, #tpu.memory_space<vmem>>, vector<1x128x32xbf16>
    %19 = vector.shape_cast %18 : vector<1x128x32xbf16> to vector<128x32xbf16>
    %cst_22 = arith.constant dense<0.000000e+00> : vector<128x128xf32>
    %20 = tpu.matmul %19, %8, %cst_22 {dimension_numbers = #tpu.dot_dimension_numbers<[1], [0], [0], [1], [0, 0, 1, 1], [], []>} : vector<128x32xbf16>, vector<32x128xbf16>, vector<128x128xf32> -> vector<128x128xf32>
    %21 = vector.broadcast %9 : vector<1x128xf32> to vector<128x128xf32>
    %22 = arith.addf %20, %21 : vector<128x128xf32>
    %cst_23 = arith.constant 0.000000e+00 : f32
    %23 = vector.broadcast %cst_23 : f32 to vector<128x128xf32>
    %24 = arith.maximumf %22, %23 : vector<128x128xf32>
    %c128_24 = arith.constant 128 : index
    %c0_25 = arith.constant 0 : index
    %25 = vector.load %arg13[%c128_24, %c0_25] : memref<256x128xf32, #tpu.memory_space<vmem>>, vector<128x128xf32>
    tpu.vector_store %arg13[%c128_24, %c0_25], %24 {strides = array<i32>} : memref<256x128xf32, #tpu.memory_space<vmem>>, vector<128x128xf32>,
    %c0_26 = arith.constant 0 : index
    %c0_27 = arith.constant 0 : index
    %26 = tpu.strided_load %arg13[%c0_26, %c0_27] {strides = array<i32: 2, 1>} : memref<256x128xf32, #tpu.memory_space<vmem>>, vector<8x128xf32>
    %c1 = arith.constant 1 : index
    %c0_28 = arith.constant 0 : index
    %27 = tpu.strided_load %arg13[%c1, %c0_28] {strides = array<i32: 2, 1>} : memref<256x128xf32, #tpu.memory_space<vmem>>, vector<8x128xf32>
    %c16 = arith.constant 16 : index
    %c0_29 = arith.constant 0 : index
    %28 = tpu.strided_load %arg13[%c16, %c0_29] {strides = array<i32: 2, 1>} : memref<256x128xf32, #tpu.memory_space<vmem>>, vector<8x128xf32>
    %c17 = arith.constant 17 : index
    %c0_30 = arith.constant 0 : index
    %29 = tpu.strided_load %arg13[%c17, %c0_30] {strides = array<i32: 2, 1>} : memref<256x128xf32, #tpu.memory_space<vmem>>, vector<8x128xf32>
    %30 = arith.maximumf %26, %27 : vector<8x128xf32>
    %31 = arith.maximumf %28, %29 : vector<8x128xf32>
    %32 = arith.maximumf %30, %31 : vector<8x128xf32>
    %c16_31 = arith.constant 16 : index
    %c0_32 = arith.constant 0 : index
    %33 = vector.load %arg14[%c16_31, %c0_32] : memref<96x128xf32, #tpu.memory_space<vmem>>, vector<8x128xf32>
    tpu.vector_store %arg14[%c16_31, %c0_32], %32 {strides = array<i32>} : memref<96x128xf32, #tpu.memory_space<vmem>>, vector<8x128xf32>,
    %c32 = arith.constant 32 : index
    %c0_33 = arith.constant 0 : index
    %34 = tpu.strided_load %arg13[%c32, %c0_33] {strides = array<i32: 2, 1>} : memref<256x128xf32, #tpu.memory_space<vmem>>, vector<8x128xf32>
    %c33 = arith.constant 33 : index
    %c0_34 = arith.constant 0 : index
    %35 = tpu.strided_load %arg13[%c33, %c0_34] {strides = array<i32: 2, 1>} : memref<256x128xf32, #tpu.memory_space<vmem>>, vector<8x128xf32>
    %c48 = arith.constant 48 : index
    %c0_35 = arith.constant 0 : index
    %36 = tpu.strided_load %arg13[%c48, %c0_35] {strides = array<i32: 2, 1>} : memref<256x128xf32, #tpu.memory_space<vmem>>, vector<8x128xf32>
    %c49 = arith.constant 49 : index
    %c0_36 = arith.constant 0 : index
    %37 = tpu.strided_load %arg13[%c49, %c0_36] {strides = array<i32: 2, 1>} : memref<256x128xf32, #tpu.memory_space<vmem>>, vector<8x128xf32>
    %38 = arith.maximumf %34, %35 : vector<8x128xf32>
    %39 = arith.maximumf %36, %37 : vector<8x128xf32>
    %40 = arith.maximumf %38, %39 : vector<8x128xf32>
    %c24_37 = arith.constant 24 : index
    %c0_38 = arith.constant 0 : index
    %41 = vector.load %arg14[%c24_37, %c0_38] : memref<96x128xf32, #tpu.memory_space<vmem>>, vector<8x128xf32>
    tpu.vector_store %arg14[%c24_37, %c0_38], %40 {strides = array<i32>} : memref<96x128xf32, #tpu.memory_space<vmem>>, vector<8x128xf32>,
    %c64 = arith.constant 64 : index
    %c0_39 = arith.constant 0 : index
    %42 = tpu.strided_load %arg13[%c64, %c0_39] {strides = array<i32: 2, 1>} : memref<256x128xf32, #tpu.memory_space<vmem>>, vector<8x128xf32>
    %c65 = arith.constant 65 : index
    %c0_40 = arith.constant 0 : index
    %43 = tpu.strided_load %arg13[%c65, %c0_40] {strides = array<i32: 2, 1>} : memref<256x128xf32, #tpu.memory_space<vmem>>, vector<8x128xf32>
    %c80_41 = arith.constant 80 : index
    %c0_42 = arith.constant 0 : index
    %44 = tpu.strided_load %arg13[%c80_41, %c0_42] {strides = array<i32: 2, 1>} : memref<256x128xf32, #tpu.memory_space<vmem>>, vector<8x128xf32>
    %c81 = arith.constant 81 : index
    %c0_43 = arith.constant 0 : index
    %45 = tpu.strided_load %arg13[%c81, %c0_43] {strides = array<i32: 2, 1>} : memref<256x128xf32, #tpu.memory_space<vmem>>, vector<8x128xf32>
    %46 = arith.maximumf %42, %43 : vector<8x128xf32>
    %47 = arith.maximumf %44, %45 : vector<8x128xf32>
    %48 = arith.maximumf %46, %47 : vector<8x128xf32>
    %c32_44 = arith.constant 32 : index
    %c0_45 = arith.constant 0 : index
    %49 = vector.load %arg14[%c32_44, %c0_45] : memref<96x128xf32, #tpu.memory_space<vmem>>, vector<8x128xf32>
    tpu.vector_store %arg14[%c32_44, %c0_45], %48 {strides = array<i32>} : memref<96x128xf32, #tpu.memory_space<vmem>>, vector<8x128xf32>,
    %c96 = arith.constant 96 : index
    %c0_46 = arith.constant 0 : index
    %50 = tpu.strided_load %arg13[%c96, %c0_46] {strides = array<i32: 2, 1>} : memref<256x128xf32, #tpu.memory_space<vmem>>, vector<8x128xf32>
    %c97 = arith.constant 97 : index
    %c0_47 = arith.constant 0 : index
    %51 = tpu.strided_load %arg13[%c97, %c0_47] {strides = array<i32: 2, 1>} : memref<256x128xf32, #tpu.memory_space<vmem>>, vector<8x128xf32>
    %c112 = arith.constant 112 : index
    %c0_48 = arith.constant 0 : index
    %52 = tpu.strided_load %arg13[%c112, %c0_48] {strides = array<i32: 2, 1>} : memref<256x128xf32, #tpu.memory_space<vmem>>, vector<8x128xf32>
    %c113 = arith.constant 113 : index
    %c0_49 = arith.constant 0 : index
    %53 = tpu.strided_load %arg13[%c113, %c0_49] {strides = array<i32: 2, 1>} : memref<256x128xf32, #tpu.memory_space<vmem>>, vector<8x128xf32>
    %54 = arith.maximumf %50, %51 : vector<8x128xf32>
    %55 = arith.maximumf %52, %53 : vector<8x128xf32>
    %56 = arith.maximumf %54, %55 : vector<8x128xf32>
    %c40 = arith.constant 40 : index
    %c0_50 = arith.constant 0 : index
    %57 = vector.load %arg14[%c40, %c0_50] : memref<96x128xf32, #tpu.memory_space<vmem>>, vector<8x128xf32>
    tpu.vector_store %arg14[%c40, %c0_50], %56 {strides = array<i32>} : memref<96x128xf32, #tpu.memory_space<vmem>>, vector<8x128xf32>,
    %c128_51 = arith.constant 128 : index
    %c0_52 = arith.constant 0 : index
    %58 = tpu.strided_load %arg13[%c128_51, %c0_52] {strides = array<i32: 2, 1>} : memref<256x128xf32, #tpu.memory_space<vmem>>, vector<8x128xf32>
    %c129 = arith.constant 129 : index
    %c0_53 = arith.constant 0 : index
    %59 = tpu.strided_load %arg13[%c129, %c0_53] {strides = array<i32: 2, 1>} : memref<256x128xf32, #tpu.memory_space<vmem>>, vector<8x128xf32>
    %c144 = arith.constant 144 : index
    %c0_54 = arith.constant 0 : index
    %60 = tpu.strided_load %arg13[%c144, %c0_54] {strides = array<i32: 2, 1>} : memref<256x128xf32, #tpu.memory_space<vmem>>, vector<8x128xf32>
    %c145 = arith.constant 145 : index
    %c0_55 = arith.constant 0 : index
    %61 = tpu.strided_load %arg13[%c145, %c0_55] {strides = array<i32: 2, 1>} : memref<256x128xf32, #tpu.memory_space<vmem>>, vector<8x128xf32>
    %62 = arith.maximumf %58, %59 : vector<8x128xf32>
    %63 = arith.maximumf %60, %61 : vector<8x128xf32>
    %64 = arith.maximumf %62, %63 : vector<8x128xf32>
    %c48_56 = arith.constant 48 : index
    %c0_57 = arith.constant 0 : index
    %65 = vector.load %arg14[%c48_56, %c0_57] : memref<96x128xf32, #tpu.memory_space<vmem>>, vector<8x128xf32>
    tpu.vector_store %arg14[%c48_56, %c0_57], %64 {strides = array<i32>} : memref<96x128xf32, #tpu.memory_space<vmem>>, vector<8x128xf32>,
    %c160 = arith.constant 160 : index
    %c0_58 = arith.constant 0 : index
    %66 = tpu.strided_load %arg13[%c160, %c0_58] {strides = array<i32: 2, 1>} : memref<256x128xf32, #tpu.memory_space<vmem>>, vector<8x128xf32>
    %c161 = arith.constant 161 : index
    %c0_59 = arith.constant 0 : index
    %67 = tpu.strided_load %arg13[%c161, %c0_59] {strides = array<i32: 2, 1>} : memref<256x128xf32, #tpu.memory_space<vmem>>, vector<8x128xf32>
    %c176 = arith.constant 176 : index
    %c0_60 = arith.constant 0 : index
    %68 = tpu.strided_load %arg13[%c176, %c0_60] {strides = array<i32: 2, 1>} : memref<256x128xf32, #tpu.memory_space<vmem>>, vector<8x128xf32>
    %c177 = arith.constant 177 : index
    %c0_61 = arith.constant 0 : index
    %69 = tpu.strided_load %arg13[%c177, %c0_61] {strides = array<i32: 2, 1>} : memref<256x128xf32, #tpu.memory_space<vmem>>, vector<8x128xf32>
    %70 = arith.maximumf %66, %67 : vector<8x128xf32>
    %71 = arith.maximumf %68, %69 : vector<8x128xf32>
    %72 = arith.maximumf %70, %71 : vector<8x128xf32>
    %c56 = arith.constant 56 : index
    %c0_62 = arith.constant 0 : index
    %73 = vector.load %arg14[%c56, %c0_62] : memref<96x128xf32, #tpu.memory_space<vmem>>, vector<8x128xf32>
    tpu.vector_store %arg14[%c56, %c0_62], %72 {strides = array<i32>} : memref<96x128xf32, #tpu.memory_space<vmem>>, vector<8x128xf32>,
    %c192 = arith.constant 192 : index
    %c0_63 = arith.constant 0 : index
    %74 = tpu.strided_load %arg13[%c192, %c0_63] {strides = array<i32: 2, 1>} : memref<256x128xf32, #tpu.memory_space<vmem>>, vector<8x128xf32>
    %c193 = arith.constant 193 : index
    %c0_64 = arith.constant 0 : index
    %75 = tpu.strided_load %arg13[%c193, %c0_64] {strides = array<i32: 2, 1>} : memref<256x128xf32, #tpu.memory_space<vmem>>, vector<8x128xf32>
    %c208 = arith.constant 208 : index
    %c0_65 = arith.constant 0 : index
    %76 = tpu.strided_load %arg13[%c208, %c0_65] {strides = array<i32: 2, 1>} : memref<256x128xf32, #tpu.memory_space<vmem>>, vector<8x128xf32>
    %c209 = arith.constant 209 : index
    %c0_66 = arith.constant 0 : index
    %77 = tpu.strided_load %arg13[%c209, %c0_66] {strides = array<i32: 2, 1>} : memref<256x128xf32, #tpu.memory_space<vmem>>, vector<8x128xf32>
    %78 = arith.maximumf %74, %75 : vector<8x128xf32>
    %79 = arith.maximumf %76, %77 : vector<8x128xf32>
    %80 = arith.maximumf %78, %79 : vector<8x128xf32>
    %c64_67 = arith.constant 64 : index
    %c0_68 = arith.constant 0 : index
    %81 = vector.load %arg14[%c64_67, %c0_68] : memref<96x128xf32, #tpu.memory_space<vmem>>, vector<8x128xf32>
    tpu.vector_store %arg14[%c64_67, %c0_68], %80 {strides = array<i32>} : memref<96x128xf32, #tpu.memory_space<vmem>>, vector<8x128xf32>,
    %c224 = arith.constant 224 : index
    %c0_69 = arith.constant 0 : index
    %82 = tpu.strided_load %arg13[%c224, %c0_69] {strides = array<i32: 2, 1>} : memref<256x128xf32, #tpu.memory_space<vmem>>, vector<8x128xf32>
    %c225 = arith.constant 225 : index
    %c0_70 = arith.constant 0 : index
    %83 = tpu.strided_load %arg13[%c225, %c0_70] {strides = array<i32: 2, 1>} : memref<256x128xf32, #tpu.memory_space<vmem>>, vector<8x128xf32>
    %c240 = arith.constant 240 : index
    %c0_71 = arith.constant 0 : index
    %84 = tpu.strided_load %arg13[%c240, %c0_71] {strides = array<i32: 2, 1>} : memref<256x128xf32, #tpu.memory_space<vmem>>, vector<8x128xf32>
    %c241 = arith.constant 241 : index
    %c0_72 = arith.constant 0 : index
    %85 = tpu.strided_load %arg13[%c241, %c0_72] {strides = array<i32: 2, 1>} : memref<256x128xf32, #tpu.memory_space<vmem>>, vector<8x128xf32>
    %86 = arith.maximumf %82, %83 : vector<8x128xf32>
    %87 = arith.maximumf %84, %85 : vector<8x128xf32>
    %88 = arith.maximumf %86, %87 : vector<8x128xf32>
    %c72 = arith.constant 72 : index
    %c0_73 = arith.constant 0 : index
    %89 = vector.load %arg14[%c72, %c0_73] : memref<96x128xf32, #tpu.memory_space<vmem>>, vector<8x128xf32>
    tpu.vector_store %arg14[%c72, %c0_73], %88 {strides = array<i32>} : memref<96x128xf32, #tpu.memory_space<vmem>>, vector<8x128xf32>,
    %c0_74 = arith.constant 0 : index
    %c0_75 = arith.constant 0 : index
    %90 = vector.load %arg5[%c0_74, %c0_75] : memref<1x128xf32, #tpu.memory_space<vmem>>, vector<1x128xf32>
    %91 = tpu.iota {dimensions = array<i32: 0>} : vector<64x1xi32>
    %c0_i32 = arith.constant 0 : i32
    %92 = vector.broadcast %c0_i32 : i32 to vector<64x1xi32>
    %93 = arith.addi %91, %92 : vector<64x1xi32>
    %c8_i32 = arith.constant 8 : i32
    %c0_i32_76 = arith.constant 0 : i32
    %94 = arith.cmpi eq, %c8_i32, %c0_i32_76 : i32
    %c1_i32 = arith.constant 1 : i32
    %95 = arith.select %94, %c1_i32, %c8_i32 : i32
    %96 = vector.broadcast %95 : i32 to vector<64x1xi32>
    %97 = arith.remsi %93, %96 : vector<64x1xi32>
    %c0_i32_77 = arith.constant 0 : i32
    %98 = vector.broadcast %c0_i32_77 : i32 to vector<64x1xi32>
    %99 = arith.cmpi ne, %97, %98 : vector<64x1xi32>
    %c0_i32_78 = arith.constant 0 : i32
    %100 = vector.broadcast %c0_i32_78 : i32 to vector<64x1xi32>
    %101 = arith.cmpi slt, %97, %100 : vector<64x1xi32>
    %c0_i32_79 = arith.constant 0 : i32
    %102 = arith.cmpi slt, %95, %c0_i32_79 : i32
    %103 = vector.broadcast %102 : i1 to vector<64x1xi1>
    %104 = vector.broadcast %103 : vector<64x1xi1> to vector<64x1xi1>
    %105 = arith.xori %101, %104 : vector<64x1xi1>
    %106 = arith.andi %105, %99 : vector<64x1xi1>
    %107 = vector.broadcast %95 : i32 to vector<64x1xi32>
    %108 = arith.addi %97, %107 : vector<64x1xi32>
    %109 = arith.select %106, %108, %97 : vector<64x1xi1>, vector<64x1xi32>
    %c0_i32_80 = arith.constant 0 : i32
    %110 = vector.broadcast %c0_i32_80 : i32 to vector<64x1xi32>
    %111 = arith.cmpi ne, %109, %110 : vector<64x1xi32>
    %c7_i32 = arith.constant 7 : i32
    %112 = vector.broadcast %c7_i32 : i32 to vector<64x1xi32>
    %113 = arith.cmpi ne, %109, %112 : vector<64x1xi32>
    %cst_81 = arith.constant 0.000000e+00 : f32
    %114 = vector.broadcast %cst_81 : f32 to vector<64x128xf32>
    %c7 = arith.constant 7 : index
    %c0_82 = arith.constant 0 : index
    %115 = vector.load %arg14[%c7, %c0_82] : memref<96x128xf32, #tpu.memory_space<vmem>>, vector<64x128xf32>
    %cst_83 = arith.constant 0.000000e+00 : f32
    %116 = vector.shape_cast %111 : vector<64x1xi1> to vector<64x1xi1>
    %117 = vector.broadcast %116 : vector<64x1xi1> to vector<64x128xi1>
    %118 = vector.broadcast %cst_83 : f32 to vector<64x128xf32>
    %119 = arith.select %117, %115, %118 : vector<64x128xi1>, vector<64x128xf32>
    %120 = arith.truncf %119 : vector<64x128xf32> to vector<64x128xbf16>
    %c0_84 = arith.constant 0 : index
    %c0_85 = arith.constant 0 : index
    %c0_86 = arith.constant 0 : index
    %121 = vector.load %arg4[%c0_84, %c0_85, %c0_86] : memref<9x128x128xbf16, #tpu.memory_space<vmem>>, vector<1x128x128xbf16>
    %122 = vector.shape_cast %121 : vector<1x128x128xbf16> to vector<128x128xbf16>
    %cst_87 = arith.constant dense<0.000000e+00> : vector<64x128xf32>
    %123 = tpu.matmul %120, %122, %cst_87 {dimension_numbers = #tpu.dot_dimension_numbers<[1], [0], [0], [1], [0, 0, 1, 1], [], []>} : vector<64x128xbf16>, vector<128x128xbf16>, vector<64x128xf32> -> vector<64x128xf32>
    %124 = arith.addf %114, %123 : vector<64x128xf32>
    %c8 = arith.constant 8 : index
    %c0_88 = arith.constant 0 : index
    %125 = vector.load %arg14[%c8, %c0_88] : memref<96x128xf32, #tpu.memory_space<vmem>>, vector<64x128xf32>
    %126 = arith.truncf %125 : vector<64x128xf32> to vector<64x128xbf16>
    %c1_89 = arith.constant 1 : index
    %c0_90 = arith.constant 0 : index
    %c0_91 = arith.constant 0 : index
    %127 = vector.load %arg4[%c1_89, %c0_90, %c0_91] : memref<9x128x128xbf16, #tpu.memory_space<vmem>>, vector<1x128x128xbf16>
    %128 = vector.shape_cast %127 : vector<1x128x128xbf16> to vector<128x128xbf16>
    %cst_92 = arith.constant dense<0.000000e+00> : vector<64x128xf32>
    %129 = tpu.matmul %126, %128, %cst_92 {dimension_numbers = #tpu.dot_dimension_numbers<[1], [0], [0], [1], [0, 0, 1, 1], [], []>} : vector<64x128xbf16>, vector<128x128xbf16>, vector<64x128xf32> -> vector<64x128xf32>
    %130 = arith.addf %124, %129 : vector<64x128xf32>
    %c9 = arith.constant 9 : index
    %c0_93 = arith.constant 0 : index
    %131 = vector.load %arg14[%c9, %c0_93] : memref<96x128xf32, #tpu.memory_space<vmem>>, vector<64x128xf32>
    %cst_94 = arith.constant 0.000000e+00 : f32
    %132 = vector.shape_cast %113 : vector<64x1xi1> to vector<64x1xi1>
    %133 = vector.broadcast %132 : vector<64x1xi1> to vector<64x128xi1>
    %134 = vector.broadcast %cst_94 : f32 to vector<64x128xf32>
    %135 = arith.select %133, %131, %134 : vector<64x128xi1>, vector<64x128xf32>
    %136 = arith.truncf %135 : vector<64x128xf32> to vector<64x128xbf16>
    %c2 = arith.constant 2 : index
    %c0_95 = arith.constant 0 : index
    %c0_96 = arith.constant 0 : index
    %137 = vector.load %arg4[%c2, %c0_95, %c0_96] : memref<9x128x128xbf16, #tpu.memory_space<vmem>>, vector<1x128x128xbf16>
    %138 = vector.shape_cast %137 : vector<1x128x128xbf16> to vector<128x128xbf16>
    %cst_97 = arith.constant dense<0.000000e+00> : vector<64x128xf32>
    %139 = tpu.matmul %136, %138, %cst_97 {dimension_numbers = #tpu.dot_dimension_numbers<[1], [0], [0], [1], [0, 0, 1, 1], [], []>} : vector<64x128xbf16>, vector<128x128xbf16>, vector<64x128xf32> -> vector<64x128xf32>
    %140 = arith.addf %130, %139 : vector<64x128xf32>
    %c15 = arith.constant 15 : index
    %c0_98 = arith.constant 0 : index
    %141 = vector.load %arg14[%c15, %c0_98] : memref<96x128xf32, #tpu.memory_space<vmem>>, vector<64x128xf32>
    %cst_99 = arith.constant 0.000000e+00 : f32
    %142 = vector.shape_cast %111 : vector<64x1xi1> to vector<64x1xi1>
    %143 = vector.broadcast %142 : vector<64x1xi1> to vector<64x128xi1>
    %144 = vector.broadcast %cst_99 : f32 to vector<64x128xf32>
    %145 = arith.select %143, %141, %144 : vector<64x128xi1>, vector<64x128xf32>
    %146 = arith.truncf %145 : vector<64x128xf32> to vector<64x128xbf16>
    %c3 = arith.constant 3 : index
    %c0_100 = arith.constant 0 : index
    %c0_101 = arith.constant 0 : index
    %147 = vector.load %arg4[%c3, %c0_100, %c0_101] : memref<9x128x128xbf16, #tpu.memory_space<vmem>>, vector<1x128x128xbf16>
    %148 = vector.shape_cast %147 : vector<1x128x128xbf16> to vector<128x128xbf16>
    %cst_102 = arith.constant dense<0.000000e+00> : vector<64x128xf32>
    %149 = tpu.matmul %146, %148, %cst_102 {dimension_numbers = #tpu.dot_dimension_numbers<[1], [0], [0], [1], [0, 0, 1, 1], [], []>} : vector<64x128xbf16>, vector<128x128xbf16>, vector<64x128xf32> -> vector<64x128xf32>
    %150 = arith.addf %140, %149 : vector<64x128xf32>
    %c16_103 = arith.constant 16 : index
    %c0_104 = arith.constant 0 : index
    %151 = vector.load %arg14[%c16_103, %c0_104] : memref<96x128xf32, #tpu.memory_space<vmem>>, vector<64x128xf32>
    %152 = arith.truncf %151 : vector<64x128xf32> to vector<64x128xbf16>
    %c4 = arith.constant 4 : index
    %c0_105 = arith.constant 0 : index
    %c0_106 = arith.constant 0 : index
    %153 = vector.load %arg4[%c4, %c0_105, %c0_106] : memref<9x128x128xbf16, #tpu.memory_space<vmem>>, vector<1x128x128xbf16>
    %154 = vector.shape_cast %153 : vector<1x128x128xbf16> to vector<128x128xbf16>
    %cst_107 = arith.constant dense<0.000000e+00> : vector<64x128xf32>
    %155 = tpu.matmul %152, %154, %cst_107 {dimension_numbers = #tpu.dot_dimension_numbers<[1], [0], [0], [1], [0, 0, 1, 1], [], []>} : vector<64x128xbf16>, vector<128x128xbf16>, vector<64x128xf32> -> vector<64x128xf32>
    %156 = arith.addf %150, %155 : vector<64x128xf32>
    %c17_108 = arith.constant 17 : index
    %c0_109 = arith.constant 0 : index
    %157 = vector.load %arg14[%c17_108, %c0_109] : memref<96x128xf32, #tpu.memory_space<vmem>>, vector<64x128xf32>
    %cst_110 = arith.constant 0.000000e+00 : f32
    %158 = vector.shape_cast %113 : vector<64x1xi1> to vector<64x1xi1>
    %159 = vector.broadcast %158 : vector<64x1xi1> to vector<64x128xi1>
    %160 = vector.broadcast %cst_110 : f32 to vector<64x128xf32>
    %161 = arith.select %159, %157, %160 : vector<64x128xi1>, vector<64x128xf32>
    %162 = arith.truncf %161 : vector<64x128xf32> to vector<64x128xbf16>
    %c5 = arith.constant 5 : index
    %c0_111 = arith.constant 0 : index
    %c0_112 = arith.constant 0 : index
    %163 = vector.load %arg4[%c5, %c0_111, %c0_112] : memref<9x128x128xbf16, #tpu.memory_space<vmem>>, vector<1x128x128xbf16>
    %164 = vector.shape_cast %163 : vector<1x128x128xbf16> to vector<128x128xbf16>
    %cst_113 = arith.constant dense<0.000000e+00> : vector<64x128xf32>
    %165 = tpu.matmul %162, %164, %cst_113 {dimension_numbers = #tpu.dot_dimension_numbers<[1], [0], [0], [1], [0, 0, 1, 1], [], []>} : vector<64x128xbf16>, vector<128x128xbf16>, vector<64x128xf32> -> vector<64x128xf32>
    %166 = arith.addf %156, %165 : vector<64x128xf32>
    %c23 = arith.constant 23 : index
    %c0_114 = arith.constant 0 : index
    %167 = vector.load %arg14[%c23, %c0_114] : memref<96x128xf32, #tpu.memory_space<vmem>>, vector<64x128xf32>
    %cst_115 = arith.constant 0.000000e+00 : f32
    %168 = vector.shape_cast %111 : vector<64x1xi1> to vector<64x1xi1>
    %169 = vector.broadcast %168 : vector<64x1xi1> to vector<64x128xi1>
    %170 = vector.broadcast %cst_115 : f32 to vector<64x128xf32>
    %171 = arith.select %169, %167, %170 : vector<64x128xi1>, vector<64x128xf32>
    %172 = arith.truncf %171 : vector<64x128xf32> to vector<64x128xbf16>
    %c6 = arith.constant 6 : index
    %c0_116 = arith.constant 0 : index
    %c0_117 = arith.constant 0 : index
    %173 = vector.load %arg4[%c6, %c0_116, %c0_117] : memref<9x128x128xbf16, #tpu.memory_space<vmem>>, vector<1x128x128xbf16>
    %174 = vector.shape_cast %173 : vector<1x128x128xbf16> to vector<128x128xbf16>
    %cst_118 = arith.constant dense<0.000000e+00> : vector<64x128xf32>
    %175 = tpu.matmul %172, %174, %cst_118 {dimension_numbers = #tpu.dot_dimension_numbers<[1], [0], [0], [1], [0, 0, 1, 1], [], []>} : vector<64x128xbf16>, vector<128x128xbf16>, vector<64x128xf32> -> vector<64x128xf32>
    %176 = arith.addf %166, %175 : vector<64x128xf32>
    %c24_119 = arith.constant 24 : index
    %c0_120 = arith.constant 0 : index
    %177 = vector.load %arg14[%c24_119, %c0_120] : memref<96x128xf32, #tpu.memory_space<vmem>>, vector<64x128xf32>
    %178 = arith.truncf %177 : vector<64x128xf32> to vector<64x128xbf16>
    %c7_121 = arith.constant 7 : index
    %c0_122 = arith.constant 0 : index
    %c0_123 = arith.constant 0 : index
    %179 = vector.load %arg4[%c7_121, %c0_122, %c0_123] : memref<9x128x128xbf16, #tpu.memory_space<vmem>>, vector<1x128x128xbf16>
    %180 = vector.shape_cast %179 : vector<1x128x128xbf16> to vector<128x128xbf16>
    %cst_124 = arith.constant dense<0.000000e+00> : vector<64x128xf32>
    %181 = tpu.matmul %178, %180, %cst_124 {dimension_numbers = #tpu.dot_dimension_numbers<[1], [0], [0], [1], [0, 0, 1, 1], [], []>} : vector<64x128xbf16>, vector<128x128xbf16>, vector<64x128xf32> -> vector<64x128xf32>
    %182 = arith.addf %176, %181 : vector<64x128xf32>
    %c25 = arith.constant 25 : index
    %c0_125 = arith.constant 0 : index
    %183 = vector.load %arg14[%c25, %c0_125] : memref<96x128xf32, #tpu.memory_space<vmem>>, vector<64x128xf32>
    %cst_126 = arith.constant 0.000000e+00 : f32
    %184 = vector.shape_cast %113 : vector<64x1xi1> to vector<64x1xi1>
    %185 = vector.broadcast %184 : vector<64x1xi1> to vector<64x128xi1>
    %186 = vector.broadcast %cst_126 : f32 to vector<64x128xf32>
    %187 = arith.select %185, %183, %186 : vector<64x128xi1>, vector<64x128xf32>
    %188 = arith.truncf %187 : vector<64x128xf32> to vector<64x128xbf16>
    %c8_127 = arith.constant 8 : index
    %c0_128 = arith.constant 0 : index
    %c0_129 = arith.constant 0 : index
    %189 = vector.load %arg4[%c8_127, %c0_128, %c0_129] : memref<9x128x128xbf16, #tpu.memory_space<vmem>>, vector<1x128x128xbf16>
    %190 = vector.shape_cast %189 : vector<1x128x128xbf16> to vector<128x128xbf16>
    %cst_130 = arith.constant dense<0.000000e+00> : vector<64x128xf32>
    %191 = tpu.matmul %188, %190, %cst_130 {dimension_numbers = #tpu.dot_dimension_numbers<[1], [0], [0], [1], [0, 0, 1, 1], [], []>} : vector<64x128xbf16>, vector<128x128xbf16>, vector<64x128xf32> -> vector<64x128xf32>
    %192 = arith.addf %182, %191 : vector<64x128xf32>
    %193 = vector.broadcast %90 : vector<1x128xf32> to vector<64x128xf32>
    %194 = arith.addf %192, %193 : vector<64x128xf32>
    %cst_131 = arith.constant 0.000000e+00 : f32
    %195 = vector.broadcast %cst_131 : f32 to vector<64x128xf32>
    %196 = arith.maximumf %194, %195 : vector<64x128xf32>
    %c0_132 = arith.constant 0 : index
    %c0_133 = arith.constant 0 : index
    %197 = vector.load %arg13[%c0_132, %c0_133] : memref<256x128xf32, #tpu.memory_space<vmem>>, vector<64x128xf32>
    tpu.vector_store %arg13[%c0_132, %c0_133], %196 {strides = array<i32>} : memref<256x128xf32, #tpu.memory_space<vmem>>, vector<64x128xf32>,
    %c0_134 = arith.constant 0 : index
    %c0_135 = arith.constant 0 : index
    %198 = tpu.strided_load %arg13[%c0_134, %c0_135] {strides = array<i32: 2, 1>} : memref<256x128xf32, #tpu.memory_space<vmem>>, vector<4x128xf32>
    %c1_136 = arith.constant 1 : index
    %c0_137 = arith.constant 0 : index
    %199 = tpu.strided_load %arg13[%c1_136, %c0_137] {strides = array<i32: 2, 1>} : memref<256x128xf32, #tpu.memory_space<vmem>>, vector<4x128xf32>
    %c8_138 = arith.constant 8 : index
    %c0_139 = arith.constant 0 : index
    %200 = tpu.strided_load %arg13[%c8_138, %c0_139] {strides = array<i32: 2, 1>} : memref<256x128xf32, #tpu.memory_space<vmem>>, vector<4x128xf32>
    %c9_140 = arith.constant 9 : index
    %c0_141 = arith.constant 0 : index
    %201 = tpu.strided_load %arg13[%c9_140, %c0_141] {strides = array<i32: 2, 1>} : memref<256x128xf32, #tpu.memory_space<vmem>>, vector<4x128xf32>
    %202 = arith.maximumf %198, %199 : vector<4x128xf32>
    %203 = arith.maximumf %200, %201 : vector<4x128xf32>
    %204 = arith.maximumf %202, %203 : vector<4x128xf32>
    %c8_142 = arith.constant 8 : index
    %c0_143 = arith.constant 0 : index
    %205 = vector.load %arg15[%c8_142, %c0_143] : memref<32x128xf32, #tpu.memory_space<vmem>>, vector<4x128xf32>
    tpu.vector_store %arg15[%c8_142, %c0_143], %204 {strides = array<i32>} : memref<32x128xf32, #tpu.memory_space<vmem>>, vector<4x128xf32>,
    %c16_144 = arith.constant 16 : index
    %c0_145 = arith.constant 0 : index
    %206 = tpu.strided_load %arg13[%c16_144, %c0_145] {strides = array<i32: 2, 1>} : memref<256x128xf32, #tpu.memory_space<vmem>>, vector<4x128xf32>
    %c17_146 = arith.constant 17 : index
    %c0_147 = arith.constant 0 : index
    %207 = tpu.strided_load %arg13[%c17_146, %c0_147] {strides = array<i32: 2, 1>} : memref<256x128xf32, #tpu.memory_space<vmem>>, vector<4x128xf32>
    %c24_148 = arith.constant 24 : index
    %c0_149 = arith.constant 0 : index
    %208 = tpu.strided_load %arg13[%c24_148, %c0_149] {strides = array<i32: 2, 1>} : memref<256x128xf32, #tpu.memory_space<vmem>>, vector<4x128xf32>
    %c25_150 = arith.constant 25 : index
    %c0_151 = arith.constant 0 : index
    %209 = tpu.strided_load %arg13[%c25_150, %c0_151] {strides = array<i32: 2, 1>} : memref<256x128xf32, #tpu.memory_space<vmem>>, vector<4x128xf32>
    %210 = arith.maximumf %206, %207 : vector<4x128xf32>
    %211 = arith.maximumf %208, %209 : vector<4x128xf32>
    %212 = arith.maximumf %210, %211 : vector<4x128xf32>
    %c12 = arith.constant 12 : index
    %c0_152 = arith.constant 0 : index
    %213 = vector.load %arg15[%c12, %c0_152] : memref<32x128xf32, #tpu.memory_space<vmem>>, vector<4x128xf32>
    tpu.vector_store %arg15[%c12, %c0_152], %212 {strides = array<i32>} : memref<32x128xf32, #tpu.memory_space<vmem>>, vector<4x128xf32>,
    %c32_153 = arith.constant 32 : index
    %c0_154 = arith.constant 0 : index
    %214 = tpu.strided_load %arg13[%c32_153, %c0_154] {strides = array<i32: 2, 1>} : memref<256x128xf32, #tpu.memory_space<vmem>>, vector<4x128xf32>
    %c33_155 = arith.constant 33 : index
    %c0_156 = arith.constant 0 : index
    %215 = tpu.strided_load %arg13[%c33_155, %c0_156] {strides = array<i32: 2, 1>} : memref<256x128xf32, #tpu.memory_space<vmem>>, vector<4x128xf32>
    %c40_157 = arith.constant 40 : index
    %c0_158 = arith.constant 0 : index
    %216 = tpu.strided_load %arg13[%c40_157, %c0_158] {strides = array<i32: 2, 1>} : memref<256x128xf32, #tpu.memory_space<vmem>>, vector<4x128xf32>
    %c41 = arith.constant 41 : index
    %c0_159 = arith.constant 0 : index
    %217 = tpu.strided_load %arg13[%c41, %c0_159] {strides = array<i32: 2, 1>} : memref<256x128xf32, #tpu.memory_space<vmem>>, vector<4x128xf32>
    %218 = arith.maximumf %214, %215 : vector<4x128xf32>
    %219 = arith.maximumf %216, %217 : vector<4x128xf32>
    %220 = arith.maximumf %218, %219 : vector<4x128xf32>
    %c16_160 = arith.constant 16 : index
    %c0_161 = arith.constant 0 : index
    %221 = vector.load %arg15[%c16_160, %c0_161] : memref<32x128xf32, #tpu.memory_space<vmem>>, vector<4x128xf32>
    tpu.vector_store %arg15[%c16_160, %c0_161], %220 {strides = array<i32>} : memref<32x128xf32, #tpu.memory_space<vmem>>, vector<4x128xf32>,
    %c48_162 = arith.constant 48 : index
    %c0_163 = arith.constant 0 : index
    %222 = tpu.strided_load %arg13[%c48_162, %c0_163] {strides = array<i32: 2, 1>} : memref<256x128xf32, #tpu.memory_space<vmem>>, vector<4x128xf32>
    %c49_164 = arith.constant 49 : index
    %c0_165 = arith.constant 0 : index
    %223 = tpu.strided_load %arg13[%c49_164, %c0_165] {strides = array<i32: 2, 1>} : memref<256x128xf32, #tpu.memory_space<vmem>>, vector<4x128xf32>
    %c56_166 = arith.constant 56 : index
    %c0_167 = arith.constant 0 : index
    %224 = tpu.strided_load %arg13[%c56_166, %c0_167] {strides = array<i32: 2, 1>} : memref<256x128xf32, #tpu.memory_space<vmem>>, vector<4x128xf32>
    %c57 = arith.constant 57 : index
    %c0_168 = arith.constant 0 : index
    %225 = tpu.strided_load %arg13[%c57, %c0_168] {strides = array<i32: 2, 1>} : memref<256x128xf32, #tpu.memory_space<vmem>>, vector<4x128xf32>
    %226 = arith.maximumf %222, %223 : vector<4x128xf32>
    %227 = arith.maximumf %224, %225 : vector<4x128xf32>
    %228 = arith.maximumf %226, %227 : vector<4x128xf32>
    %c20 = arith.constant 20 : index
    %c0_169 = arith.constant 0 : index
    %229 = vector.load %arg15[%c20, %c0_169] : memref<32x128xf32, #tpu.memory_space<vmem>>, vector<4x128xf32>
    tpu.vector_store %arg15[%c20, %c0_169], %228 {strides = array<i32>} : memref<32x128xf32, #tpu.memory_space<vmem>>, vector<4x128xf32>,
    %c0_170 = arith.constant 0 : index
    %c0_171 = arith.constant 0 : index
    %230 = vector.load %arg7[%c0_170, %c0_171] : memref<1x128xf32, #tpu.memory_space<vmem>>, vector<1x128xf32>
    %231 = tpu.iota {dimensions = array<i32: 0>} : vector<16x1xi32>
    %c0_i32_172 = arith.constant 0 : i32
    %232 = vector.broadcast %c0_i32_172 : i32 to vector<16x1xi32>
    %233 = arith.addi %231, %232 : vector<16x1xi32>
    %c4_i32 = arith.constant 4 : i32
    %c0_i32_173 = arith.constant 0 : i32
    %234 = arith.cmpi eq, %c4_i32, %c0_i32_173 : i32
    %c1_i32_174 = arith.constant 1 : i32
    %235 = arith.select %234, %c1_i32_174, %c4_i32 : i32
    %236 = vector.broadcast %235 : i32 to vector<16x1xi32>
    %237 = arith.remsi %233, %236 : vector<16x1xi32>
    %c0_i32_175 = arith.constant 0 : i32
    %238 = vector.broadcast %c0_i32_175 : i32 to vector<16x1xi32>
    %239 = arith.cmpi ne, %237, %238 : vector<16x1xi32>
    %c0_i32_176 = arith.constant 0 : i32
    %240 = vector.broadcast %c0_i32_176 : i32 to vector<16x1xi32>
    %241 = arith.cmpi slt, %237, %240 : vector<16x1xi32>
    %c0_i32_177 = arith.constant 0 : i32
    %242 = arith.cmpi slt, %235, %c0_i32_177 : i32
    %243 = vector.broadcast %242 : i1 to vector<16x1xi1>
    %244 = vector.broadcast %243 : vector<16x1xi1> to vector<16x1xi1>
    %245 = arith.xori %241, %244 : vector<16x1xi1>
    %246 = arith.andi %245, %239 : vector<16x1xi1>
    %247 = vector.broadcast %235 : i32 to vector<16x1xi32>
    %248 = arith.addi %237, %247 : vector<16x1xi32>
    %249 = arith.select %246, %248, %237 : vector<16x1xi1>, vector<16x1xi32>
    %c0_i32_178 = arith.constant 0 : i32
    %250 = vector.broadcast %c0_i32_178 : i32 to vector<16x1xi32>
    %251 = arith.cmpi ne, %249, %250 : vector<16x1xi32>
    %c3_i32 = arith.constant 3 : i32
    %252 = vector.broadcast %c3_i32 : i32 to vector<16x1xi32>
    %253 = arith.cmpi ne, %249, %252 : vector<16x1xi32>
    %cst_179 = arith.constant 0.000000e+00 : f32
    %254 = vector.broadcast %cst_179 : f32 to vector<16x128xf32>
    %c3_180 = arith.constant 3 : index
    %c0_181 = arith.constant 0 : index
    %255 = vector.load %arg15[%c3_180, %c0_181] : memref<32x128xf32, #tpu.memory_space<vmem>>, vector<16x128xf32>
    %cst_182 = arith.constant 0.000000e+00 : f32
    %256 = vector.shape_cast %251 : vector<16x1xi1> to vector<16x1xi1>
    %257 = vector.broadcast %256 : vector<16x1xi1> to vector<16x128xi1>
    %258 = vector.broadcast %cst_182 : f32 to vector<16x128xf32>
    %259 = arith.select %257, %255, %258 : vector<16x128xi1>, vector<16x128xf32>
    %260 = arith.truncf %259 : vector<16x128xf32> to vector<16x128xbf16>
    %c0_183 = arith.constant 0 : index
    %c0_184 = arith.constant 0 : index
    %c0_185 = arith.constant 0 : index
    %261 = vector.load %arg6[%c0_183, %c0_184, %c0_185] : memref<9x128x128xbf16, #tpu.memory_space<vmem>>, vector<1x128x128xbf16>
    %262 = vector.shape_cast %261 : vector<1x128x128xbf16> to vector<128x128xbf16>
    %cst_186 = arith.constant dense<0.000000e+00> : vector<16x128xf32>
    %263 = tpu.matmul %260, %262, %cst_186 {dimension_numbers = #tpu.dot_dimension_numbers<[1], [0], [0], [1], [0, 0, 1, 1], [], []>} : vector<16x128xbf16>, vector<128x128xbf16>, vector<16x128xf32> -> vector<16x128xf32>
    %264 = arith.addf %254, %263 : vector<16x128xf32>
    %c4_187 = arith.constant 4 : index
    %c0_188 = arith.constant 0 : index
    %265 = vector.load %arg15[%c4_187, %c0_188] : memref<32x128xf32, #tpu.memory_space<vmem>>, vector<16x128xf32>
    %266 = arith.truncf %265 : vector<16x128xf32> to vector<16x128xbf16>
    %c1_189 = arith.constant 1 : index
    %c0_190 = arith.constant 0 : index
    %c0_191 = arith.constant 0 : index
    %267 = vector.load %arg6[%c1_189, %c0_190, %c0_191] : memref<9x128x128xbf16, #tpu.memory_space<vmem>>, vector<1x128x128xbf16>
    %268 = vector.shape_cast %267 : vector<1x128x128xbf16> to vector<128x128xbf16>
    %cst_192 = arith.constant dense<0.000000e+00> : vector<16x128xf32>
    %269 = tpu.matmul %266, %268, %cst_192 {dimension_numbers = #tpu.dot_dimension_numbers<[1], [0], [0], [1], [0, 0, 1, 1], [], []>} : vector<16x128xbf16>, vector<128x128xbf16>, vector<16x128xf32> -> vector<16x128xf32>
    %270 = arith.addf %264, %269 : vector<16x128xf32>
    %c5_193 = arith.constant 5 : index
    %c0_194 = arith.constant 0 : index
    %271 = vector.load %arg15[%c5_193, %c0_194] : memref<32x128xf32, #tpu.memory_space<vmem>>, vector<16x128xf32>
    %cst_195 = arith.constant 0.000000e+00 : f32
    %272 = vector.shape_cast %253 : vector<16x1xi1> to vector<16x1xi1>
    %273 = vector.broadcast %272 : vector<16x1xi1> to vector<16x128xi1>
    %274 = vector.broadcast %cst_195 : f32 to vector<16x128xf32>
    %275 = arith.select %273, %271, %274 : vector<16x128xi1>, vector<16x128xf32>
    %276 = arith.truncf %275 : vector<16x128xf32> to vector<16x128xbf16>
    %c2_196 = arith.constant 2 : index
    %c0_197 = arith.constant 0 : index
    %c0_198 = arith.constant 0 : index
    %277 = vector.load %arg6[%c2_196, %c0_197, %c0_198] : memref<9x128x128xbf16, #tpu.memory_space<vmem>>, vector<1x128x128xbf16>
    %278 = vector.shape_cast %277 : vector<1x128x128xbf16> to vector<128x128xbf16>
    %cst_199 = arith.constant dense<0.000000e+00> : vector<16x128xf32>
    %279 = tpu.matmul %276, %278, %cst_199 {dimension_numbers = #tpu.dot_dimension_numbers<[1], [0], [0], [1], [0, 0, 1, 1], [], []>} : vector<16x128xbf16>, vector<128x128xbf16>, vector<16x128xf32> -> vector<16x128xf32>
    %280 = arith.addf %270, %279 : vector<16x128xf32>
    %c7_200 = arith.constant 7 : index
    %c0_201 = arith.constant 0 : index
    %281 = vector.load %arg15[%c7_200, %c0_201] : memref<32x128xf32, #tpu.memory_space<vmem>>, vector<16x128xf32>
    %cst_202 = arith.constant 0.000000e+00 : f32
    %282 = vector.shape_cast %251 : vector<16x1xi1> to vector<16x1xi1>
    %283 = vector.broadcast %282 : vector<16x1xi1> to vector<16x128xi1>
    %284 = vector.broadcast %cst_202 : f32 to vector<16x128xf32>
    %285 = arith.select %283, %281, %284 : vector<16x128xi1>, vector<16x128xf32>
    %286 = arith.truncf %285 : vector<16x128xf32> to vector<16x128xbf16>
    %c3_203 = arith.constant 3 : index
    %c0_204 = arith.constant 0 : index
    %c0_205 = arith.constant 0 : index
    %287 = vector.load %arg6[%c3_203, %c0_204, %c0_205] : memref<9x128x128xbf16, #tpu.memory_space<vmem>>, vector<1x128x128xbf16>
    %288 = vector.shape_cast %287 : vector<1x128x128xbf16> to vector<128x128xbf16>
    %cst_206 = arith.constant dense<0.000000e+00> : vector<16x128xf32>
    %289 = tpu.matmul %286, %288, %cst_206 {dimension_numbers = #tpu.dot_dimension_numbers<[1], [0], [0], [1], [0, 0, 1, 1], [], []>} : vector<16x128xbf16>, vector<128x128xbf16>, vector<16x128xf32> -> vector<16x128xf32>
    %290 = arith.addf %280, %289 : vector<16x128xf32>
    %c8_207 = arith.constant 8 : index
    %c0_208 = arith.constant 0 : index
    %291 = vector.load %arg15[%c8_207, %c0_208] : memref<32x128xf32, #tpu.memory_space<vmem>>, vector<16x128xf32>
    %292 = arith.truncf %291 : vector<16x128xf32> to vector<16x128xbf16>
    %c4_209 = arith.constant 4 : index
    %c0_210 = arith.constant 0 : index
    %c0_211 = arith.constant 0 : index
    %293 = vector.load %arg6[%c4_209, %c0_210, %c0_211] : memref<9x128x128xbf16, #tpu.memory_space<vmem>>, vector<1x128x128xbf16>
    %294 = vector.shape_cast %293 : vector<1x128x128xbf16> to vector<128x128xbf16>
    %cst_212 = arith.constant dense<0.000000e+00> : vector<16x128xf32>
    %295 = tpu.matmul %292, %294, %cst_212 {dimension_numbers = #tpu.dot_dimension_numbers<[1], [0], [0], [1], [0, 0, 1, 1], [], []>} : vector<16x128xbf16>, vector<128x128xbf16>, vector<16x128xf32> -> vector<16x128xf32>
    %296 = arith.addf %290, %295 : vector<16x128xf32>
    %c9_213 = arith.constant 9 : index
    %c0_214 = arith.constant 0 : index
    %297 = vector.load %arg15[%c9_213, %c0_214] : memref<32x128xf32, #tpu.memory_space<vmem>>, vector<16x128xf32>
    %cst_215 = arith.constant 0.000000e+00 : f32
    %298 = vector.shape_cast %253 : vector<16x1xi1> to vector<16x1xi1>
    %299 = vector.broadcast %298 : vector<16x1xi1> to vector<16x128xi1>
    %300 = vector.broadcast %cst_215 : f32 to vector<16x128xf32>
    %301 = arith.select %299, %297, %300 : vector<16x128xi1>, vector<16x128xf32>
    %302 = arith.truncf %301 : vector<16x128xf32> to vector<16x128xbf16>
    %c5_216 = arith.constant 5 : index
    %c0_217 = arith.constant 0 : index
    %c0_218 = arith.constant 0 : index
    %303 = vector.load %arg6[%c5_216, %c0_217, %c0_218] : memref<9x128x128xbf16, #tpu.memory_space<vmem>>, vector<1x128x128xbf16>
    %304 = vector.shape_cast %303 : vector<1x128x128xbf16> to vector<128x128xbf16>
    %cst_219 = arith.constant dense<0.000000e+00> : vector<16x128xf32>
    %305 = tpu.matmul %302, %304, %cst_219 {dimension_numbers = #tpu.dot_dimension_numbers<[1], [0], [0], [1], [0, 0, 1, 1], [], []>} : vector<16x128xbf16>, vector<128x128xbf16>, vector<16x128xf32> -> vector<16x128xf32>
    %306 = arith.addf %296, %305 : vector<16x128xf32>
    %c11 = arith.constant 11 : index
    %c0_220 = arith.constant 0 : index
    %307 = vector.load %arg15[%c11, %c0_220] : memref<32x128xf32, #tpu.memory_space<vmem>>, vector<16x128xf32>
    %cst_221 = arith.constant 0.000000e+00 : f32
    %308 = vector.shape_cast %251 : vector<16x1xi1> to vector<16x1xi1>
    %309 = vector.broadcast %308 : vector<16x1xi1> to vector<16x128xi1>
    %310 = vector.broadcast %cst_221 : f32 to vector<16x128xf32>
    %311 = arith.select %309, %307, %310 : vector<16x128xi1>, vector<16x128xf32>
    %312 = arith.truncf %311 : vector<16x128xf32> to vector<16x128xbf16>
    %c6_222 = arith.constant 6 : index
    %c0_223 = arith.constant 0 : index
    %c0_224 = arith.constant 0 : index
    %313 = vector.load %arg6[%c6_222, %c0_223, %c0_224] : memref<9x128x128xbf16, #tpu.memory_space<vmem>>, vector<1x128x128xbf16>
    %314 = vector.shape_cast %313 : vector<1x128x128xbf16> to vector<128x128xbf16>
    %cst_225 = arith.constant dense<0.000000e+00> : vector<16x128xf32>
    %315 = tpu.matmul %312, %314, %cst_225 {dimension_numbers = #tpu.dot_dimension_numbers<[1], [0], [0], [1], [0, 0, 1, 1], [], []>} : vector<16x128xbf16>, vector<128x128xbf16>, vector<16x128xf32> -> vector<16x128xf32>
    %316 = arith.addf %306, %315 : vector<16x128xf32>
    %c12_226 = arith.constant 12 : index
    %c0_227 = arith.constant 0 : index
    %317 = vector.load %arg15[%c12_226, %c0_227] : memref<32x128xf32, #tpu.memory_space<vmem>>, vector<16x128xf32>
    %318 = arith.truncf %317 : vector<16x128xf32> to vector<16x128xbf16>
    %c7_228 = arith.constant 7 : index
    %c0_229 = arith.constant 0 : index
    %c0_230 = arith.constant 0 : index
    %319 = vector.load %arg6[%c7_228, %c0_229, %c0_230] : memref<9x128x128xbf16, #tpu.memory_space<vmem>>, vector<1x128x128xbf16>
    %320 = vector.shape_cast %319 : vector<1x128x128xbf16> to vector<128x128xbf16>
    %cst_231 = arith.constant dense<0.000000e+00> : vector<16x128xf32>
    %321 = tpu.matmul %318, %320, %cst_231 {dimension_numbers = #tpu.dot_dimension_numbers<[1], [0], [0], [1], [0, 0, 1, 1], [], []>} : vector<16x128xbf16>, vector<128x128xbf16>, vector<16x128xf32> -> vector<16x128xf32>
    %322 = arith.addf %316, %321 : vector<16x128xf32>
    %c13 = arith.constant 13 : index
    %c0_232 = arith.constant 0 : index
    %323 = vector.load %arg15[%c13, %c0_232] : memref<32x128xf32, #tpu.memory_space<vmem>>, vector<16x128xf32>
    %cst_233 = arith.constant 0.000000e+00 : f32
    %324 = vector.shape_cast %253 : vector<16x1xi1> to vector<16x1xi1>
    %325 = vector.broadcast %324 : vector<16x1xi1> to vector<16x128xi1>
    %326 = vector.broadcast %cst_233 : f32 to vector<16x128xf32>
    %327 = arith.select %325, %323, %326 : vector<16x128xi1>, vector<16x128xf32>
    %328 = arith.truncf %327 : vector<16x128xf32> to vector<16x128xbf16>
    %c8_234 = arith.constant 8 : index
    %c0_235 = arith.constant 0 : index
    %c0_236 = arith.constant 0 : index
    %329 = vector.load %arg6[%c8_234, %c0_235, %c0_236] : memref<9x128x128xbf16, #tpu.memory_space<vmem>>, vector<1x128x128xbf16>
    %330 = vector.shape_cast %329 : vector<1x128x128xbf16> to vector<128x128xbf16>
    %cst_237 = arith.constant dense<0.000000e+00> : vector<16x128xf32>
    %331 = tpu.matmul %328, %330, %cst_237 {dimension_numbers = #tpu.dot_dimension_numbers<[1], [0], [0], [1], [0, 0, 1, 1], [], []>} : vector<16x128xbf16>, vector<128x128xbf16>, vector<16x128xf32> -> vector<16x128xf32>
    %332 = arith.addf %322, %331 : vector<16x128xf32>
    %333 = vector.broadcast %230 : vector<1x128xf32> to vector<16x128xf32>
    %334 = arith.addf %332, %333 : vector<16x128xf32>
    %cst_238 = arith.constant 0.000000e+00 : f32
    %335 = vector.broadcast %cst_238 : f32 to vector<16x128xf32>
    %336 = arith.maximumf %334, %335 : vector<16x128xf32>
    %c0_239 = arith.constant 0 : index
    %c0_240 = arith.constant 0 : index
    %337 = vector.load %arg13[%c0_239, %c0_240] : memref<256x128xf32, #tpu.memory_space<vmem>>, vector<16x128xf32>
    tpu.vector_store %arg13[%c0_239, %c0_240], %336 {strides = array<i32>} : memref<256x128xf32, #tpu.memory_space<vmem>>, vector<16x128xf32>,
    %c0_241 = arith.constant 0 : index
    %c0_242 = arith.constant 0 : index
    %338 = tpu.strided_load %arg13[%c0_241, %c0_242] {strides = array<i32: 2, 1>} : memref<256x128xf32, #tpu.memory_space<vmem>>, vector<2x128xf32>
    %c1_243 = arith.constant 1 : index
    %c0_244 = arith.constant 0 : index
    %339 = tpu.strided_load %arg13[%c1_243, %c0_244] {strides = array<i32: 2, 1>} : memref<256x128xf32, #tpu.memory_space<vmem>>, vector<2x128xf32>
    %c4_245 = arith.constant 4 : index
    %c0_246 = arith.constant 0 : index
    %340 = tpu.strided_load %arg13[%c4_245, %c0_246] {strides = array<i32: 2, 1>} : memref<256x128xf32, #tpu.memory_space<vmem>>, vector<2x128xf32>
    %c5_247 = arith.constant 5 : index
    %c0_248 = arith.constant 0 : index
    %341 = tpu.strided_load %arg13[%c5_247, %c0_248] {strides = array<i32: 2, 1>} : memref<256x128xf32, #tpu.memory_space<vmem>>, vector<2x128xf32>
    %342 = arith.maximumf %338, %339 : vector<2x128xf32>
    %343 = arith.maximumf %340, %341 : vector<2x128xf32>
    %344 = arith.maximumf %342, %343 : vector<2x128xf32>
    %345 = vector.extract_strided_slice %344 {offsets = [0, 0], sizes = [1, 128], strides = [1, 1]} : vector<2x128xf32> to vector<1x128xf32>
    %c0_249 = arith.constant 0 : index
    %c0_250 = arith.constant 0 : index
    %346 = vector.load %arg16[%c0_249, %c0_250] : memref<8x512xf32, #tpu.memory_space<vmem>>, vector<1x128xf32>
    tpu.vector_store %arg16[%c0_249, %c0_250], %345 {strides = array<i32>} : memref<8x512xf32, #tpu.memory_space<vmem>>, vector<1x128xf32>,
    %347 = vector.extract_strided_slice %344 {offsets = [1, 0], sizes = [1, 128], strides = [1, 1]} : vector<2x128xf32> to vector<1x128xf32>
    %c0_251 = arith.constant 0 : index
    %c128_252 = arith.constant 128 : index
    %348 = vector.load %arg16[%c0_251, %c128_252] : memref<8x512xf32, #tpu.memory_space<vmem>>, vector<1x128xf32>
    tpu.vector_store %arg16[%c0_251, %c128_252], %347 {strides = array<i32>} : memref<8x512xf32, #tpu.memory_space<vmem>>, vector<1x128xf32>,
    %c8_253 = arith.constant 8 : index
    %c0_254 = arith.constant 0 : index
    %349 = tpu.strided_load %arg13[%c8_253, %c0_254] {strides = array<i32: 2, 1>} : memref<256x128xf32, #tpu.memory_space<vmem>>, vector<2x128xf32>
    %c9_255 = arith.constant 9 : index
    %c0_256 = arith.constant 0 : index
    %350 = tpu.strided_load %arg13[%c9_255, %c0_256] {strides = array<i32: 2, 1>} : memref<256x128xf32, #tpu.memory_space<vmem>>, vector<2x128xf32>
    %c12_257 = arith.constant 12 : index
    %c0_258 = arith.constant 0 : index
    %351 = tpu.strided_load %arg13[%c12_257, %c0_258] {strides = array<i32: 2, 1>} : memref<256x128xf32, #tpu.memory_space<vmem>>, vector<2x128xf32>
    %c13_259 = arith.constant 13 : index
    %c0_260 = arith.constant 0 : index
    %352 = tpu.strided_load %arg13[%c13_259, %c0_260] {strides = array<i32: 2, 1>} : memref<256x128xf32, #tpu.memory_space<vmem>>, vector<2x128xf32>
    %353 = arith.maximumf %349, %350 : vector<2x128xf32>
    %354 = arith.maximumf %351, %352 : vector<2x128xf32>
    %355 = arith.maximumf %353, %354 : vector<2x128xf32>
    %356 = vector.extract_strided_slice %355 {offsets = [0, 0], sizes = [1, 128], strides = [1, 1]} : vector<2x128xf32> to vector<1x128xf32>
    %c0_261 = arith.constant 0 : index
    %c256 = arith.constant 256 : index
    %357 = vector.load %arg16[%c0_261, %c256] : memref<8x512xf32, #tpu.memory_space<vmem>>, vector<1x128xf32>
    tpu.vector_store %arg16[%c0_261, %c256], %356 {strides = array<i32>} : memref<8x512xf32, #tpu.memory_space<vmem>>, vector<1x128xf32>,
    %358 = vector.extract_strided_slice %355 {offsets = [1, 0], sizes = [1, 128], strides = [1, 1]} : vector<2x128xf32> to vector<1x128xf32>
    %c0_262 = arith.constant 0 : index
    %c384 = arith.constant 384 : index
    %359 = vector.load %arg16[%c0_262, %c384] : memref<8x512xf32, #tpu.memory_space<vmem>>, vector<1x128xf32>
    tpu.vector_store %arg16[%c0_262, %c384], %358 {strides = array<i32>} : memref<8x512xf32, #tpu.memory_space<vmem>>, vector<1x128xf32>,
    %c0_263 = arith.constant 0 : index
    %c0_264 = arith.constant 0 : index
    %360 = vector.load %arg16[%c0_263, %c0_264] : memref<8x512xf32, #tpu.memory_space<vmem>>, vector<8x512xf32>
    %361 = arith.truncf %360 : vector<8x512xf32> to vector<8x512xbf16>
    %c0_265 = arith.constant 0 : index
    %c0_266 = arith.constant 0 : index
    %362 = vector.load %arg8[%c0_265, %c0_266] : memref<512x128xbf16, #tpu.memory_space<vmem>>, vector<512x128xbf16>
    %cst_267 = arith.constant dense<0.000000e+00> : vector<8x128xf32>
    %363 = tpu.matmul %361, %362, %cst_267 {dimension_numbers = #tpu.dot_dimension_numbers<[1], [0], [0], [1], [0, 0, 1, 1], [], []>} : vector<8x512xbf16>, vector<512x128xbf16>, vector<8x128xf32> -> vector<8x128xf32>
    %c0_268 = arith.constant 0 : index
    %c0_269 = arith.constant 0 : index
    %364 = vector.load %arg9[%c0_268, %c0_269] : memref<1x128xf32, #tpu.memory_space<vmem>>, vector<1x128xf32>
    %365 = vector.broadcast %364 : vector<1x128xf32> to vector<8x128xf32>
    %366 = arith.addf %363, %365 : vector<8x128xf32>
    %cst_270 = arith.constant 0.000000e+00 : f32
    %367 = vector.broadcast %cst_270 : f32 to vector<8x128xf32>
    %368 = arith.maximumf %366, %367 : vector<8x128xf32>
    %369 = arith.truncf %368 : vector<8x128xf32> to vector<8x128xbf16>
    %c0_271 = arith.constant 0 : index
    %c0_272 = arith.constant 0 : index
    %370 = vector.load %arg10[%c0_271, %c0_272] : memref<128x128xbf16, #tpu.memory_space<vmem>>, vector<128x128xbf16>
    %cst_273 = arith.constant dense<0.000000e+00> : vector<8x128xf32>
    %371 = tpu.matmul %369, %370, %cst_273 {dimension_numbers = #tpu.dot_dimension_numbers<[1], [0], [0], [1], [0, 0, 1, 1], [], []>} : vector<8x128xbf16>, vector<128x128xbf16>, vector<8x128xf32> -> vector<8x128xf32>
    %c0_274 = arith.constant 0 : index
    %c0_275 = arith.constant 0 : index
    %372 = vector.load %arg11[%c0_274, %c0_275] : memref<1x128xf32, #tpu.memory_space<vmem>>, vector<1x128xf32>
    %373 = vector.broadcast %372 : vector<1x128xf32> to vector<8x128xf32>
    %374 = arith.addf %371, %373 : vector<8x128xf32>
    %375 = arith.mulf %374, %374 : vector<8x128xf32>
    %cst_276 = arith.constant dense<0.000000e+00> : vector<8xf32>
    %376 = vector.multi_reduction <add>, %375, %cst_276 [1] : vector<8x128xf32> to vector<8xf32>
    %377 = vector.shape_cast %376 : vector<8xf32> to vector<8x1xf32>
    %cst_277 = arith.constant 1.000000e-24 : f32
    %378 = vector.broadcast %cst_277 : f32 to vector<8x1xf32>
    %379 = arith.maximumf %377, %378 : vector<8x1xf32>
    %380 = math.rsqrt %379 : vector<8x1xf32>
    %381 = vector.broadcast %380 : vector<8x1xf32> to vector<8x128xf32>
    %382 = arith.mulf %374, %381 : vector<8x128xf32>
    %383 = vector.extract_strided_slice %382 {offsets = [0, 0], sizes = [1, 128], strides = [1, 1]} : vector<8x128xf32> to vector<1x128xf32>
    %c0_278 = arith.constant 0 : index
    %c0_279 = arith.constant 0 : index
    %c0_280 = arith.constant 0 : index
    %384 = vector.load %arg12[%c0_278, %c0_279, %c0_280] : memref<1x1x128xf32, #tpu.memory_space<vmem>>, vector<1x1x128xf32>
    %385 = vector.shape_cast %384 : vector<1x1x128xf32> to vector<1x128xf32>
    %386 = vector.shape_cast %383 : vector<1x128xf32> to vector<1x1x128xf32>
    tpu.vector_store %arg12[%c0_278, %c0_279, %c0_280], %386 {strides = array<i32>} : memref<1x1x128xf32, #tpu.memory_space<vmem>>, vector<1x1x128xf32>,
    return
  }
  func.func @transform_0(%arg0: i32) -> (i32, i32, i32) {
    %c0_i32 = arith.constant 0 : i32
    %c0_i32_0 = arith.constant 0 : i32
    %c0_i32_1 = arith.constant 0 : i32
    return %arg0, %c0_i32, %c0_i32_0 : i32, i32, i32
  }
  func.func @transform_1(%arg0: i32) -> (i32, i32) {
    %c0_i32 = arith.constant 0 : i32
    %c0_i32_0 = arith.constant 0 : i32
    %c0_i32_1 = arith.constant 0 : i32
    return %c0_i32, %c0_i32_0 : i32, i32
  }
  func.func @transform_2(%arg0: i32) -> (i32, i32) {
    %c0_i32 = arith.constant 0 : i32
    %c0_i32_0 = arith.constant 0 : i32
    %c0_i32_1 = arith.constant 0 : i32
    return %c0_i32, %c0_i32_0 : i32, i32
  }
  func.func @transform_3(%arg0: i32) -> (i32, i32, i32) {
    %c0_i32 = arith.constant 0 : i32
    %c0_i32_0 = arith.constant 0 : i32
    %c0_i32_1 = arith.constant 0 : i32
    %c0_i32_2 = arith.constant 0 : i32
    return %c0_i32, %c0_i32_0, %c0_i32_1 : i32, i32, i32
  }
  func.func @transform_4(%arg0: i32) -> (i32, i32) {
    %c0_i32 = arith.constant 0 : i32
    %c0_i32_0 = arith.constant 0 : i32
    %c0_i32_1 = arith.constant 0 : i32
    return %c0_i32, %c0_i32_0 : i32, i32
  }
  func.func @transform_5(%arg0: i32) -> (i32, i32, i32) {
    %c0_i32 = arith.constant 0 : i32
    %c0_i32_0 = arith.constant 0 : i32
    %c0_i32_1 = arith.constant 0 : i32
    %c0_i32_2 = arith.constant 0 : i32
    return %c0_i32, %c0_i32_0, %c0_i32_1 : i32, i32, i32
  }
  func.func @transform_6(%arg0: i32) -> (i32, i32) {
    %c0_i32 = arith.constant 0 : i32
    %c0_i32_0 = arith.constant 0 : i32
    %c0_i32_1 = arith.constant 0 : i32
    return %c0_i32, %c0_i32_0 : i32, i32
  }
  func.func @transform_7(%arg0: i32) -> (i32, i32) {
    %c0_i32 = arith.constant 0 : i32
    %c0_i32_0 = arith.constant 0 : i32
    %c0_i32_1 = arith.constant 0 : i32
    return %c0_i32, %c0_i32_0 : i32, i32
  }
  func.func @transform_8(%arg0: i32) -> (i32, i32) {
    %c0_i32 = arith.constant 0 : i32
    %c0_i32_0 = arith.constant 0 : i32
    %c0_i32_1 = arith.constant 0 : i32
    return %c0_i32, %c0_i32_0 : i32, i32
  }
  func.func @transform_9(%arg0: i32) -> (i32, i32) {
    %c0_i32 = arith.constant 0 : i32
    %c0_i32_0 = arith.constant 0 : i32
    %c0_i32_1 = arith.constant 0 : i32
    return %c0_i32, %c0_i32_0 : i32, i32
  }
  func.func @transform_10(%arg0: i32) -> (i32, i32) {
    %c0_i32 = arith.constant 0 : i32
    %c0_i32_0 = arith.constant 0 : i32
    %c0_i32_1 = arith.constant 0 : i32
    return %c0_i32, %c0_i32_0 : i32, i32
  }
  func.func @transform_11(%arg0: i32) -> (i32, i32, i32) {
    %c0_i32 = arith.constant 0 : i32
    %c0_i32_0 = arith.constant 0 : i32
    %c0_i32_1 = arith.constant 0 : i32
    return %arg0, %c0_i32, %c0_i32_0 : i32, i32, i32
  }
}

</mosaic_0001>

<bundles_post_ra>
// kernel: forward.1
= control target key start
LH: loop header
LB: loop body
LE: loop exit
PB: predicated region body
PF: predicated region fallthrough
CT: control target
= control target key end

     0   :  { %s7066_s0 = inlined_call_operand.vmem [shape: bf16[2,256,32], index: 0, kind: input, shape index: {}]   ;;  %s7067_s1 = inlined_call_operand.vmem [shape: bf16[32,128], index: 1, kind: input, shape index: {}]   ;;  %s7068_s2 = inlined_call_operand.vmem [shape: f32[1,128], index: 2, kind: input, shape index: {}]   ;;  %s7069_s3 = inlined_call_operand.vmem [shape: bf16[9,128,128], index: 3, kind: input, shape index: {}]   ;;  %s7070_s4 = inlined_call_operand.vmem [shape: f32[1,128], index: 4, kind: input, shape index: {}]   ;;  %s7071_s5 = inlined_call_operand.vmem [shape: bf16[9,128,128], index: 5, kind: input, shape index: {}]   ;;  %s7072_s6 = inlined_call_operand.vmem [shape: f32[1,128], index: 6, kind: input, shape index: {}]   ;;  %s7073_s7 = inlined_call_operand.vmem [shape: bf16[512,128], index: 7, kind: input, shape index: {}]   ;;  %s7074_s8 = inlined_call_operand.vmem [shape: f32[1,128], index: 8, kind: input, shape index: {}]   ;;  %s7075_s9 = inlined_call_operand.vmem [shape: bf16[128,128], index: 9, kind: input, shape index: {}]   ;;  %s7076_s10 = inlined_call_operand.vmem [shape: f32[1,128], index: 10, kind: input, shape index: {}]   ;;  %s7077_s11 = inlined_call_operand.hbm [shape: f32[2,1,128], index: 11, kind: output, shape index: {}]  }
   0x1   :  { %7078 = sst [smem:[#allocation9_spill]] %s7066_s0 }
   0x2   :  { %16 = vsyncpa [#allocation7], 0 }
   0x3   :  { %18 = vsyncpa [#allocation7 + $0x1], 0  ;;  %s5894_s17 = smov 0   ;;  %s5896_s18 = smov 0  }
   0x4   :  { %s5898_s19 = smov 0   ;;  %s5900_s20 = smov 0  }
   0x5 LB: > { %s5915_s21 = sadd.s32 4294967295, %s5829_s20   ;;  %s4159_s22 = sadd.s32 4294967294, %s5829_s20   ;;  %s5829_s20 = sphi %s5900_s20, %s7109_s20   ;;  %s5825_s19 = sphi %s5898_s19, %s7108_s19   ;;  %s5821_s18 = sphi %s5896_s18, %s7107_s18   ;;  %s5817_s17 = sphi %s5894_s17, %s7106_s17  }
   0x6   : > { %s5919_s23 = sadd.s32 1, %s5829_s20   ;;  %s267_s24 = sadd.s32 1, %s5825_s19 }
   0x7   : > { %s264_s25 = ssub.s32 %s5829_s20, %s5919_s23  ;;  %p277_p0 = scmp.ne.s32.totalorder %s5825_s19, %s5821_s18 }
   0x8   : > { %p265_p1 = scmp.eq.s32.totalorder %s264_s25, 0  ;;  %p278_p2 = scmp.eq.s32.totalorder %s5915_s21, 1 }
   0x9   : > { %p283_p3 = scmp.ne.s32.totalorder %s5821_s18, %s5817_s17  ;;  %p284_p4 = scmp.eq.s32.totalorder %s4159_s22, 1 }
   0xa   : > { %s5930_s26 = scalar_select %p265_p1, %s5825_s19, %s267_s24  }
   0xb   : > { %p5932_p5 = por %p278_p2, %p277_p0  ;;  %p5936_p6 = por %p284_p4, %p283_p3 }
   0xc   : > { %p4162_p7 = scmp.ge.s32.totalorder %s5829_s20, 1  ;;  %p340_p8 = scmp.lt.s32.totalorder %s5829_s20, 3 }
   0xe   : > { %p341_p9 = pnand %p4162_p7, %p340_p8 }
   0xf   : > { %v5561_v0 = vld [vmem:[%s7067_s1] sm:$0xff] (!%p341_p9)   ;;  %p379_p10 = scmp.lt.s32.totalorder (!%p341_p9), %s5915_s21, 1  ;;  %v5562_v1 = vld [vmem:[%s7067_s1 + $0x8] sm:$0xff] (!%p341_p9)   ;;  %vm474_vm0 = vcmask (!%p341_p9), 261120   ;;  %s7081_s0 = sld [smem:[#allocation9_spill]] (!%p341_p9)  ;;  %v5581_v20 = vld [vmem:[%s7069_s3 + $0x50] sm:$0xff] (!%p341_p9)  }
  0x10   : > { %344 = sbr.rel (%p341_p9) target bundleno = 1897 (0x769), region = 64  ;;  %5000 = vmatprep.subr.bf16.mxu0 (!%p341_p9), %v5561_v0  ;;  %5020 = vmatprep.subr.bf16.mxu1 (!%p341_p9), %v5561_v0  ;;  %v5579_v18 = vld [vmem:[%s7069_s3 + $0x40] sm:$0xff] (!%p341_p9)   ;;  %v5580_v19 = vld [vmem:[%s7069_s3 + $0x48] sm:$0xff] (!%p341_p9)   ;;  %v5582_v21 = vld [vmem:[%s7069_s3 + $0x58] sm:$0xff] (!%p341_p9)   ;;  %v5831_v23 = vmov (!%p341_p9), 0.0   ;;  %s377_s22 = sand.u32 (!%p341_p9), 1, %s5821_s18  }
  0x11   : > { %5001 = vmatpush3.bf16.msra.mxu0 (!%p341_p9), %v5561_v0  ;;  %5021 = vmatpush3.bf16.msra.mxu1 (!%p341_p9), %v5561_v0  ;;  %v5583_v22 = vld [vmem:[%s7069_s3 + $0x60] sm:$0xff] (!%p341_p9)   ;;  %386 = vst [vmem:[#allocation3 + $0x8] sm:$0xff] (!%p341_p9), %v5831_v23  ;;  %385 = vst [vmem:[#allocation3] sm:$0xff] (!%p341_p9), %v5831_v23  ;;  %v5584_v24 = vld [vmem:[%s7069_s3 + $0x68] sm:$0xff] (!%p341_p9)   ;;  %s378_s25 = scalar_lea.vmem (!%p341_p9), [#allocation6], %s377_s22 }
  0x12   : > { %5002 = vmatprep.subr.bf16.mxu0 (!%p341_p9), %v5562_v1  ;;  %5022 = vmatprep.subr.bf16.mxu1 (!%p341_p9), %v5562_v1  ;;  %387 = vst [vmem:[#allocation4] sm:$0xff] (!%p341_p9), %v5831_v23  ;;  %388 = vst [vmem:[#allocation3 + $0x50] sm:$0xff] (!%p341_p9), %v5831_v23  ;;  %v5585_v25 = vld [vmem:[%s7069_s3 + $0x70] sm:$0xff] (!%p341_p9)   ;;  %v5586_v26 = vld [vmem:[%s7069_s3 + $0x78] sm:$0xff] (!%p341_p9)   ;;  %s4104_s29 = sshll.u32 (!%p341_p9), %s378_s25, 4  ;;  %s7026_s29 = int_to_ptr.vmem [resolvable:$true] %s4104_s29 }
  0x13   : > { %389 = vst [vmem:[#allocation3 + $0x58] sm:$0xff] (!%p341_p9), %v5831_v23  ;;  %390 = vst [vmem:[#allocation4 + $0x18] sm:$0xff] (!%p341_p9), %v5831_v23  ;;  %v6025_v27 = vld [vmem:[%s7069_s3] sm:$0xff] (!%p341_p9)  }
  0x14   : > { %391 = vst [vmem:[#allocation5] sm:$0xff] (!%p341_p9), %v5831_v23  ;;  %392 = vst [vmem:[#allocation5 + $0x8] sm:$0xff] (!%p341_p9), %v5831_v23  ;;  %v6031_v28 = vld [vmem:[%s7068_s2] ss:$0 sm:$0xff] (!%p341_p9) }
  0x15   : > { %5003 = vmatpush3.bf16.msra.mxu0 (!%p341_p9), %v5562_v1  ;;  %5023 = vmatpush3.bf16.msra.mxu1 (!%p341_p9), %v5562_v1  ;;  %393 = vst [vmem:[#allocation5 + $0x10] sm:$0xff] (!%p341_p9), %v5831_v23  ;;  %394 = vst [vmem:[#allocation5 + $0x18] sm:$0xff] (!%p341_p9), %v5831_v23 }
  0x16   : > { %5040 = vmatprep.subr.bf16.mxu0 (!%p341_p9), %v5579_v18  ;;  %5256 = vmatprep.subr.bf16.mxu1 (!%p341_p9), %v5831_v23 }
  0x17   : > { %s380_s14 = scalar_select %p379_p10, %s5915_s21, 1 }
  0x19   : > { %s4737_s15 = sshll.u32 %s380_s14, 7  ;;  %s4092_s14 = scalar_lea.sflag [#allocation7], %s377_s22 }
  0x1a   : > { %s5953_s24 = scalar_lea.vmem %s7081_s0, %s4737_s15  ;;  %s5767_s15 = scalar_lea.vmem %s7026_s29, 16 }
  0x1b   : > { %v5563_v2 = vld [vmem:[%s5953_s24] sm:$0xff]   ;;  %v5564_v3 = vld [vmem:[%s5953_s24 + $0x8] sm:$0xff]   ;;  %v5567_v6 = vld [vmem:[%s5953_s24 + $0x10] sm:$0xff]   ;;  %p5768_p11 = scmp.ne.s32.totalorder %s7026_s29, %s5767_s15 }
  0x1c   : > { %5004 = vmatprep.mubr.msk.bf16.mxu0 %vm474_vm0, %v5563_v2  ;;  %v5565_v4 = vld [vmem:[%s5953_s24 + $0x40] sm:$0xff]   ;;  %v5566_v5 = vld [vmem:[%s5953_s24 + $0x48] sm:$0xff]   ;;  %v5569_v7 = vld [vmem:[%s5953_s24 + $0x50] sm:$0xff]  }
  0x1d   : > { %5005 = vmatmul.mubr.msk.bf16.vlgmr.msra.gmra.mrb[0].mxu0 %vm474_vm0, %v5564_v3  ;;  %5024 = vmatprep.mubr.msk.bf16.mxu1 %vm474_vm0, %v5565_v4  ;;  %v5568_v8 = vld [vmem:[%s5953_s24 + $0x18] sm:$0xff]   ;;  %v5571_v10 = vld [vmem:[%s5953_s24 + $0x20] sm:$0xff]   ;;  %v5572_v12 = vld [vmem:[%s5953_s24 + $0x28] sm:$0xff]   ;;  %p5769_p12 = pnand %p5768_p11, %p5932_p5 }
  0x1e   : > { %5025 = vmatmul.mubr.msk.bf16.vlgmr.msra.gmra.mrb[0].mxu1 %vm474_vm0, %v5566_v5  ;;  %5008 = vmatprep.mubr.msk.bf16.mxu0 %vm474_vm0, %v5567_v6  ;;  %v5570_v9 = vld [vmem:[%s5953_s24 + $0x58] sm:$0xff]   ;;  %v5573_v11 = vld [vmem:[%s5953_s24 + $0x60] sm:$0xff]   ;;  %v5574_v13 = vld [vmem:[%s5953_s24 + $0x68] sm:$0xff]  }
  0x1f   : > { %5028 = vmatprep.mubr.msk.bf16.mxu1 %vm474_vm0, %v5569_v7  ;;  %v5575_v14 = vld [vmem:[%s5953_s24 + $0x30] sm:$0xff]   ;;  %v5576_v16 = vld [vmem:[%s5953_s24 + $0x38] sm:$0xff]   ;;  %5041 = vmatpush3.bf16.msra.mxu0 %v5579_v18  ;;  %p5770_p13 = pneg %p5769_p12 }
  0x20   : > { %v5577_v15 = vld [vmem:[%s5953_s24 + $0x70] sm:$0xff]   ;;  %v5578_v17 = vld [vmem:[%s5953_s24 + $0x78] sm:$0xff]   ;;  %5042 = vmatprep.subr.bf16.mxu0 %v5580_v19  ;;  %s4734_s24 = sshll.u32 %s5915_s21, 4  ;;  %s5833_s21 = smov [#allocation6]  }
  0x21   : > { %s7024_s13 = scalar_lea.hbm %s7077_s11, %s4734_s24  ;;  %s5771_s16 = sshll.u32 %s5833_s21, 4  ;;  %s5772_s16 = int_to_ptr.vmem [resolvable:$false] %s5771_s16 }
  0x22   : > { %s5773_s0 = scalar_lea.vmem %s5772_s16, 32  ;;  %p5774_p0 = scmp.lt.s32.totalorder %s7026_s29, %s5772_s16 }
  0x23   : > { %5043 = vmatpush3.bf16.msra.mxu0 %v5580_v19  ;;  %p5775_p1 = scmp.lt.s32.totalorder %s5773_s0, %s5767_s15 }
  0x24   : > { %5044 = vmatprep.subr.bf16.mxu0 %v5581_v20 }
  0x25   : > { %5009 = vmatmul.mubr.msk.bf16.gmra.mrb[4].mxu0 %vm474_vm0, %v5568_v8  ;;  %p5776_p2 = por %p5775_p1, %p5774_p0 }
  0x26   : > { %5029 = vmatmul.mubr.msk.bf16.gmra.mrb[4].mxu1 %vm474_vm0, %v5570_v9  ;;  %5012 = vmatprep.mubr.msk.bf16.mxu0 %vm474_vm0, %v5571_v10 }
  0x27   : > { %5032 = vmatprep.mubr.msk.bf16.mxu1 %vm474_vm0, %v5573_v11  ;;  %5045 = vmatpush3.bf16.msra.mxu0 %v5581_v20  ;;  %p5777_p3 = pnand %p5776_p2, %p5770_p13 }
  0x28   : > { %5046 = vmatprep.subr.bf16.mxu0 %v5582_v21 }
  0x2b   : > { %5047 = vmatpush3.bf16.msra.mxu0 %v5582_v21 }
  0x2c   : > { %5048 = vmatprep.subr.bf16.mxu0 %v5583_v22 }
  0x2d   : > { %5013 = vmatmul.mubr.msk.bf16.gmra.mrb[8].mxu0 %vm474_vm0, %v5572_v12 }
  0x2e   : > { %5033 = vmatmul.mubr.msk.bf16.gmra.mrb[8].mxu1 %vm474_vm0, %v5574_v13  ;;  %5016 = vmatprep.mubr.msk.bf16.mxu0 %vm474_vm0, %v5575_v14 }
  0x2f   : > { %5036 = vmatprep.mubr.msk.bf16.mxu1 %vm474_vm0, %v5577_v15  ;;  %5049 = vmatpush3.bf16.msra.mxu0 %v5583_v22 }
  0x30   : > { %5050 = vmatprep.subr.bf16.mxu0 %v5584_v24 }
  0x33   : > { %5051 = vmatpush3.bf16.msra.mxu0 %v5584_v24 }
  0x34   : > { %5052 = vmatprep.subr.bf16.mxu0 %v5585_v25 }
  0x35   : > { %5017 = vmatmul.mubr.msk.bf16.gmra.mrb[12].mxu0 %vm474_vm0, %v5576_v16 }
  0x36   : > { %5037 = vmatmul.mubr.msk.bf16.gmra.mrb[12].mxu1 %vm474_vm0, %v5578_v17 }
  0x37   : > { %5053 = vmatpush3.bf16.msra.mxu0 %v5585_v25 }
  0x38   : > { %5054 = vmatprep.subr.bf16.mxu0 %v5586_v26 }
  0x3b   : > { %5055 = vmatpush3.bf16.msra.mxu0 %v5586_v26 }
  0x3c   : > { %5064 = vmatprep.subr.bf16.mxu0 %v6025_v27 }
  0xf0   : > { %v5006_v29 = vpop.f32.mrb[0].mxu0 }
  0xf1   : > { %v542_v30 = vadd.f32 %v5006_v29, %v6031_v28  ;;  %v533_v31 = vpop.f32.mrb[1].mxu0  ;;  %v5026_v32 = vpop.f32.mrb[0].mxu1 }
  0xf2   : > { %v534_v33 = vadd.f32 %v6031_v28, %v533_v31  ;;  %v5007_v34 = vpop.f32.mrb[2].mxu0  ;;  %v751_v35 = vadd.f32 %v5026_v32, %v6031_v28  ;;  %v742_v36 = vpop.f32.mrb[1].mxu1 }
  0xf3   : > { %v598_v37 = vmax.f32 %v542_v30, 0.0  ;;  %v545_v38 = vadd.f32 %v5007_v34, %v6031_v28  ;;  %v536_v39 = vpop.f32.mrb[3].mxu0  ;;  %v743_v40 = vadd.f32 %v6031_v28, %v742_v36  ;;  %v5027_v41 = vpop.f32.mrb[2].mxu1 }
  0xf4   : > { %v596_v42 = vmax.f32 %v534_v33, 0.0  ;;  %v537_v43 = vadd.f32 %v6031_v28, %v536_v39  ;;  %v807_v44 = vmax.f32 %v751_v35, 0.0  ;;  %v754_v45 = vadd.f32 %v5027_v41, %v6031_v28  ;;  %v745_v46 = vpop.f32.mrb[3].mxu1 }
  0xf5   : > { %614 = vst [vmem:[#allocation2 + $0x10] sm:$0xff] %v598_v37  ;;  %v599_v47 = vmax.f32 %v545_v38, 0.0  ;;  %v805_v48 = vmax.f32 %v743_v40, 0.0  ;;  %v746_v49 = vadd.f32 %v6031_v28, %v745_v46 }
  0xf6   : > { %612 = vst [vmem:[#allocation2] sm:$0xff] %v596_v42  ;;  %v597_v50 = vmax.f32 %v537_v43, 0.0  ;;  %823 = vst [vmem:[#allocation2 + $0x90] sm:$0xff] %v807_v44  ;;  %v808_v51 = vmax.f32 %v754_v45, 0.0 }
  0xf7   : > { %615 = vst [vmem:[#allocation2 + $0x18] sm:$0xff] %v599_v47  ;;  %821 = vst [vmem:[#allocation2 + $0x80] sm:$0xff] %v805_v48  ;;  %v806_v52 = vmax.f32 %v746_v49, 0.0 }
  0xf8   : > { %613 = vst [vmem:[#allocation2 + $0x8] sm:$0xff] %v597_v50  ;;  %v5010_v53 = vpop.f32.mrb[4].mxu0  ;;  %824 = vst [vmem:[#allocation2 + $0x98] sm:$0xff] %v808_v51 }
  0xf9   : > { %v558_v54 = vadd.f32 %v5010_v53, %v6031_v28  ;;  %v549_v55 = vpop.f32.mrb[5].mxu0  ;;  %822 = vst [vmem:[#allocation2 + $0x88] sm:$0xff] %v806_v52  ;;  %v5030_v56 = vpop.f32.mrb[4].mxu1 }
  0xfa   : > { %v550_v57 = vadd.f32 %v6031_v28, %v549_v55  ;;  %v5011_v58 = vpop.f32.mrb[6].mxu0  ;;  %v767_v59 = vadd.f32 %v5030_v56, %v6031_v28  ;;  %v758_v60 = vpop.f32.mrb[5].mxu1 }
  0xfb   : > { %v602_v61 = vmax.f32 %v558_v54, 0.0  ;;  %v561_v62 = vadd.f32 %v5011_v58, %v6031_v28  ;;  %v552_v63 = vpop.f32.mrb[7].mxu0  ;;  %v759_v0 = vadd.f32 %v6031_v28, %v758_v60  ;;  %v5031_v1 = vpop.f32.mrb[6].mxu1 }
  0xfc   : > { %v600_v2 = vmax.f32 %v550_v57, 0.0  ;;  %v553_v3 = vadd.f32 %v6031_v28, %v552_v63  ;;  %v811_v4 = vmax.f32 %v767_v59, 0.0  ;;  %v770_v5 = vadd.f32 %v5031_v1, %v6031_v28  ;;  %v761_v6 = vpop.f32.mrb[7].mxu1 }
  0xfd   : > { %618 = vst [vmem:[#allocation2 + $0x30] sm:$0xff] %v602_v61  ;;  %v603_v7 = vmax.f32 %v561_v62, 0.0  ;;  %v809_v8 = vmax.f32 %v759_v0, 0.0  ;;  %v762_v9 = vadd.f32 %v6031_v28, %v761_v6 }
  0xfe   : > { %v841_v10 = vld [vmem:[#allocation2 + $0x10] ss:$2 sm:$0xff]  ;;  %v843_v11 = vld [vmem:[#allocation2 + $0x11] ss:$2 sm:$0xff]  ;;  %616 = vst [vmem:[#allocation2 + $0x20] sm:$0xff] %v600_v2  ;;  %v601_v12 = vmax.f32 %v553_v3, 0.0 }
  0xff   : > { %827 = vst [vmem:[#allocation2 + $0xb0] sm:$0xff] %v811_v4  ;;  %v812_v13 = vmax.f32 %v770_v5, 0.0  ;;  %v845_v14 = vmax.f32 %v841_v10, %v843_v11  ;;  %v837_v15 = vld [vmem:[#allocation2] ss:$2 sm:$0xff]  ;;  %v839_v16 = vld [vmem:[#allocation2 + $0x1] ss:$2 sm:$0xff]  ;;  %v933_v5 = vlaneseq }
 0x100   : > { %619 = vst [vmem:[#allocation2 + $0x38] sm:$0xff] %v603_v7  ;;  %v889_v17 = vld [vmem:[#allocation2 + $0x90] ss:$2 sm:$0xff]  ;;  %825 = vst [vmem:[#allocation2 + $0xa0] sm:$0xff] %v809_v8  ;;  %v891_v18 = vld [vmem:[#allocation2 + $0x91] ss:$2 sm:$0xff]  ;;  %v844_v22 = vmax.f32 %v837_v15, %v839_v16 }
 0x101   : > { %617 = vst [vmem:[#allocation2 + $0x28] sm:$0xff] %v601_v12  ;;  %v5014_v19 = vpop.f32.mrb[8].mxu0  ;;  %v885_v20 = vld [vmem:[#allocation2 + $0x80] ss:$2 sm:$0xff]  ;;  %828 = vst [vmem:[#allocation2 + $0xb8] sm:$0xff] %v812_v13  ;;  %v810_v21 = vmax.f32 %v762_v9, 0.0  ;;  %v893_v24 = vmax.f32 %v889_v17, %v891_v18 }
 0x102   : > { %v574_v25 = vadd.f32 %v5014_v19, %v6031_v28  ;;  %v887_v26 = vld [vmem:[#allocation2 + $0x81] ss:$2 sm:$0xff]  ;;  %v565_v29 = vpop.f32.mrb[9].mxu0  ;;  %v5034_v30 = vpop.f32.mrb[8].mxu1  ;;  %v6052_v36 = vmax.f32 %v844_v22, %v845_v14 }
 0x103   : > { %v892_v31 = vmax.f32 %v885_v20, %v887_v26  ;;  %v566_v32 = vadd.f32 %v6031_v28, %v565_v29  ;;  %v5015_v33 = vpop.f32.mrb[10].mxu0  ;;  %826 = vst [vmem:[#allocation2 + $0xa8] sm:$0xff] %v810_v21  ;;  %v783_v34 = vadd.f32 %v5034_v30, %v6031_v28  ;;  %v774_v35 = vpop.f32.mrb[9].mxu1 }
 0x104   : > { %v606_v37 = vmax.f32 %v574_v25, 0.0  ;;  %v577_v38 = vadd.f32 %v5015_v33, %v6031_v28  ;;  %v568_v39 = vpop.f32.mrb[11].mxu0  ;;  %v775_v40 = vadd.f32 %v6031_v28, %v774_v35  ;;  %v5035_v41 = vpop.f32.mrb[10].mxu1  ;;  %847 = vst [vmem:[#allocation3 + $0x10] sm:$0xff] %v6052_v36  ;;  %v1114_v54 = vpack.c.bf16 %v6052_v36, %v5831_v23 }
 0x105   : > { %v6056_v42 = vmax.f32 %v892_v31, %v893_v24  ;;  %v604_v43 = vmax.f32 %v566_v32, 0.0  ;;  %v569_v44 = vadd.f32 %v6031_v28, %v568_v39  ;;  %v815_v45 = vmax.f32 %v783_v34, 0.0  ;;  %v777_v46 = vpop.f32.mrb[11].mxu1 }
 0x106   : > { %622 = vst [vmem:[#allocation2 + $0x50] sm:$0xff] %v606_v37  ;;  %v607_v47 = vmax.f32 %v577_v38, 0.0  ;;  %v813_v48 = vmax.f32 %v775_v40, 0.0  ;;  %v786_v49 = vadd.f32 %v5035_v41, %v6031_v28  ;;  %v778_v50 = vadd.f32 %v6031_v28, %v777_v46  ;;  %5056 = vmatprep.mubr.bf16.mxu0 %v1114_v54 }
 0x107   : > { %v853_v51 = vld [vmem:[#allocation2 + $0x30] ss:$2 sm:$0xff]  ;;  %v855_v52 = vld [vmem:[#allocation2 + $0x31] ss:$2 sm:$0xff]  ;;  %895 = vst [vmem:[#allocation3 + $0x30] sm:$0xff] %v6056_v42  ;;  %620 = vst [vmem:[#allocation2 + $0x40] sm:$0xff] %v604_v43 }
 0x108   : > { %v605_v53 = vmax.f32 %v569_v44, 0.0  ;;  %831 = vst [vmem:[#allocation2 + $0xd0] sm:$0xff] %v815_v45  ;;  %v857_v55 = vmax.f32 %v853_v51, %v855_v52  ;;  %v849_v56 = vld [vmem:[#allocation2 + $0x20] ss:$2 sm:$0xff]  ;;  %v851_v57 = vld [vmem:[#allocation2 + $0x21] ss:$2 sm:$0xff] }
 0x109   : > { %623 = vst [vmem:[#allocation2 + $0x58] sm:$0xff] %v607_v47  ;;  %v901_v58 = vld [vmem:[#allocation2 + $0xb0] ss:$2 sm:$0xff]  ;;  %829 = vst [vmem:[#allocation2 + $0xc0] sm:$0xff] %v813_v48  ;;  %v856_v59 = vmax.f32 %v849_v56, %v851_v57  ;;  %v903_v60 = vld [vmem:[#allocation2 + $0xb1] ss:$2 sm:$0xff] }
 0x10a   : > { %621 = vst [vmem:[#allocation2 + $0x48] sm:$0xff] %v605_v53  ;;  %v816_v61 = vmax.f32 %v786_v49, 0.0  ;;  %v5018_v62 = vpop.f32.mrb[12].mxu0  ;;  %v814_v63 = vmax.f32 %v778_v50, 0.0  ;;  %v905_v0 = vmax.f32 %v901_v58, %v903_v60  ;;  %v897_v1 = vld [vmem:[#allocation2 + $0xa0] ss:$2 sm:$0xff] }
 0x10b   : > { %v899_v2 = vld [vmem:[#allocation2 + $0xa1] ss:$2 sm:$0xff]  ;;  %v590_v3 = vadd.f32 %v5018_v62, %v6031_v28  ;;  %v581_v4 = vpop.f32.mrb[13].mxu0  ;;  %v5038_v23 = vpop.f32.mrb[12].mxu1  ;;  %v6066_v6 = vmax.f32 %v856_v59, %v857_v55  ;;  %v6079_v32 = vshrl.u32 %v933_v5, 7  ;;  %v5589_v55 = vld [vmem:[%s7069_s3 + $0x10] sm:$0xff]  }
 0x10c   : > { %v904_v7 = vmax.f32 %v897_v1, %v899_v2  ;;  %832 = vst [vmem:[#allocation2 + $0xd8] sm:$0xff] %v816_v61  ;;  %830 = vst [vmem:[#allocation2 + $0xc8] sm:$0xff] %v814_v63  ;;  %v582_v8 = vadd.f32 %v6031_v28, %v581_v4  ;;  %v5019_v9 = vpop.f32.mrb[14].mxu0  ;;  %v799_v10 = vadd.f32 %v5038_v23, %v6031_v28  ;;  %v790_v11 = vpop.f32.mrb[13].mxu1  ;;  %v5588_v51 = vld [vmem:[%s7069_s3 + $0x8] sm:$0xff]  }
 0x10d   : > { %v610_v12 = vmax.f32 %v590_v3, 0.0  ;;  %v593_v13 = vadd.f32 %v5019_v9, %v6031_v28  ;;  %v584_v14 = vpop.f32.mrb[15].mxu0  ;;  %v791_v15 = vadd.f32 %v6031_v28, %v790_v11  ;;  %v5039_v16 = vpop.f32.mrb[14].mxu1  ;;  %859 = vst [vmem:[#allocation3 + $0x18] sm:$0xff] %v6066_v6  ;;  %v1701_v33 = vpack.c.bf16 %v6066_v6, %v6052_v36  ;;  %v1054_v5 = vld [vmem:[#allocation3 + $0x7] sm:$0xff]  ;;  %v5618_v36 = vld [vmem:[%s7069_s3 + $0x138] sm:$0xff]  }
 0x10e   : > { %v6073_v17 = vmax.f32 %v904_v7, %v905_v0  ;;  %v608_v18 = vmax.f32 %v582_v8, 0.0  ;;  %v585_v19 = vadd.f32 %v6031_v28, %v584_v14  ;;  %v819_v20 = vmax.f32 %v799_v10, 0.0  ;;  %v793_v21 = vpop.f32.mrb[15].mxu1  ;;  %v5590_v7 = vld [vmem:[%s7069_s3 + $0x18] sm:$0xff]  }
 0x10f   : > { %626 = vst [vmem:[#allocation2 + $0x70] sm:$0xff] %v610_v12  ;;  %v611_v22 = vmax.f32 %v593_v13, 0.0  ;;  %v817_v24 = vmax.f32 %v791_v15, 0.0  ;;  %v802_v25 = vadd.f32 %v5039_v16, %v6031_v28  ;;  %v794_v26 = vadd.f32 %v6031_v28, %v793_v21  ;;  %v6131_v12 = vld [vmem:[#allocation3 + $0xf] sm:$0xff] }
 0x110   : > { %v865_v29 = vld [vmem:[#allocation2 + $0x50] ss:$2 sm:$0xff]  ;;  %v867_v30 = vld [vmem:[#allocation2 + $0x51] ss:$2 sm:$0xff]  ;;  %907 = vst [vmem:[#allocation3 + $0x38] sm:$0xff] %v6073_v17  ;;  %624 = vst [vmem:[#allocation2 + $0x60] sm:$0xff] %v608_v18  ;;  %v1703_v34 = vpack.c.bf16 %v6073_v17, %v6056_v42  ;;  %v4233_v21 = vpack.c.bf16 %v6131_v12, %v1054_v5 }
 0x111   : > { %v609_v31 = vmax.f32 %v585_v19, 0.0  ;;  %835 = vst [vmem:[#allocation2 + $0xf0] sm:$0xff] %v819_v20  ;;  %v869_v35 = vmax.f32 %v865_v29, %v867_v30  ;;  %v861_v37 = vld [vmem:[#allocation2 + $0x40] ss:$2 sm:$0xff]  ;;  %v863_v38 = vld [vmem:[#allocation2 + $0x41] ss:$2 sm:$0xff] }
 0x112   : > { %627 = vst [vmem:[#allocation2 + $0x78] sm:$0xff] %v611_v22  ;;  %833 = vst [vmem:[#allocation2 + $0xe0] sm:$0xff] %v817_v24  ;;  %v820_v28 = vmax.f32 %v802_v25, 0.0  ;;  %v818_v39 = vmax.f32 %v794_v26, 0.0  ;;  %v868_v40 = vmax.f32 %v861_v37, %v863_v38  ;;  %v6088_v49 = vadd.s32 8, %v6079_v32  ;;  %v5591_v24 = vld [vmem:[%s7069_s3 + $0x20] sm:$0xff]  }
 0x113   : > { %625 = vst [vmem:[#allocation2 + $0x68] sm:$0xff] %v609_v31  ;;  %v913_v41 = vld [vmem:[#allocation2 + $0xd0] ss:$2 sm:$0xff]  ;;  %v915_v43 = vld [vmem:[#allocation2 + $0xd1] ss:$2 sm:$0xff]  ;;  %v946_v59 = vand.u32 7, %v6079_v32 }
 0x114   : > { %v909_v44 = vld [vmem:[#allocation2 + $0xc0] ss:$2 sm:$0xff]  ;;  %836 = vst [vmem:[#allocation2 + $0xf8] sm:$0xff] %v820_v28  ;;  %834 = vst [vmem:[#allocation2 + $0xe8] sm:$0xff] %v818_v39  ;;  %v6085_v45 = vmax.f32 %v868_v40, %v869_v35  ;;  %v917_v46 = vmax.f32 %v913_v41, %v915_v43  ;;  %v911_v47 = vld [vmem:[#allocation2 + $0xc1] ss:$2 sm:$0xff] }
 0x115   : > { %v916_v48 = vmax.f32 %v909_v44, %v911_v47  ;;  %v953_v60 = vand.u32 7, %v6088_v49  ;;  %vm6109_vm1 = vcmp.ne.s32.totalorder %v946_v59, 0  ;;  %v6133_v13 = vld [vmem:[#allocation3 + $0x11] sm:$0xff]  ;;  %v5592_v26 = vld [vmem:[%s7069_s3 + $0x28] sm:$0xff]   ;;  %v6175_v35 = vadd.s32 16, %v6079_v32 }
 0x116   : > { %871 = vst [vmem:[#allocation3 + $0x20] sm:$0xff] %v6085_v45  ;;  %v1115_v50 = vpack.c.bf16 %v6085_v45, %v6066_v6  ;;  %v5593_v31 = vld [vmem:[%s7069_s3 + $0x30] sm:$0xff]   ;;  %v6178_v37 = vadd.s32 24, %v6079_v32  ;;  %v6181_v38 = vadd.s32 32, %v6079_v32  ;;  %v6184_v28 = vadd.s32 40, %v6079_v32  ;;  %v5594_v39 = vld [vmem:[%s7069_s3 + $0x38] sm:$0xff]  }
 0x117   : > { %v6096_v52 = vmax.f32 %v916_v48, %v917_v46  ;;  %vm6115_vm2 = vcmp.ne.s32.totalorder %v953_v60, 0  ;;  %v6135_v14 = vld [vmem:[#allocation3 + $0x31] sm:$0xff]  ;;  %v960_v40 = vand.u32 7, %v6175_v35  ;;  %v5595_v46 = vld [vmem:[%s7069_s3 + $0x80] sm:$0xff]   ;;  %v6197_v47 = vadd.s32 48, %v6079_v32 }
 0x118   : > { %5057 = vmatmul.mubr.bf16.vlgmr.msra.gmra.mrb[16].mxu0 %v1115_v50  ;;  %vm6146_vm3 = vmpackc.low %vm6115_vm2, %vm6109_vm1  ;;  %v967_v41 = vand.u32 7, %v6178_v37  ;;  %v974_v43 = vand.u32 7, %v6181_v38  ;;  %v981_v44 = vand.u32 7, %v6184_v28  ;;  %v6200_v48 = vadd.s32 56, %v6079_v32  ;;  %v5604_v37 = vld [vmem:[%s7069_s3 + $0xc8] sm:$0xff]   ;;  %v5605_v28 = vld [vmem:[%s7069_s3 + $0xd0] sm:$0xff]  }
 0x119   : > { %v877_v53 = vld [vmem:[#allocation2 + $0x70] ss:$2 sm:$0xff]  ;;  %v879_v54 = vld [vmem:[#allocation2 + $0x71] ss:$2 sm:$0xff]  ;;  %919 = vst [vmem:[#allocation3 + $0x40] sm:$0xff] %v6096_v52  ;;  %5065 = vmatpush3.bf16.msra.mxu0 %v6025_v27  ;;  %v1117_v11 = vpack.c.bf16 %v6096_v52, %v6073_v17  ;;  %vm1040_vm4 = vcmp.ne.s32.totalorder %v960_v40, 0 }
 0x11a   : > { %v881_v56 = vmax.f32 %v877_v53, %v879_v54  ;;  %v873_v57 = vld [vmem:[#allocation2 + $0x60] ss:$2 sm:$0xff]  ;;  %v875_v58 = vld [vmem:[#allocation2 + $0x61] ss:$2 sm:$0xff]  ;;  %5066 = vmatprep.subr.bf16.mxu0 %v5588_v51  ;;  %vm1041_vm5 = vcmp.ne.s32.totalorder %v967_v41, 0  ;;  %vm1042_vm6 = vcmp.ne.s32.totalorder %v974_v43, 0 }
 0x11b   : > { %v880_v61 = vmax.f32 %v873_v57, %v875_v58  ;;  %v925_v62 = vld [vmem:[#allocation2 + $0xf0] ss:$2 sm:$0xff]  ;;  %v927_v63 = vld [vmem:[#allocation2 + $0xf1] ss:$2 sm:$0xff]  ;;  %v921_v0 = vld [vmem:[#allocation2 + $0xe0] ss:$2 sm:$0xff] }
 0x11c   : > { %v929_v1 = vmax.f32 %v925_v62, %v927_v63  ;;  %v923_v2 = vld [vmem:[#allocation2 + $0xe1] ss:$2 sm:$0xff]  ;;  %vm1043_vm7 = vcmp.ne.s32.totalorder %v981_v44, 0  ;;  %v6208_v54 = vld [vmem:[#allocation3 + $0x17] sm:$0xff]  ;;  %vm6210_vm8 = vmpackc.low %vm1041_vm5, %vm1040_vm4  ;;  %v995_v62 = vand.u32 7, %v6200_v48  ;;  %vm1046_vm12 = vcmp.ne.s32.totalorder %v946_v59, 7 }
 0x11d   : > { %v6105_v3 = vmax.f32 %v880_v61, %v881_v56  ;;  %v928_v4 = vmax.f32 %v921_v0, %v923_v2  ;;  %5067 = vmatpush3.bf16.msra.mxu0 %v5588_v51  ;;  %v6122_v8 = vld [vmem:[#allocation3 + $0x19] sm:$0xff]  ;;  %vm6218_vm9 = vmpackc.low %vm1043_vm7, %vm1042_vm6  ;;  %v5596_v58 = vld [vmem:[%s7069_s3 + $0x88] sm:$0xff]   ;;  %v988_v61 = vand.u32 7, %v6197_v47  ;;  %vm1047_vm13 = vcmp.ne.s32.totalorder %v953_v60, 7 }
 0x11e   : > { %5068 = vmatprep.subr.bf16.mxu0 %v5589_v55  ;;  %v4365_v16 = vpack.c.bf16 %v6122_v8, %v6133_v13  ;;  %v6202_v50 = vld [vmem:[#allocation3 + $0x1f] sm:$0xff]  ;;  %vm1045_vm11 = vcmp.ne.s32.totalorder %v995_v62, 0  ;;  %v5597_v0 = vld [vmem:[%s7069_s3 + $0x90] sm:$0xff]   ;;  %vm6256_vm15 = vmpackc.low %vm1047_vm13, %vm1046_vm12  ;;  %vm1048_vm0 = vcmp.ne.s32.totalorder %v960_v40, 7  ;;  %vm1049_vm1 = vcmp.ne.s32.totalorder %v967_v41, 7 }
 0x11f   : > { %883 = vst [vmem:[#allocation3 + $0x28] sm:$0xff] %v6105_v3  ;;  %v6125_v9 = vmax.f32 %v928_v4, %v929_v1  ;;  %v1116_v10 = vpack.c.bf16 %v6056_v42, %v6105_v3  ;;  %v1702_v15 = vpack.c.bf16 %v6105_v3, %v6085_v45  ;;  %v6216_v56 = vpack.c.bf16 %v6202_v50, %v6208_v54  ;;  %v6240_v1 = vld [vmem:[#allocation3 + $0x37] sm:$0xff]  ;;  %v1361_v27 = vld [vmem:[#allocation3 + $0x9] sm:$0xff]  ;;  %vm6284_vm5 = vmpackc.low %vm1049_vm1, %vm1048_vm0 }
 0x120   : > { %v6150_v19 = vld [vmem:[#allocation3 + $0x39] sm:$0xff]  ;;  %vm1044_vm10 = vcmp.ne.s32.totalorder %v988_v61, 0  ;;  %v4269_v60 = vpack.c.bf16 %v6133_v13, %v1361_v27  ;;  %vm1050_vm2 = vcmp.ne.s32.totalorder %v974_v43, 7  ;;  %vm1051_vm4 = vcmp.ne.s32.totalorder %v981_v44, 7  ;;  %v5608_v47 = vld [vmem:[%s7069_s3 + $0xe8] sm:$0xff]   ;;  %v5617_v27 = vld [vmem:[%s7069_s3 + $0x130] sm:$0xff]  }
 0x121   : > { %931 = vst [vmem:[#allocation3 + $0x48] sm:$0xff] %v6125_v9  ;;  %5060 = vmatprep.mubr.bf16.mxu0 %v1116_v10  ;;  %v1704_v20 = vpack.c.bf16 %v6125_v9, %v6096_v52  ;;  %5069 = vmatpush3.bf16.msra.mxu0 %v5589_v55  ;;  %v4371_v22 = vpack.c.bf16 %v6150_v19, %v6135_v14  ;;  %v6242_v2 = vld [vmem:[#allocation3 + $0x3f] sm:$0xff]  ;;  %vm6248_vm14 = vmpackc.low %vm1045_vm11, %vm1044_vm10  ;;  %v5600_v10 = vld [vmem:[%s7069_s3 + $0xa8] sm:$0xff]   ;;  %vm1052_vm7 = vcmp.ne.s32.totalorder %v988_v61, 7  ;;  %vm1053_vm10 = vcmp.ne.s32.totalorder %v995_v62, 7 }
 0x122   : > { %5061 = vmatmul.mubr.bf16.gmra.mrb[20].mxu0 %v1117_v11  ;;  %5070 = vmatprep.subr.bf16.mxu0 %v5590_v7  ;;  %v6254_v23 = vpack.c.bf16 %v6242_v2, %v6240_v1  ;;  %v5598_v59 = vld [vmem:[%s7069_s3 + $0x98] sm:$0xff]   ;;  %v5601_v11 = vld [vmem:[%s7069_s3 + $0xb0] sm:$0xff]   ;;  %vm6292_vm6 = vmpackc.low %vm1051_vm4, %vm1050_vm2  ;;  %v4305_v44 = vpack.c.bf16 %v6208_v54, %v6131_v12 }
 0x123   : > { %5080 = vmatprep.mubr.msk.bf16.mxu0 %vm6146_vm3, %v4233_v21  ;;  %v5602_v21 = vld [vmem:[%s7069_s3 + $0xb8] sm:$0xff]   ;;  %vm6314_vm11 = vmpackc.low %vm1053_vm10, %vm1052_vm7  ;;  %v5609_v12 = vld [vmem:[%s7069_s3 + $0xf0] sm:$0xff]  }
 0x124   : > { %v5606_v43 = vld [vmem:[%s7069_s3 + $0xd8] sm:$0xff]   ;;  %v5611_v54 = vld [vmem:[%s7069_s3 + $0x100] sm:$0xff]   ;;  %v5612_v61 = vld [vmem:[%s7069_s3 + $0x108] sm:$0xff]  }
 0x125   : > { %5071 = vmatpush3.bf16.msra.mxu0 %v5590_v7  ;;  %v5599_v7 = vld [vmem:[%s7069_s3 + $0xa0] sm:$0xff]   ;;  %v5610_v48 = vld [vmem:[%s7069_s3 + $0xf8] sm:$0xff]   ;;  %v5624_v17 = vld [vmem:[%s7069_s3 + $0x168] sm:$0xff]  }
 0x126   : > { %v6162_v25 = vld [vmem:[#allocation3 + $0x21] sm:$0xff]  ;;  %5072 = vmatprep.subr.bf16.mxu0 %v5591_v24  ;;  %v6167_v29 = vld [vmem:[#allocation3 + $0x29] sm:$0xff]  ;;  %v5626_v45 = vld [vmem:[%s7069_s3 + $0x178] sm:$0xff]  }
 0x127   : > { %v4368_v30 = vpack.c.bf16 %v6167_v29, %v6162_v25  ;;  %v6204_v51 = vld [vmem:[#allocation3 + $0x27] sm:$0xff]  ;;  %v6206_v53 = vld [vmem:[#allocation3 + $0x2f] sm:$0xff]  ;;  %v6301_v38 = vpack.c.bf16 %v6135_v14, %v6167_v29  ;;  %v5630_v14 = vld [vmem:[%s7069_s3 + $0x198] sm:$0xff]  }
 0x128   : > { %v6229_v63 = vpack.c.bf16 %v6206_v53, %v6204_v51  ;;  %v4311_v62 = vpack.c.bf16 %v6240_v1, %v6206_v53  ;;  %v5614_v53 = vld [vmem:[%s7069_s3 + $0x118] sm:$0xff]   ;;  %v5615_v1 = vld [vmem:[%s7069_s3 + $0x120] sm:$0xff]   ;;  %v5629_v13 = vld [vmem:[%s7069_s3 + $0x190] sm:$0xff]  }
 0x129   : > { %5073 = vmatpush3.bf16.msra.mxu0 %v5591_v24  ;;  %v5603_v24 = vld [vmem:[%s7069_s3 + $0xc0] sm:$0xff]   ;;  %v5634_v18 = vld [vmem:[%s7069_s3 + $0x1b8] sm:$0xff]   ;;  %v5636_v29 = vld [vmem:[%s7069_s3 + $0x1c8] sm:$0xff]  }
 0x12a   : > { %5074 = vmatprep.subr.bf16.mxu0 %v5592_v26  ;;  %v5619_v6 = vld [vmem:[%s7069_s3 + $0x140] sm:$0xff]   ;;  %v5638_v55 = vld [vmem:[%s7069_s3 + $0x1d8] sm:$0xff]   ;;  %v5641_v4 = vld [vmem:[%s7069_s3 + $0x1f0] sm:$0xff]  }
 0x12b   : > { %v5623_v42 = vld [vmem:[%s7069_s3 + $0x160] sm:$0xff]   ;;  %v5650_v5 = vld [vmem:[%s7069_s3 + $0x238] sm:$0xff]   ;;  %v5653_v35 = vld [vmem:[%s7071_s5 + $0x50] sm:$0xff]  }
 0x12c   : > { %v5627_v52 = vld [vmem:[%s7069_s3 + $0x180] sm:$0xff]  }
 0x12d   : > { %5075 = vmatpush3.bf16.msra.mxu0 %v5592_v26  ;;  %v5639_v57 = vld [vmem:[%s7069_s3 + $0x1e0] sm:$0xff]   ;;  %v5652_v26 = vld [vmem:[%s7071_s5 + $0x48] sm:$0xff]  }
 0x12e   : > { %5076 = vmatprep.subr.bf16.mxu0 %v5593_v31  ;;  %v5655_v40 = vld [vmem:[%s7071_s5 + $0x60] sm:$0xff]  }
 0x131   : > { %5077 = vmatpush3.bf16.msra.mxu0 %v5593_v31  ;;  %v6290_v31 = vpack.c.bf16 %v6162_v25, %v6122_v8  ;;  %v5628_v8 = vld [vmem:[%s7069_s3 + $0x188] sm:$0xff]   ;;  %v5635_v25 = vld [vmem:[%s7069_s3 + $0x1c0] sm:$0xff]  }
 0x132   : > { %5078 = vmatprep.subr.bf16.mxu0 %v5594_v39 }
 0x135   : > { %5079 = vmatpush3.bf16.msra.mxu0 %v5594_v39  ;;  %v6312_v39 = vld [vmem:[#allocation3 + $0x41] sm:$0xff] }
 0x136   : > { %5088 = vmatprep.subr.bf16.mxu0 %v5595_v46  ;;  %v6320_v41 = vpack.c.bf16 %v6312_v39, %v6150_v19  ;;  %v5631_v19 = vld [vmem:[%s7069_s3 + $0x1a0] sm:$0xff]  }
 0x138   : > { %5081 = vmatmul.mubr.msk.bf16.vlgmr.msra.gmra.mrb[16].mxu0 %vm6210_vm8, %v6216_v56 }
 0x139   : > { %5084 = vmatprep.mubr.msk.bf16.mxu0 %vm6218_vm9, %v6229_v63  ;;  %5089 = vmatpush3.bf16.msra.mxu0 %v5595_v46  ;;  %v5607_v46 = vld [vmem:[%s7069_s3 + $0xe0] sm:$0xff]  }
 0x13a   : > { %5090 = vmatprep.subr.bf16.mxu0 %v5596_v58 }
 0x13d   : > { %5091 = vmatpush3.bf16.msra.mxu0 %v5596_v58  ;;  %v4308_v58 = vpack.c.bf16 %v6204_v51, %v6202_v50  ;;  %v5613_v50 = vld [vmem:[%s7069_s3 + $0x110] sm:$0xff]   ;;  %v6361_v51 = vld [vmem:[#allocation3 + $0x47] sm:$0xff] }
 0x13e   : > { %5092 = vmatprep.subr.bf16.mxu0 %v5597_v0 }
 0x140   : > { %5085 = vmatmul.mubr.msk.bf16.gmra.mrb[20].mxu0 %vm6248_vm14, %v6254_v23 }
 0x141   : > { %5093 = vmatpush3.bf16.msra.mxu0 %v5597_v0  ;;  %5104 = vmatprep.mubr.msk.bf16.mxu0 %vm6256_vm15, %v4269_v60  ;;  %v4314_v0 = vpack.c.bf16 %v6361_v51, %v6242_v2  ;;  %v5616_v2 = vld [vmem:[%s7069_s3 + $0x128] sm:$0xff]   ;;  %v5622_v60 = vld [vmem:[%s7069_s3 + $0x158] sm:$0xff]  }
 0x142   : > { %5094 = vmatprep.subr.bf16.mxu0 %v5598_v59 }
 0x145   : > { %5095 = vmatpush3.bf16.msra.mxu0 %v5598_v59  ;;  %v5621_v59 = vld [vmem:[%s7069_s3 + $0x150] sm:$0xff]  }
 0x146   : > { %5096 = vmatprep.subr.bf16.mxu0 %v5599_v7 }
 0x149   : > { %5097 = vmatpush3.bf16.msra.mxu0 %v5599_v7  ;;  %v2160_v7 = vld [vmem:[#allocation3 + $0x20] sm:$0xff] }
 0x14a   : > { %5098 = vmatprep.subr.bf16.mxu0 %v5600_v10 }
 0x14d   : > { %5099 = vmatpush3.bf16.msra.mxu0 %v5600_v10 }
 0x14e   : > { %5100 = vmatprep.subr.bf16.mxu0 %v5601_v11 }
 0x151   : > { %5101 = vmatpush3.bf16.msra.mxu0 %v5601_v11  ;;  %v2159_v11 = vld [vmem:[#allocation3 + $0x18] sm:$0xff] }
 0x152   : > { %5102 = vmatprep.subr.bf16.mxu0 %v5602_v21 }
 0x155   : > { %5103 = vmatpush3.bf16.msra.mxu0 %v5602_v21  ;;  %v5642_v21 = vld [vmem:[%s7069_s3 + $0x1f8] sm:$0xff]  }
 0x156   : > { %5112 = vmatprep.subr.bf16.mxu0 %v5603_v24 }
 0x158   : > { %5105 = vmatmul.mubr.msk.bf16.vlgmr.msra.gmra.mrb[16].mxu0 %vm6284_vm5, %v6290_v31 }
 0x159   : > { %5108 = vmatprep.mubr.msk.bf16.mxu0 %vm6292_vm6, %v6301_v38  ;;  %5113 = vmatpush3.bf16.msra.mxu0 %v5603_v24  ;;  %v5643_v24 = vld [vmem:[%s7069_s3 + $0x200] sm:$0xff]  }
 0x15a   : > { %5114 = vmatprep.subr.bf16.mxu0 %v5604_v37 }
 0x15d   : > { %5115 = vmatpush3.bf16.msra.mxu0 %v5604_v37  ;;  %v2162_v37 = vld [vmem:[#allocation3 + $0x30] sm:$0xff] }
 0x15e   : > { %5116 = vmatprep.subr.bf16.mxu0 %v5605_v28 }
 0x160   : > { %5109 = vmatmul.mubr.msk.bf16.gmra.mrb[20].mxu0 %vm6314_vm11, %v6320_v41 }
 0x161   : > { %5117 = vmatpush3.bf16.msra.mxu0 %v5605_v28  ;;  %5128 = vmatprep.mubr.msk.bf16.mxu0 %vm6146_vm3, %v4305_v44  ;;  %v2163_v28 = vld [vmem:[#allocation3 + $0x38] sm:$0xff]  ;;  %v5644_v44 = vld [vmem:[%s7069_s3 + $0x208] sm:$0xff]  }
 0x162   : > { %5118 = vmatprep.subr.bf16.mxu0 %v5606_v43 }
 0x165   : > { %5119 = vmatpush3.bf16.msra.mxu0 %v5606_v43  ;;  %v2168_v43 = vpack.c.bf16 %v2162_v37, %v6105_v3 }
 0x166   : > { %5120 = vmatprep.subr.bf16.mxu0 %v5607_v46 }
 0x169   : > { %5121 = vmatpush3.bf16.msra.mxu0 %v5607_v46 }
 0x16a   : > { %5122 = vmatprep.subr.bf16.mxu0 %v5608_v47 }
 0x16d   : > { %5123 = vmatpush3.bf16.msra.mxu0 %v5608_v47  ;;  %v5645_v47 = vld [vmem:[%s7069_s3 + $0x210] sm:$0xff]  }
 0x16e   : > { %5124 = vmatprep.subr.bf16.mxu0 %v5609_v12 }
 0x171   : > { %5125 = vmatpush3.bf16.msra.mxu0 %v5609_v12  ;;  %v6509_v12 = vld [vmem:[#allocation3 + $0x8] sm:$0xff] }
 0x172   : > { %5126 = vmatprep.subr.bf16.mxu0 %v5610_v48  ;;  %v2170_v3 = vpack.c.bf16 %v6509_v12, %v6125_v9  ;;  %v5648_v9 = vld [vmem:[%s7069_s3 + $0x228] sm:$0xff]  }
 0x175   : > { %5127 = vmatpush3.bf16.msra.mxu0 %v5610_v48  ;;  %v5646_v48 = vld [vmem:[%s7069_s3 + $0x218] sm:$0xff]  }
 0x176   : > { %5136 = vmatprep.subr.bf16.mxu0 %v5611_v54 }
 0x178   : > { %5129 = vmatmul.mubr.msk.bf16.vlgmr.msra.gmra.mrb[16].mxu0 %vm6210_vm8, %v4308_v58  ;;  %v5649_v58 = vld [vmem:[%s7069_s3 + $0x230] sm:$0xff]  }
 0x179   : > { %5132 = vmatprep.mubr.msk.bf16.mxu0 %vm6218_vm9, %v4311_v62  ;;  %5137 = vmatpush3.bf16.msra.mxu0 %v5611_v54  ;;  %v5647_v54 = vld [vmem:[%s7069_s3 + $0x220] sm:$0xff]  }
 0x17a   : > { %5138 = vmatprep.subr.bf16.mxu0 %v5612_v61  ;;  %v5651_v62 = vld [vmem:[%s7071_s5 + $0x40] sm:$0xff]  }
 0x17b   : > { %5257 = vmatpush3.bf16.msra.mxu1 %v5651_v62 }
 0x17c   : > { %5258 = vmatprep.subr.bf16.mxu1 %v6509_v12 }
 0x17d   : > { %5139 = vmatpush3.bf16.msra.mxu0 %v5612_v61 }
 0x17e   : > { %5140 = vmatprep.subr.bf16.mxu0 %v5613_v50 }
 0x17f   : > { %5259 = vmatpush3.bf16.msra.mxu1 %v5652_v26 }
 0x180   : > { %5133 = vmatmul.mubr.msk.bf16.gmra.mrb[20].mxu0 %vm6248_vm14, %v4314_v0  ;;  %5260 = vmatprep.subr.bf16.mxu1 %v6509_v12  ;;  %v4472_v0 = vld [vmem:[%s7070_s4] ss:$0 sm:$0xff] }
 0x181   : > { %5141 = vmatpush3.bf16.msra.mxu0 %v5613_v50  ;;  %5152 = vmatprep.mubr.bf16.mxu0 %v1701_v33  ;;  %v5620_v33 = vld [vmem:[%s7069_s3 + $0x148] sm:$0xff]   ;;  %v5657_v50 = vld [vmem:[%s7071_s5 + $0x70] sm:$0xff]  }
 0x182   : > { %5142 = vmatprep.subr.bf16.mxu0 %v5614_v53 }
 0x183   : > { %5261 = vmatpush3.bf16.msra.mxu1 %v5653_v35  ;;  %v5659_v35 = vld [vmem:[%s7071_s5] sm:$0xff]  }
 0x184   : > { %5262 = vmatprep.subr.bf16.mxu1 %v6509_v12 }
 0x185   : > { %5143 = vmatpush3.bf16.msra.mxu0 %v5614_v53 }
 0x186   : > { %5144 = vmatprep.subr.bf16.mxu0 %v5615_v1 }
 0x189   : > { %5145 = vmatpush3.bf16.msra.mxu0 %v5615_v1 }
 0x18a   : > { %5146 = vmatprep.subr.bf16.mxu0 %v5616_v2 }
 0x18d   : > { %5147 = vmatpush3.bf16.msra.mxu0 %v5616_v2 }
 0x18e   : > { %5148 = vmatprep.subr.bf16.mxu0 %v5617_v27 }
 0x191   : > { %5149 = vmatpush3.bf16.msra.mxu0 %v5617_v27 }
 0x192   : > { %5150 = vmatprep.subr.bf16.mxu0 %v5618_v36 }
 0x195   : > { %5151 = vmatpush3.bf16.msra.mxu0 %v5618_v36 }
 0x196   : > { %5160 = vmatprep.subr.bf16.mxu0 %v5619_v6 }
 0x198   : > { %5153 = vmatmul.mubr.bf16.vlgmr.msra.gmra.mrb[16].mxu0 %v1702_v15  ;;  %v6442_v15 = vld [vmem:[#allocation3 + $0x49] sm:$0xff] }
 0x199   : > { %5156 = vmatprep.mubr.bf16.mxu0 %v1703_v34  ;;  %5161 = vmatpush3.bf16.msra.mxu0 %v5619_v6  ;;  %v5625_v34 = vld [vmem:[%s7069_s3 + $0x170] sm:$0xff]  }
 0x19a   : > { %5162 = vmatprep.subr.bf16.mxu0 %v5620_v33 }
 0x19d   : > { %5163 = vmatpush3.bf16.msra.mxu0 %v5620_v33 }
 0x19e   : > { %5164 = vmatprep.subr.bf16.mxu0 %v5621_v59 }
 0x1a0   : > { %5157 = vmatmul.mubr.bf16.gmra.mrb[20].mxu0 %v1704_v20  ;;  %v5632_v20 = vld [vmem:[%s7069_s3 + $0x1a8] sm:$0xff]  }
 0x1a1   : > { %5165 = vmatpush3.bf16.msra.mxu0 %v5621_v59  ;;  %5176 = vmatprep.mubr.msk.bf16.mxu0 %vm6256_vm15, %v4365_v16  ;;  %v4374_v16 = vpack.c.bf16 %v6442_v15, %v6312_v39  ;;  %v2164_v39 = vld [vmem:[#allocation3 + $0x40] sm:$0xff] }
 0x1a2   : > { %5166 = vmatprep.subr.bf16.mxu0 %v5622_v60  ;;  %v2169_v46 = vpack.c.bf16 %v2164_v39, %v2163_v28 }
 0x1a5   : > { %5167 = vmatpush3.bf16.msra.mxu0 %v5622_v60 }
 0x1a6   : > { %5168 = vmatprep.subr.bf16.mxu0 %v5623_v42 }
 0x1a9   : > { %5169 = vmatpush3.bf16.msra.mxu0 %v5623_v42 }
 0x1aa   : > { %5170 = vmatprep.subr.bf16.mxu0 %v5624_v17 }
 0x1ad   : > { %5171 = vmatpush3.bf16.msra.mxu0 %v5624_v17 }
 0x1ae   : > { %5172 = vmatprep.subr.bf16.mxu0 %v5625_v34 }
 0x1b1   : > { %5173 = vmatpush3.bf16.msra.mxu0 %v5625_v34 }
 0x1b2   : > { %5174 = vmatprep.subr.bf16.mxu0 %v5626_v45 }
 0x1b5   : > { %5175 = vmatpush3.bf16.msra.mxu0 %v5626_v45 }
 0x1b6   : > { %5184 = vmatprep.subr.bf16.mxu0 %v5627_v52 }
 0x1b8   : > { %5177 = vmatmul.mubr.msk.bf16.vlgmr.msra.gmra.mrb[16].mxu0 %vm6284_vm5, %v4368_v30  ;;  %v5637_v30 = vld [vmem:[%s7069_s3 + $0x1d0] sm:$0xff]  }
 0x1b9   : > { %5180 = vmatprep.mubr.msk.bf16.mxu0 %vm6292_vm6, %v4371_v22  ;;  %5185 = vmatpush3.bf16.msra.mxu0 %v5627_v52  ;;  %v5633_v22 = vld [vmem:[%s7069_s3 + $0x1b0] sm:$0xff]  }
 0x1ba   : > { %5186 = vmatprep.subr.bf16.mxu0 %v5628_v8 }
 0x1bd   : > { %5187 = vmatpush3.bf16.msra.mxu0 %v5628_v8 }
 0x1be   : > { %5188 = vmatprep.subr.bf16.mxu0 %v5629_v13 }
 0x1c0   : > { %5181 = vmatmul.mubr.msk.bf16.gmra.mrb[20].mxu0 %vm6314_vm11, %v4374_v16 }
 0x1c1   : > { %5189 = vmatpush3.bf16.msra.mxu0 %v5629_v13  ;;  %5200 = vmatprep.mubr.msk.bf16.mxu0 %vm6146_vm3, %v6216_v56  ;;  %v2008_v56 = vld [vmem:[#allocation3 + $0x4f] sm:$0xff]  ;;  %vm5832_vm3 = vmmov 0  }
 0x1c2   : > { %5190 = vmatprep.subr.bf16.mxu0 %v5630_v14  ;;  %v4410_v10 = vpack.c.bf16 %v2008_v56, %v6361_v51  ;;  %5272 = vmatprep.mubr.msk.bf16.mxu1 %vm5832_vm3, %v6509_v12  ;;  %v5658_v51 = vld [vmem:[%s7071_s5 + $0x78] sm:$0xff]  }
 0x1c5   : > { %5191 = vmatpush3.bf16.msra.mxu0 %v5630_v14 }
 0x1c6   : > { %5192 = vmatprep.subr.bf16.mxu0 %v5631_v19 }
 0x1c9   : > { %5193 = vmatpush3.bf16.msra.mxu0 %v5631_v19 }
 0x1ca   : > { %5194 = vmatprep.subr.bf16.mxu0 %v5632_v20 }
 0x1cd   : > { %5195 = vmatpush3.bf16.msra.mxu0 %v5632_v20 }
 0x1ce   : > { %5196 = vmatprep.subr.bf16.mxu0 %v5633_v22 }
 0x1d1   : > { %5197 = vmatpush3.bf16.msra.mxu0 %v5633_v22 }
 0x1d2   : > { %5198 = vmatprep.subr.bf16.mxu0 %v5634_v18 }
 0x1d5   : > { %5199 = vmatpush3.bf16.msra.mxu0 %v5634_v18 }
 0x1d6   : > { %5208 = vmatprep.subr.bf16.mxu0 %v5635_v25 }
 0x1d8   : > { %5201 = vmatmul.mubr.msk.bf16.vlgmr.msra.gmra.mrb[16].mxu0 %vm6210_vm8, %v6229_v63  ;;  %v2167_v63 = vpack.c.bf16 %v2160_v7, %v2159_v11 }
 0x1d9   : > { %5204 = vmatprep.mubr.msk.bf16.mxu0 %vm6218_vm9, %v6254_v23  ;;  %5209 = vmatpush3.bf16.msra.mxu0 %v5635_v25  ;;  %v5640_v23 = vld [vmem:[%s7069_s3 + $0x1e8] sm:$0xff]  }
 0x1da   : > { %5210 = vmatprep.subr.bf16.mxu0 %v5636_v29 }
 0x1dd   : > { %5211 = vmatpush3.bf16.msra.mxu0 %v5636_v29 }
 0x1de   : > { %5212 = vmatprep.subr.bf16.mxu0 %v5637_v30 }
 0x1e0   : > { %5205 = vmatmul.mubr.msk.bf16.gmra.mrb[20].mxu0 %vm6248_vm14, %v4410_v10 }
 0x1e1   : > { %5213 = vmatpush3.bf16.msra.mxu0 %v5637_v30  ;;  %5224 = vmatprep.mubr.bf16.mxu0 %v2167_v63 }
 0x1e2   : > { %5214 = vmatprep.subr.bf16.mxu0 %v5638_v55 }
 0x1e5   : > { %5215 = vmatpush3.bf16.msra.mxu0 %v5638_v55 }
 0x1e6   : > { %5216 = vmatprep.subr.bf16.mxu0 %v5639_v57 }
 0x1e9   : > { %5217 = vmatpush3.bf16.msra.mxu0 %v5639_v57 }
 0x1ea   : > { %5218 = vmatprep.subr.bf16.mxu0 %v5640_v23 }
 0x1ed   : > { %5219 = vmatpush3.bf16.msra.mxu0 %v5640_v23 }
 0x1ee   : > { %5220 = vmatprep.subr.bf16.mxu0 %v5641_v4 }
 0x1f1   : > { %5221 = vmatpush3.bf16.msra.mxu0 %v5641_v4 }
 0x1f2   : > { %5222 = vmatprep.subr.bf16.mxu0 %v5642_v21 }
 0x1f5   : > { %5223 = vmatpush3.bf16.msra.mxu0 %v5642_v21 }
 0x1f6   : > { %5232 = vmatprep.subr.bf16.mxu0 %v5643_v24 }
 0x1f8   : > { %5225 = vmatmul.mubr.bf16.vlgmr.msra.gmra.mrb[16].mxu0 %v2168_v43 }
 0x1f9   : > { %5228 = vmatprep.mubr.bf16.mxu0 %v2169_v46  ;;  %5233 = vmatpush3.bf16.msra.mxu0 %v5643_v24 }
 0x1fa   : > { %5234 = vmatprep.subr.bf16.mxu0 %v5644_v44 }
 0x1fd   : > { %5235 = vmatpush3.bf16.msra.mxu0 %v5644_v44 }
 0x1fe   : > { %5236 = vmatprep.subr.bf16.mxu0 %v5645_v47 }
 0x200   : > { %5229 = vmatmul.mubr.bf16.gmra.mrb[20].mxu0 %v2170_v3 }
 0x201   : > { %5237 = vmatpush3.bf16.msra.mxu0 %v5645_v47  ;;  %5248 = vmatprep.mubr.msk.bf16.mxu0 %vm6256_vm15, %v6290_v31  ;;  %v2316_v31 = vld [vmem:[#allocation3 + $0x51] sm:$0xff] }
 0x202   : > { %5238 = vmatprep.subr.bf16.mxu0 %v5646_v48  ;;  %v4470_v61 = vpack.c.bf16 %v2316_v31, %v6442_v15 }
 0x205   : > { %5239 = vmatpush3.bf16.msra.mxu0 %v5646_v48 }
 0x206   : > { %5240 = vmatprep.subr.bf16.mxu0 %v5647_v54 }
 0x209   : > { %5241 = vmatpush3.bf16.msra.mxu0 %v5647_v54 }
 0x20a   : > { %5242 = vmatprep.subr.bf16.mxu0 %v5648_v9 }
 0x20d   : > { %5243 = vmatpush3.bf16.msra.mxu0 %v5648_v9 }
 0x20e   : > { %5244 = vmatprep.subr.bf16.mxu0 %v5649_v58 }
 0x211   : > { %5245 = vmatpush3.bf16.msra.mxu0 %v5649_v58 }
 0x212   : > { %5246 = vmatprep.subr.bf16.mxu0 %v5650_v5 }
 0x215   : > { %5247 = vmatpush3.bf16.msra.mxu0 %v5650_v5 }
 0x218   : > { %5249 = vmatmul.mubr.msk.bf16.vlgmr.msra.gmra.mrb[16].mxu0 %vm6284_vm5, %v6301_v38  ;;  %v5654_v38 = vld [vmem:[%s7071_s5 + $0x58] sm:$0xff]  }
 0x219   : > { %5252 = vmatprep.mubr.msk.bf16.mxu0 %vm6292_vm6, %v6320_v41  ;;  %5263 = vmatpush3.bf16.msra.mxu1 %v5654_v38  ;;  %v5656_v41 = vld [vmem:[%s7071_s5 + $0x68] sm:$0xff]  }
 0x21a   : > { %5264 = vmatprep.subr.bf16.mxu1 %v6509_v12 }
 0x21d   : > { %5265 = vmatpush3.bf16.msra.mxu1 %v5655_v40  ;;  %v5660_v40 = vld [vmem:[%s7071_s5 + $0x8] sm:$0xff]  }
 0x21e   : > { %5266 = vmatprep.subr.bf16.mxu1 %v6509_v12 }
 0x220   : > { %5253 = vmatmul.mubr.msk.bf16.gmra.mrb[20].mxu0 %vm6314_vm11, %v4470_v61 }
 0x221   : > { %5267 = vmatpush3.bf16.msra.mxu1 %v5656_v41  ;;  %v5661_v41 = vld [vmem:[%s7071_s5 + $0x10] sm:$0xff]  }
 0x222   : > { %5268 = vmatprep.subr.bf16.mxu1 %v6509_v12 }
 0x225   : > { %5269 = vmatpush3.bf16.msra.mxu1 %v5657_v50  ;;  %v5662_v50 = vld [vmem:[%s7071_s5 + $0x18] sm:$0xff]  }
 0x226   : > { %5270 = vmatprep.subr.bf16.mxu1 %v6509_v12 }
 0x229   : > { %5271 = vmatpush3.bf16.msra.mxu1 %v5658_v51  ;;  %v5663_v51 = vld [vmem:[%s7071_s5 + $0x20] sm:$0xff]  }
 0x22a   : > { %5276 = vmatprep.subr.bf16.mxu1 %v6509_v12 }
 0x2eb   : > { %v5250_v53 = vpop.f32.mrb[16].mxu0 }
 0x2ec   : > { %v2475_v1 = vadd.f32 %v5250_v53, %v4472_v0  ;;  %v2428_v2 = vpop.f32.mrb[17].mxu0  ;;  %v5665_v53 = vld [vmem:[%s7071_s5 + $0x30] sm:$0xff]  }
 0x2ed   : > { %v2473_v27 = vadd.f32 %v4472_v0, %v2428_v2  ;;  %v5251_v36 = vpop.f32.mrb[18].mxu0  ;;  %v2549_v2 = vand.u32 3, %v6088_v49 }
 0x2ee   : > { %v2483_v6 = vmax.f32 %v2475_v1, 0.0  ;;  %v2476_v33 = vadd.f32 %v5251_v36, %v4472_v0  ;;  %v2431_v59 = vpop.f32.mrb[19].mxu0  ;;  %v2542_v1 = vand.u32 3, %v6079_v32  ;;  %v5667_v32 = vld [vmem:[%s7071_s5 + $0x80] sm:$0xff]  }
 0x2ef   : > { %v2481_v60 = vmax.f32 %v2473_v27, 0.0  ;;  %v2474_v42 = vadd.f32 %v4472_v0, %v2431_v59  ;;  %v5666_v27 = vld [vmem:[%s7071_s5 + $0x38] sm:$0xff]   ;;  %vm2563_vm9 = vcmp.ne.s32.totalorder %v2549_v2, 0  ;;  %v5668_v59 = vld [vmem:[%s7071_s5 + $0x88] sm:$0xff]   ;;  %vm2565_vm14 = vcmp.ne.s32.totalorder %v2549_v2, 3 }
 0x2f0   : > { %2491 = vst [vmem:[#allocation2 + $0x10] sm:$0xff] %v2483_v6  ;;  %v2484_v17 = vmax.f32 %v2476_v33, 0.0  ;;  %vm2562_vm8 = vcmp.ne.s32.totalorder %v2542_v1, 0  ;;  %vm2564_vm13 = vcmp.ne.s32.totalorder %v2542_v1, 3  ;;  %v5708_v2 = vld [vmem:[%s7071_s5 + $0x1c8] sm:$0xff]  }
 0x2f1   : > { %2489 = vst [vmem:[#allocation2] sm:$0xff] %v2481_v60  ;;  %v2482_v34 = vmax.f32 %v2474_v42, 0.0  ;;  %vm6617_vm12 = vmpackc.low %vm2563_vm9, %vm2562_vm8  ;;  %v5669_v60 = vld [vmem:[%s7071_s5 + $0x90] sm:$0xff]   ;;  %v5670_v42 = vld [vmem:[%s7071_s5 + $0x98] sm:$0xff]  }
 0x2f2   : > { %2492 = vst [vmem:[#allocation2 + $0x18] sm:$0xff] %v2484_v17  ;;  %v5671_v17 = vld [vmem:[%s7071_s5 + $0xa0] sm:$0xff]   ;;  %vm6660_vm15 = vmpackc.low %vm2565_vm14, %vm2564_vm13  ;;  %v5712_v33 = vld [vmem:[%s7071_s5 + $0x1e8] sm:$0xff]  }
 0x2f3   : > { %2490 = vst [vmem:[#allocation2 + $0x8] sm:$0xff] %v2482_v34  ;;  %v5254_v45 = vpop.f32.mrb[20].mxu0  ;;  %v5672_v34 = vld [vmem:[%s7071_s5 + $0xa8] sm:$0xff]  }
 0x2f4   : > { %v2479_v52 = vadd.f32 %v5254_v45, %v4472_v0  ;;  %v2444_v8 = vpop.f32.mrb[21].mxu0  ;;  %v5673_v45 = vld [vmem:[%s7071_s5 + $0xb0] sm:$0xff]  }
 0x2f5   : > { %v5255_v13 = vpop.f32.mrb[22].mxu0  ;;  %v2477_v20 = vadd.f32 %v4472_v0, %v2444_v8 }
 0x2f6   : > { %v2487_v15 = vmax.f32 %v2479_v52, 0.0  ;;  %v2447_v16 = vpop.f32.mrb[23].mxu0  ;;  %v2480_v22 = vadd.f32 %v5255_v13, %v4472_v0  ;;  %v5674_v52 = vld [vmem:[%s7071_s5 + $0xb8] sm:$0xff]  }
 0x2f7   : > { %v2507_v14 = vld [vmem:[#allocation2 + $0x10] ss:$2 sm:$0xf]  ;;  %v2508_v19 = vld [vmem:[#allocation2 + $0x11] ss:$2 sm:$0xf]  ;;  %v2478_v18 = vadd.f32 %v4472_v0, %v2447_v16 }
 0x2f8   : > { %v2497_v25 = vld [vmem:[#allocation2] ss:$2 sm:$0xf]  ;;  %v2498_v29 = vld [vmem:[#allocation2 + $0x1] ss:$2 sm:$0xf]  ;;  %v2513_v7 = vmax.f32 %v2507_v14, %v2508_v19 }
 0x2f9   : > { %2495 = vst [vmem:[#allocation2 + $0x30] sm:$0xff] %v2487_v15  ;;  %v2510_v30 = vld [vmem:[#allocation2 + $0x18] ss:$2 sm:$0xf]  ;;  %v2503_v10 = vmax.f32 %v2497_v25, %v2498_v29  ;;  %v2485_v23 = vmax.f32 %v2477_v20, 0.0  ;;  %v2488_v4 = vmax.f32 %v2480_v22, 0.0 }
 0x2fa   : > { %v2512_v56 = vld [vmem:[#allocation2 + $0x19] ss:$2 sm:$0xf]  ;;  %v2500_v55 = vld [vmem:[#allocation2 + $0x8] ss:$2 sm:$0xf] }
 0x2fb   : > { %v2514_v11 = vmax.f32 %v2510_v30, %v2512_v56  ;;  %v2502_v63 = vld [vmem:[#allocation2 + $0x9] ss:$2 sm:$0xf]  ;;  %v2486_v21 = vmax.f32 %v2478_v18, 0.0  ;;  %2493 = vst [vmem:[#allocation2 + $0x20] sm:$0xff] %v2485_v23  ;;  %2496 = vst [vmem:[#allocation2 + $0x38] sm:$0xff] %v2488_v4 }
 0x2fc   : > { %v2504_v57 = vmax.f32 %v2500_v55, %v2502_v63  ;;  %v5664_v0 = vld [vmem:[%s7071_s5 + $0x28] sm:$0xff]   ;;  %v5675_v16 = vld [vmem:[%s7071_s5 + $0xc0] sm:$0xff]   ;;  %v5677_v20 = vld [vmem:[%s7071_s5 + $0xd0] sm:$0xff]  }
 0x2fd   : > { %v2515_v24 = vmax.f32 %v2513_v7, %v2514_v11  ;;  %2494 = vst [vmem:[#allocation2 + $0x28] sm:$0xff] %v2486_v21  ;;  %v5676_v19 = vld [vmem:[%s7071_s5 + $0xc8] sm:$0xff]   ;;  %v5678_v22 = vld [vmem:[%s7071_s5 + $0xd8] sm:$0xff]   ;;  %v5679_v18 = vld [vmem:[%s7071_s5 + $0xe0] sm:$0xff]  }
 0x2fe   : > { %v2505_v37 = vmax.f32 %v2503_v10, %v2504_v57  ;;  %v5680_v25 = vld [vmem:[%s7071_s5 + $0xe8] sm:$0xff]   ;;  %v5681_v29 = vld [vmem:[%s7071_s5 + $0xf0] sm:$0xff]   ;;  %v5682_v30 = vld [vmem:[%s7071_s5 + $0xf8] sm:$0xff]  }
 0x2ff   : > { %2516 = vst [vmem:[#allocation4 + $0xc] sm:$0xf] %v2515_v24  ;;  %v5683_v10 = vld [vmem:[%s7071_s5 + $0x100] sm:$0xff]   ;;  %v5684_v55 = vld [vmem:[%s7071_s5 + $0x108] sm:$0xff]   ;;  %v5685_v63 = vld [vmem:[%s7071_s5 + $0x110] sm:$0xff]  }
 0x300   : > { %2506 = vst [vmem:[#allocation4 + $0x8] sm:$0xf] %v2505_v37  ;;  %v2527_v28 = vld [vmem:[#allocation2 + $0x30] ss:$2 sm:$0xf]  ;;  %v5686_v57 = vld [vmem:[%s7071_s5 + $0x118] sm:$0xff]  }
 0x301   : > { %v2528_v39 = vld [vmem:[#allocation2 + $0x31] ss:$2 sm:$0xf]  ;;  %v5687_v23 = vld [vmem:[%s7071_s5 + $0x120] sm:$0xff]   ;;  %v5688_v4 = vld [vmem:[%s7071_s5 + $0x128] sm:$0xff]  }
 0x302   : > { %v2517_v43 = vld [vmem:[#allocation2 + $0x20] ss:$2 sm:$0xf]  ;;  %v2518_v44 = vld [vmem:[#allocation2 + $0x21] ss:$2 sm:$0xf]  ;;  %v2533_v3 = vmax.f32 %v2527_v28, %v2528_v39 }
 0x303   : > { %v2530_v46 = vld [vmem:[#allocation2 + $0x38] ss:$2 sm:$0xf]  ;;  %v2532_v47 = vld [vmem:[#allocation2 + $0x39] ss:$2 sm:$0xf]  ;;  %v2523_v58 = vmax.f32 %v2517_v43, %v2518_v44 }
 0x304   : > { %v2534_v48 = vmax.f32 %v2530_v46, %v2532_v47  ;;  %v2520_v54 = vld [vmem:[#allocation2 + $0x28] ss:$2 sm:$0xf]  ;;  %v2522_v9 = vld [vmem:[#allocation2 + $0x29] ss:$2 sm:$0xf] }
 0x305   : > { %v2524_v5 = vmax.f32 %v2520_v54, %v2522_v9  ;;  %v5689_v21 = vld [vmem:[%s7071_s5 + $0x130] sm:$0xff]   ;;  %v5690_v24 = vld [vmem:[%s7071_s5 + $0x138] sm:$0xff]   ;;  %v5691_v39 = vld [vmem:[%s7071_s5 + $0x140] sm:$0xff]  }
 0x306   : > { %v2535_v31 = vmax.f32 %v2533_v3, %v2534_v48  ;;  %v5692_v44 = vld [vmem:[%s7071_s5 + $0x148] sm:$0xff]   ;;  %v5693_v46 = vld [vmem:[%s7071_s5 + $0x150] sm:$0xff]   ;;  %v5694_v47 = vld [vmem:[%s7071_s5 + $0x158] sm:$0xff]  }
 0x307   : > { %v2525_v61 = vmax.f32 %v2523_v58, %v2524_v5  ;;  %v2591_v62 = vld [vmem:[#allocation4 + $0x4] sm:$0xff]  ;;  %v5697_v54 = vld [vmem:[%s7071_s5 + $0x170] sm:$0xff]   ;;  %v5698_v9 = vld [vmem:[%s7071_s5 + $0x178] sm:$0xff]  }
 0x308   : > { %2536 = vst [vmem:[#allocation4 + $0x14] sm:$0xf] %v2535_v31  ;;  %v2566_v6 = vld [vmem:[#allocation4 + $0x3] sm:$0xff] }
 0x309   : > { %2526 = vst [vmem:[#allocation4 + $0x10] sm:$0xf] %v2525_v61  ;;  %v2789_v13 = vld [vmem:[#allocation4 + $0x5] sm:$0xff] }
 0x30a   : > { %v2906_v7 = vld [vmem:[#allocation4 + $0x7] sm:$0xff] }
 0x30b   : > { %v3019_v28 = vld [vmem:[#allocation4 + $0x8] sm:$0xff]  ;;  %v5695_v3 = vld [vmem:[%s7071_s5 + $0x160] sm:$0xff]  }
 0x30c   : > { %v5696_v48 = vld [vmem:[%s7071_s5 + $0x168] sm:$0xff]   ;;  %v5699_v31 = vld [vmem:[%s7071_s5 + $0x180] sm:$0xff]  }
 0x30d   : > { %v5724_v15 = vld [vmem:[%s7073_s7] sm:$0xff]  }
 0x310   : > { %v6577_v26 = vld [vmem:[#allocation4 + $0xc] sm:$0xff] }
 0x311   : > { %v2593_v38 = vpack.c.bf16 %v6577_v26, %v2591_v62  ;;  %v6615_v36 = vld [vmem:[#allocation4 + $0xb] sm:$0xff] }
 0x312   : > { %v4506_v49 = vpack.c.bf16 %v6615_v36, %v2566_v6  ;;  %v6658_v8 = vld [vmem:[#allocation4 + $0xd] sm:$0xff]  ;;  %v5711_v6 = vld [vmem:[%s7071_s5 + $0x1e0] sm:$0xff]  }
 0x313   : > { %5273 = vmatmul.mubr.bf16.vlgmr.msra.gmra.mrb[16].mxu1 %v2593_v38  ;;  %v4533_v14 = vpack.c.bf16 %v6658_v8, %v2789_v13  ;;  %v2907_v56 = vld [vmem:[#allocation4 + $0xf] sm:$0xff]  ;;  %v5702_v38 = vld [vmem:[%s7071_s5 + $0x198] sm:$0xff]  }
 0x314   : > { %5277 = vmatpush3.bf16.msra.mxu1 %v5659_v35  ;;  %5292 = vmatprep.mubr.msk.bf16.mxu1 %vm5832_vm3, %v6509_v12  ;;  %v4560_v11 = vpack.c.bf16 %v2907_v56, %v2906_v7  ;;  %v3020_v37 = vld [vmem:[#allocation4 + $0x10] sm:$0xff]  ;;  %v5700_v62 = vld [vmem:[%s7071_s5 + $0x188] sm:$0xff]   ;;  %v5722_v7 = vld [vmem:[%s7071_s5 + $0x238] sm:$0xff]  }
 0x315   : > { %5278 = vmatprep.subr.bf16.mxu1 %v6509_v12  ;;  %v3021_v43 = vpack.c.bf16 %v3020_v37, %v3019_v28  ;;  %v3130_v58 = vld [vmem:[#allocation4 + $0x9] sm:$0xff]  ;;  %v3131_v5 = vld [vmem:[#allocation4 + $0x11] sm:$0xff] }
 0x316   : > { %v4611_v61 = vpack.c.bf16 %v3131_v5, %v3130_v58  ;;  %v5701_v35 = vld [vmem:[%s7071_s5 + $0x190] sm:$0xff]   ;;  %v5716_v13 = vld [vmem:[%s7071_s5 + $0x208] sm:$0xff]  }
 0x318   : > { %5279 = vmatpush3.bf16.msra.mxu1 %v5660_v40  ;;  %v5703_v40 = vld [vmem:[%s7071_s5 + $0x1a0] sm:$0xff]  }
 0x319   : > { %5280 = vmatprep.subr.bf16.mxu1 %v6509_v12 }
 0x31c   : > { %5281 = vmatpush3.bf16.msra.mxu1 %v5661_v41  ;;  %v5704_v41 = vld [vmem:[%s7071_s5 + $0x1a8] sm:$0xff]  }
 0x31d   : > { %5282 = vmatprep.subr.bf16.mxu1 %v6509_v12 }
 0x320   : > { %5283 = vmatpush3.bf16.msra.mxu1 %v5662_v50  ;;  %v5705_v50 = vld [vmem:[%s7071_s5 + $0x1b0] sm:$0xff]  }
 0x321   : > { %5284 = vmatprep.subr.bf16.mxu1 %v6509_v12 }
 0x324   : > { %5285 = vmatpush3.bf16.msra.mxu1 %v5663_v51  ;;  %v5706_v51 = vld [vmem:[%s7071_s5 + $0x1b8] sm:$0xff]  }
 0x325   : > { %5286 = vmatprep.subr.bf16.mxu1 %v6509_v12 }
 0x328   : > { %5287 = vmatpush3.bf16.msra.mxu1 %v5664_v0  ;;  %v3244_v0 = vld [vmem:[#allocation4 + $0x13] sm:$0xff] }
 0x329   : > { %5288 = vmatprep.subr.bf16.mxu1 %v6509_v12  ;;  %v4638_v1 = vpack.c.bf16 %v3244_v0, %v6615_v36  ;;  %v5710_v36 = vld [vmem:[%s7071_s5 + $0x1d8] sm:$0xff]  }
 0x32a   : > { %v5736_v0 = vld [vmem:[%s7073_s7 + $0x18] sm:$0xff]  }
 0x32c   : > { %5289 = vmatpush3.bf16.msra.mxu1 %v5665_v53  ;;  %v5707_v53 = vld [vmem:[%s7071_s5 + $0x1c0] sm:$0xff]  }
 0x32d   : > { %5290 = vmatprep.subr.bf16.mxu1 %v6509_v12 }
 0x330   : > { %5291 = vmatpush3.bf16.msra.mxu1 %v5666_v27  ;;  %v5709_v27 = vld [vmem:[%s7071_s5 + $0x1d0] sm:$0xff]  }
 0x331   : > { %5296 = vmatprep.subr.bf16.mxu1 %v6509_v12 }
 0x333   : > { %5293 = vmatmul.mubr.msk.bf16.vlgmr.msra.gmra.mrb[20].mxu1 %vm6617_vm12, %v4506_v49 }
 0x334   : > { %5297 = vmatpush3.bf16.msra.mxu1 %v5667_v32  ;;  %5312 = vmatprep.mubr.msk.bf16.mxu1 %vm5832_vm3, %v6509_v12 }
 0x335   : > { %5298 = vmatprep.subr.bf16.mxu1 %v6509_v12 }
 0x338   : > { %5299 = vmatpush3.bf16.msra.mxu1 %v5668_v59 }
 0x339   : > { %5300 = vmatprep.subr.bf16.mxu1 %v6509_v12 }
 0x33c   : > { %5301 = vmatpush3.bf16.msra.mxu1 %v5669_v60  ;;  %v5713_v60 = vld [vmem:[%s7071_s5 + $0x1f0] sm:$0xff]  }
 0x33d   : > { %5302 = vmatprep.subr.bf16.mxu1 %v6509_v12 }
 0x340   : > { %5303 = vmatpush3.bf16.msra.mxu1 %v5670_v42 }
 0x341   : > { %5304 = vmatprep.subr.bf16.mxu1 %v6509_v12 }
 0x344   : > { %5305 = vmatpush3.bf16.msra.mxu1 %v5671_v17  ;;  %v5714_v17 = vld [vmem:[%s7071_s5 + $0x1f8] sm:$0xff]  }
 0x345   : > { %5306 = vmatprep.subr.bf16.mxu1 %v6509_v12 }
 0x348   : > { %5307 = vmatpush3.bf16.msra.mxu1 %v5672_v34  ;;  %v3357_v34 = vld [vmem:[#allocation4 + $0x14] sm:$0xff] }
 0x349   : > { %5308 = vmatprep.subr.bf16.mxu1 %v6509_v12 }
 0x34c   : > { %5309 = vmatpush3.bf16.msra.mxu1 %v5673_v45  ;;  %v5715_v45 = vld [vmem:[%s7071_s5 + $0x200] sm:$0xff]  }
 0x34d   : > { %5310 = vmatprep.subr.bf16.mxu1 %v6509_v12 }
 0x350   : > { %5311 = vmatpush3.bf16.msra.mxu1 %v5674_v52  ;;  %v3358_v52 = vpack.c.bf16 %v3357_v34, %v6577_v26  ;;  %v5718_v26 = vld [vmem:[%s7071_s5 + $0x218] sm:$0xff]  }
 0x351   : > { %5316 = vmatprep.subr.bf16.mxu1 %v6509_v12  ;;  %v5751_v34 = vld [vmem:[%s7073_s7 + $0x78] sm:$0xff]  }
 0x353   : > { %5313 = vmatmul.mubr.msk.bf16.vlgmr.msra.gmra.mrb[24].mxu1 %vm6660_vm15, %v4533_v14  ;;  %v5719_v14 = vld [vmem:[%s7071_s5 + $0x220] sm:$0xff]  }
 0x354   : > { %5317 = vmatpush3.bf16.msra.mxu1 %v5675_v16  ;;  %5332 = vmatprep.mubr.msk.bf16.mxu1 %vm5832_vm3, %v6509_v12  ;;  %v5717_v16 = vld [vmem:[%s7071_s5 + $0x210] sm:$0xff]  }
 0x355   : > { %5318 = vmatprep.subr.bf16.mxu1 %v6509_v12 }
 0x358   : > { %5319 = vmatpush3.bf16.msra.mxu1 %v5676_v19  ;;  %v5720_v19 = vld [vmem:[%s7071_s5 + $0x228] sm:$0xff]  }
 0x359   : > { %5320 = vmatprep.subr.bf16.mxu1 %v6509_v12 }
 0x35c   : > { %5321 = vmatpush3.bf16.msra.mxu1 %v5677_v20 }
 0x35d   : > { %5322 = vmatprep.subr.bf16.mxu1 %v6509_v12 }
 0x360   : > { %5323 = vmatpush3.bf16.msra.mxu1 %v5678_v22 }
 0x361   : > { %5324 = vmatprep.subr.bf16.mxu1 %v6509_v12 }
 0x364   : > { %5325 = vmatpush3.bf16.msra.mxu1 %v5679_v18 }
 0x365   : > { %5326 = vmatprep.subr.bf16.mxu1 %v6509_v12 }
 0x368   : > { %5327 = vmatpush3.bf16.msra.mxu1 %v5680_v25 }
 0x369   : > { %5328 = vmatprep.subr.bf16.mxu1 %v6509_v12 }
 0x36c   : > { %5329 = vmatpush3.bf16.msra.mxu1 %v5681_v29  ;;  %v5721_v29 = vld [vmem:[%s7071_s5 + $0x230] sm:$0xff]  }
 0x36d   : > { %5330 = vmatprep.subr.bf16.mxu1 %v6509_v12 }
 0x370   : > { %5331 = vmatpush3.bf16.msra.mxu1 %v5682_v30 }
 0x371   : > { %5336 = vmatprep.subr.bf16.mxu1 %v6509_v12 }
 0x373   : > { %5333 = vmatmul.mubr.msk.bf16.vlgmr.msra.gmra.mrb[28].mxu1 %vm6617_vm12, %v4560_v11 }
 0x374   : > { %5337 = vmatpush3.bf16.msra.mxu1 %v5683_v10  ;;  %5352 = vmatprep.mubr.msk.bf16.mxu1 %vm5832_vm3, %v6509_v12  ;;  %v3468_v10 = vld [vmem:[#allocation4 + $0x15] sm:$0xff] }
 0x375   : > { %5338 = vmatprep.subr.bf16.mxu1 %v6509_v12  ;;  %v4689_v11 = vpack.c.bf16 %v3468_v10, %v6658_v8 }
 0x378   : > { %5339 = vmatpush3.bf16.msra.mxu1 %v5684_v55 }
 0x379   : > { %5340 = vmatprep.subr.bf16.mxu1 %v6509_v12 }
 0x37c   : > { %5341 = vmatpush3.bf16.msra.mxu1 %v5685_v63 }
 0x37d   : > { %5342 = vmatprep.subr.bf16.mxu1 %v6509_v12 }
 0x380   : > { %5343 = vmatpush3.bf16.msra.mxu1 %v5686_v57 }
 0x381   : > { %5344 = vmatprep.subr.bf16.mxu1 %v6509_v12 }
 0x384   : > { %5345 = vmatpush3.bf16.msra.mxu1 %v5687_v23 }
 0x385   : > { %5346 = vmatprep.subr.bf16.mxu1 %v6509_v12 }
 0x388   : > { %5347 = vmatpush3.bf16.msra.mxu1 %v5688_v4 }
 0x389   : > { %5348 = vmatprep.subr.bf16.mxu1 %v6509_v12 }
 0x38c   : > { %5349 = vmatpush3.bf16.msra.mxu1 %v5689_v21 }
 0x38d   : > { %5350 = vmatprep.subr.bf16.mxu1 %v6509_v12 }
 0x390   : > { %5351 = vmatpush3.bf16.msra.mxu1 %v5690_v24 }
 0x391   : > { %5356 = vmatprep.subr.bf16.mxu1 %v6509_v12 }
 0x393   : > { %5353 = vmatmul.mubr.bf16.vlgmr.msra.gmra.mrb[32].mxu1 %v3021_v43 }
 0x394   : > { %5357 = vmatpush3.bf16.msra.mxu1 %v5691_v39  ;;  %5372 = vmatprep.mubr.msk.bf16.mxu1 %vm5832_vm3, %v6509_v12 }
 0x395   : > { %5358 = vmatprep.subr.bf16.mxu1 %v6509_v12 }
 0x398   : > { %5359 = vmatpush3.bf16.msra.mxu1 %v5692_v44 }
 0x399   : > { %5360 = vmatprep.subr.bf16.mxu1 %v6509_v12 }
 0x39c   : > { %5361 = vmatpush3.bf16.msra.mxu1 %v5693_v46  ;;  %v5723_v46 = vld [vmem:[%s7073_s7 + $0x40] sm:$0xff]  }
 0x39d   : > { %5362 = vmatprep.subr.bf16.mxu1 %v6509_v12  ;;  %4947 = vmatprep.subr.bf16.mxu0 %v5723_v46 }
 0x39e   : > { %4948 = vmatpush3.bf16.msra.mxu0 %v5724_v15 }
 0x3a0   : > { %5363 = vmatpush3.bf16.msra.mxu1 %v5694_v47 }
 0x3a1   : > { %5364 = vmatprep.subr.bf16.mxu1 %v6509_v12 }
 0x3a4   : > { %5365 = vmatpush3.bf16.msra.mxu1 %v5695_v3 }
 0x3a5   : > { %5366 = vmatprep.subr.bf16.mxu1 %v6509_v12 }
 0x3a8   : > { %5367 = vmatpush3.bf16.msra.mxu1 %v5696_v48  ;;  %v5725_v48 = vld [vmem:[%s7073_s7 + $0xc0] sm:$0xff]  }
 0x3a9   : > { %5368 = vmatprep.subr.bf16.mxu1 %v6509_v12 }
 0x3ac   : > { %5369 = vmatpush3.bf16.msra.mxu1 %v5697_v54 }
 0x3ad   : > { %5370 = vmatprep.subr.bf16.mxu1 %v6509_v12 }
 0x3b0   : > { %5371 = vmatpush3.bf16.msra.mxu1 %v5698_v9  ;;  %v5726_v9 = vld [vmem:[%s7073_s7 + $0x80] sm:$0xff]  }
 0x3b1   : > { %5376 = vmatprep.subr.bf16.mxu1 %v6509_v12 }
 0x3b3   : > { %5373 = vmatmul.mubr.msk.bf16.vlgmr.msra.gmra.mrb[36].mxu1 %vm6660_vm15, %v4611_v61  ;;  %v5728_v61 = vld [vmem:[%s7073_s7 + $0x8] sm:$0xff]  }
 0x3b4   : > { %5377 = vmatpush3.bf16.msra.mxu1 %v5699_v31  ;;  %5392 = vmatprep.mubr.msk.bf16.mxu1 %vm5832_vm3, %v6509_v12  ;;  %v5727_v31 = vld [vmem:[%s7073_s7 + $0x48] sm:$0xff]  }
 0x3b5   : > { %5378 = vmatprep.subr.bf16.mxu1 %v6509_v12  ;;  %4949 = vmatprep.subr.bf16.mxu0 %v5727_v31 }
 0x3b6   : > { %4950 = vmatpush3.bf16.msra.mxu0 %v5728_v61 }
 0x3b8   : > { %5379 = vmatpush3.bf16.msra.mxu1 %v5700_v62  ;;  %v5729_v62 = vld [vmem:[%s7073_s7 + $0xc8] sm:$0xff]  }
 0x3b9   : > { %5380 = vmatprep.subr.bf16.mxu1 %v6509_v12 }
 0x3bc   : > { %5381 = vmatpush3.bf16.msra.mxu1 %v5701_v35  ;;  %v5730_v35 = vld [vmem:[%s7073_s7 + $0x88] sm:$0xff]  }
 0x3bd   : > { %5382 = vmatprep.subr.bf16.mxu1 %v6509_v12 }
 0x3c0   : > { %5383 = vmatpush3.bf16.msra.mxu1 %v5702_v38  ;;  %v5731_v38 = vld [vmem:[%s7073_s7 + $0x50] sm:$0xff]  }
 0x3c1   : > { %5384 = vmatprep.subr.bf16.mxu1 %v6509_v12  ;;  %4951 = vmatprep.subr.bf16.mxu0 %v5731_v38 }
 0x3c4   : > { %5385 = vmatpush3.bf16.msra.mxu1 %v5703_v40  ;;  %v5732_v40 = vld [vmem:[%s7073_s7 + $0x10] sm:$0xff]  }
 0x3c5   : > { %5386 = vmatprep.subr.bf16.mxu1 %v6509_v12  ;;  %4952 = vmatpush3.bf16.msra.mxu0 %v5732_v40 }
 0x3c8   : > { %5387 = vmatpush3.bf16.msra.mxu1 %v5704_v41  ;;  %v5733_v41 = vld [vmem:[%s7073_s7 + $0xd0] sm:$0xff]  }
 0x3c9   : > { %5388 = vmatprep.subr.bf16.mxu1 %v6509_v12 }
 0x3cc   : > { %5389 = vmatpush3.bf16.msra.mxu1 %v5705_v50  ;;  %v5734_v50 = vld [vmem:[%s7073_s7 + $0x90] sm:$0xff]  }
 0x3cd   : > { %5390 = vmatprep.subr.bf16.mxu1 %v6509_v12 }
 0x3d0   : > { %5391 = vmatpush3.bf16.msra.mxu1 %v5706_v51  ;;  %v5735_v51 = vld [vmem:[%s7073_s7 + $0x58] sm:$0xff]  }
 0x3d1   : > { %5396 = vmatprep.subr.bf16.mxu1 %v6509_v12  ;;  %4953 = vmatprep.subr.bf16.mxu0 %v5735_v51 }
 0x3d2   : > { %4954 = vmatpush3.bf16.msra.mxu0 %v5736_v0 }
 0x3d3   : > { %5393 = vmatmul.mubr.msk.bf16.vlgmr.msra.gmra.mrb[40].mxu1 %vm6617_vm12, %v4638_v1  ;;  %v5739_v1 = vld [vmem:[%s7073_s7 + $0x60] sm:$0xff]  }
 0x3d4   : > { %5397 = vmatpush3.bf16.msra.mxu1 %v5707_v53  ;;  %5412 = vmatprep.mubr.msk.bf16.mxu1 %vm5832_vm3, %v6509_v12  ;;  %v5737_v53 = vld [vmem:[%s7073_s7 + $0xd8] sm:$0xff]  }
 0x3d5   : > { %5398 = vmatprep.subr.bf16.mxu1 %v6509_v12  ;;  %4955 = vmatprep.subr.bf16.mxu0 %v5739_v1 }
 0x3d8   : > { %5399 = vmatpush3.bf16.msra.mxu1 %v5708_v2  ;;  %v5738_v2 = vld [vmem:[%s7073_s7 + $0x98] sm:$0xff]  }
 0x3d9   : > { %5400 = vmatprep.subr.bf16.mxu1 %v6509_v12 }
 0x3dc   : > { %5401 = vmatpush3.bf16.msra.mxu1 %v5709_v27  ;;  %v5741_v27 = vld [vmem:[%s7073_s7 + $0xe0] sm:$0xff]  }
 0x3dd   : > { %5402 = vmatprep.subr.bf16.mxu1 %v6509_v12 }
 0x3e0   : > { %5403 = vmatpush3.bf16.msra.mxu1 %v5710_v36  ;;  %v5740_v36 = vld [vmem:[%s7073_s7 + $0x20] sm:$0xff]  }
 0x3e1   : > { %5404 = vmatprep.subr.bf16.mxu1 %v6509_v12  ;;  %4956 = vmatpush3.bf16.msra.mxu0 %v5740_v36 }
 0x3e4   : > { %5405 = vmatpush3.bf16.msra.mxu1 %v5711_v6  ;;  %v5743_v6 = vld [vmem:[%s7073_s7 + $0x68] sm:$0xff]  }
 0x3e5   : > { %5406 = vmatprep.subr.bf16.mxu1 %v6509_v12  ;;  %4957 = vmatprep.subr.bf16.mxu0 %v5743_v6 }
 0x3e6   : > { %v2693_v32 = vpop.f32.mrb[16].mxu1 }
 0x3e7   : > { %v5274_v49 = vpop.f32.mrb[17].mxu1 }
 0x3e8   : > { %5407 = vmatpush3.bf16.msra.mxu1 %v5712_v33  ;;  %v2696_v59 = vpop.f32.mrb[18].mxu1  ;;  %v5742_v33 = vld [vmem:[%s7073_s7 + $0xa0] sm:$0xff]   ;;  %v5744_v49 = vld [vmem:[%s7073_s7 + $0x28] sm:$0xff]  }
 0x3e9   : > { %v5275_v42 = vpop.f32.mrb[19].mxu1  ;;  %5408 = vmatprep.subr.bf16.mxu1 %v6509_v12  ;;  %4958 = vmatpush3.bf16.msra.mxu0 %v5744_v49  ;;  %v5756_v49 = vld [vmem:[%s7075_s9 + $0x8] sm:$0xff]  }
 0x3ea   : > { %v5749_v42 = vld [vmem:[%s7073_s7 + $0xf0] sm:$0xff]  }
 0x3ec   : > { %5409 = vmatpush3.bf16.msra.mxu1 %v5713_v60  ;;  %v5746_v60 = vld [vmem:[%s7073_s7 + $0xa8] sm:$0xff]  }
 0x3ed   : > { %5410 = vmatprep.subr.bf16.mxu1 %v6509_v12 }
 0x3f0   : > { %5411 = vmatpush3.bf16.msra.mxu1 %v5714_v17  ;;  %v5748_v17 = vld [vmem:[%s7073_s7 + $0x30] sm:$0xff]  }
 0x3f1   : > { %5416 = vmatprep.subr.bf16.mxu1 %v6509_v12 }
 0x3f3   : > { %5413 = vmatmul.mubr.bf16.vlgmr.msra.gmra.mrb[44].mxu1 %v3358_v52  ;;  %v5753_v52 = vld [vmem:[%s7073_s7 + $0xf8] sm:$0xff]  }
 0x3f4   : > { %5417 = vmatpush3.bf16.msra.mxu1 %v5715_v45  ;;  %5432 = vmatprep.mubr.msk.bf16.mxu1 %vm5832_vm3, %v6509_v12  ;;  %v5750_v45 = vld [vmem:[%s7073_s7 + $0xb0] sm:$0xff]  }
 0x3f5   : > { %5418 = vmatprep.subr.bf16.mxu1 %v6509_v12 }
 0x3f8   : > { %5419 = vmatpush3.bf16.msra.mxu1 %v5716_v13  ;;  %v5752_v13 = vld [vmem:[%s7073_s7 + $0x38] sm:$0xff]  }
 0x3f9   : > { %5420 = vmatprep.subr.bf16.mxu1 %v6509_v12 }
 0x3fc   : > { %5421 = vmatpush3.bf16.msra.mxu1 %v5717_v16  ;;  %v5754_v16 = vld [vmem:[%s7073_s7 + $0xb8] sm:$0xff]  }
 0x3fd   : > { %5422 = vmatprep.subr.bf16.mxu1 %v6509_v12 }
 0x400   : > { %5423 = vmatpush3.bf16.msra.mxu1 %v5718_v26 }
 0x401   : > { %5424 = vmatprep.subr.bf16.mxu1 %v6509_v12 }
 0x404   : > { %5425 = vmatpush3.bf16.msra.mxu1 %v5719_v14 }
 0x405   : > { %5426 = vmatprep.subr.bf16.mxu1 %v6509_v12 }
 0x406   : > { %v2782_v20 = vpop.f32.mrb[20].mxu1 }
 0x407   : > { %v2783_v22 = vadd.f32 %v2782_v20, %v2693_v32  ;;  %v5294_v18 = vpop.f32.mrb[21].mxu1  ;;  %v5745_v32 = vld [vmem:[%s7073_s7 + $0xe8] sm:$0xff]  }
 0x408   : > { %v2785_v25 = vpop.f32.mrb[22].mxu1  ;;  %5427 = vmatpush3.bf16.msra.mxu1 %v5720_v19 }
 0x409   : > { %v2786_v30 = vadd.f32 %v2785_v25, %v2696_v59  ;;  %v5295_v56 = vpop.f32.mrb[23].mxu1  ;;  %5428 = vmatprep.subr.bf16.mxu1 %v6509_v12  ;;  %v5747_v59 = vld [vmem:[%s7073_s7 + $0x70] sm:$0xff]  }
 0x40a   : > { %4959 = vmatprep.subr.bf16.mxu0 %v5747_v59  ;;  %v5766_v59 = vld [vmem:[#allocation3 + $0x8] sm:$0xff] }
 0x40b   : > { %4960 = vmatpush3.bf16.msra.mxu0 %v5748_v17  ;;  %v5759_v17 = vld [vmem:[%s7075_s9 + $0x20] sm:$0xff]  }
 0x40c   : > { %5429 = vmatpush3.bf16.msra.mxu1 %v5721_v29  ;;  %4961 = vmatprep.subr.bf16.mxu0 %v5751_v34  ;;  %v5760_v34 = vld [vmem:[%s7075_s9 + $0x28] sm:$0xff]  }
 0x40d   : > { %5430 = vmatprep.subr.bf16.mxu1 %v6509_v12 }
 0x40f   : > { %4962 = vmatpush3.bf16.msra.mxu0 %v5752_v13 }
 0x410   : > { %5431 = vmatpush3.bf16.msra.mxu1 %v5722_v7  ;;  %5436 = vmatprep.subr.bf16.mxu0 %v6509_v12 }
 0x411   : > { %4969 = vmatprep.subr.bf16.mxu1 %v5725_v48 }
 0x413   : > { %5433 = vmatmul.mubr.msk.bf16.vlgmr.msra.gmra.mrb[48].mxu1 %vm6660_vm15, %v4689_v11 }
 0x414   : > { %4970 = vmatpush3.bf16.msra.mxu1 %v5726_v9 }
 0x415   : > { %4971 = vmatprep.subr.bf16.mxu1 %v5729_v62 }
 0x418   : > { %4972 = vmatpush3.bf16.msra.mxu1 %v5730_v35 }
 0x419   : > { %4973 = vmatprep.subr.bf16.mxu1 %v5733_v41 }
 0x41c   : > { %4974 = vmatpush3.bf16.msra.mxu1 %v5734_v50 }
 0x41d   : > { %4975 = vmatprep.subr.bf16.mxu1 %v5737_v53 }
 0x420   : > { %4976 = vmatpush3.bf16.msra.mxu1 %v5738_v2 }
 0x421   : > { %4977 = vmatprep.subr.bf16.mxu1 %v5741_v27  ;;  %v5755_v27 = vld [vmem:[%s7075_s9] sm:$0xff]  }
 0x424   : > { %4978 = vmatpush3.bf16.msra.mxu1 %v5742_v33 }
 0x425   : > { %4979 = vmatprep.subr.bf16.mxu1 %v5745_v32 }
 0x426   : > { %v2897_v55 = vpop.f32.mrb[24].mxu1 }
 0x427   : > { %v2904_v63 = vadd.f32 %v2897_v55, %v2783_v22  ;;  %v5314_v57 = vpop.f32.mrb[25].mxu1 }
 0x428   : > { %v2900_v23 = vpop.f32.mrb[26].mxu1  ;;  %4980 = vmatpush3.bf16.msra.mxu1 %v5746_v60  ;;  %v5757_v60 = vld [vmem:[%s7075_s9 + $0x10] sm:$0xff]  }
 0x429   : > { %v2905_v4 = vadd.f32 %v2900_v23, %v2786_v30  ;;  %v5315_v21 = vpop.f32.mrb[27].mxu1  ;;  %4981 = vmatprep.subr.bf16.mxu1 %v5749_v42  ;;  %v5758_v42 = vld [vmem:[%s7075_s9 + $0x18] sm:$0xff]  }
 0x42c   : > { %4982 = vmatpush3.bf16.msra.mxu1 %v5750_v45  ;;  %v5761_v45 = vld [vmem:[%s7075_s9 + $0x30] sm:$0xff]  }
 0x42d   : > { %4983 = vmatprep.subr.bf16.mxu1 %v5753_v52  ;;  %v5762_v52 = vld [vmem:[%s7075_s9 + $0x38] sm:$0xff]  }
 0x430   : > { %4984 = vmatpush3.bf16.msra.mxu1 %v5754_v16  ;;  %v4692_v16 = vld [vmem:[%s7074_s8] ss:$0 sm:$0xff] }
 0x446   : > { %v3010_v24 = vpop.f32.mrb[28].mxu1 }
 0x447   : > { %v3017_v37 = vadd.f32 %v3010_v24, %v2904_v63  ;;  %v5334_v28 = vpop.f32.mrb[29].mxu1 }
 0x448   : > { %v3013_v39 = vpop.f32.mrb[30].mxu1 }
 0x449   : > { %v3018_v43 = vadd.f32 %v3013_v39, %v2905_v4  ;;  %v5335_v44 = vpop.f32.mrb[31].mxu1  ;;  %v4691_v4 = vld [vmem:[%s7072_s6] ss:$0 sm:$0xff] }
 0x466   : > { %v3121_v8 = vpop.f32.mrb[32].mxu1 }
 0x467   : > { %v6888_v47 = vadd.f32 %v3121_v8, %v3017_v37  ;;  %v5354_v3 = vpop.f32.mrb[33].mxu1 }
 0x468   : > { %v3124_v54 = vpop.f32.mrb[34].mxu1 }
 0x469   : > { %v6896_v58 = vadd.f32 %v3124_v54, %v3018_v43  ;;  %v5355_v5 = vpop.f32.mrb[35].mxu1 }
 0x486   : > { %v3234_v26 = vpop.f32.mrb[36].mxu1 }
 0x487   : > { %v3241_v14 = vadd.f32 %v3234_v26, %v6888_v47  ;;  %v5374_v19 = vpop.f32.mrb[37].mxu1 }
 0x488   : > { %v3237_v20 = vpop.f32.mrb[38].mxu1 }
 0x489   : > { %v3242_v22 = vadd.f32 %v3237_v20, %v6896_v58  ;;  %v5375_v18 = vpop.f32.mrb[39].mxu1 }
 0x4a6   : > { %v3347_v25 = vpop.f32.mrb[40].mxu1 }
 0x4a7   : > { %v3354_v29 = vadd.f32 %v3347_v25, %v3241_v14  ;;  %v5394_v30 = vpop.f32.mrb[41].mxu1 }
 0x4a8   : > { %v3350_v56 = vpop.f32.mrb[42].mxu1 }
 0x4a9   : > { %v3355_v7 = vadd.f32 %v3350_v56, %v3242_v22  ;;  %v5395_v10 = vpop.f32.mrb[43].mxu1 }
 0x4c6   : > { %v3458_v11 = vpop.f32.mrb[44].mxu1 }
 0x4c7   : > { %v3465_v55 = vadd.f32 %v3458_v11, %v3354_v29  ;;  %v5414_v63 = vpop.f32.mrb[45].mxu1 }
 0x4c8   : > { %v3461_v57 = vpop.f32.mrb[46].mxu1 }
 0x4c9   : > { %v3466_v12 = vadd.f32 %v3461_v57, %v3355_v7  ;;  %v5415_v23 = vpop.f32.mrb[47].mxu1 }
 0x4e6   : > { %v3571_v21 = vpop.f32.mrb[48].mxu1 }
 0x4e7   : > { %v3578_v24 = vadd.f32 %v3571_v21, %v3465_v55  ;;  %v5434_v37 = vpop.f32.mrb[49].mxu1  ;;  %v4725_v55 = vld [vmem:[%s7076_s10] ss:$0 sm:$0xff] }
 0x4e8   : > { %v3574_v28 = vpop.f32.mrb[50].mxu1 }
 0x4e9   : > { %v3586_v39 = vadd.f32 %v4691_v4, %v3578_v24  ;;  %v3579_v43 = vadd.f32 %v3574_v28, %v3466_v12  ;;  %v5435_v44 = vpop.f32.mrb[51].mxu1 }
 0x4eb   : > { %v3588_v46 = vmax.f32 %v3586_v39, 0.0  ;;  %v3587_v8 = vadd.f32 %v4691_v4, %v3579_v43 }
 0x4ed   : > { %3590 = vst [vmem:[#allocation2] sm:$0xff] %v3588_v46  ;;  %v3589_v15 = vmax.f32 %v3587_v8, 0.0 }
 0x4ef   : > { %3591 = vst [vmem:[#allocation2 + $0x8] sm:$0xff] %v3589_v15 }
 0x4f4   : > { %v3592_v47 = vld [vmem:[#allocation2] ss:$2 sm:$0x3]  ;;  %v3593_v3 = vld [vmem:[#allocation2 + $0x1] ss:$2 sm:$0x3] }
 0x4f5   : > { %v3595_v48 = vld [vmem:[#allocation2 + $0x4] ss:$2 sm:$0x3]  ;;  %v3597_v54 = vld [vmem:[#allocation2 + $0x5] ss:$2 sm:$0x3]  ;;  %v3598_v9 = vmax.f32 %v3592_v47, %v3593_v3 }
 0x4f6   : > { %v3599_v58 = vmax.f32 %v3595_v48, %v3597_v54  ;;  %v3606_v5 = vld [vmem:[#allocation2 + $0x8] ss:$2 sm:$0x3]  ;;  %v3607_v31 = vld [vmem:[#allocation2 + $0x9] ss:$2 sm:$0x3] }
 0x4f7   : > { %v3609_v61 = vld [vmem:[#allocation2 + $0xc] ss:$2 sm:$0x3]  ;;  %v3611_v62 = vld [vmem:[#allocation2 + $0xd] ss:$2 sm:$0x3]  ;;  %v3612_v35 = vmax.f32 %v3606_v5, %v3607_v31 }
 0x4f8   : > { %v3600_v38 = vmax.f32 %v3598_v9, %v3599_v58  ;;  %v3613_v40 = vmax.f32 %v3609_v61, %v3611_v62 }
 0x4fa   : > { %3601 = vst [vmem:[#allocation5] sm:$0x1] %v3600_v38  ;;  %v3603_v41 = vrot.slane %v3600_v38, 1  ;;  %v3614_v50 = vmax.f32 %v3612_v35, %v3613_v40 }
 0x4fc   : > { %3605 = vst [vmem:[#allocation5 + $0x8] sm:$0x1] %v3603_v41  ;;  %v3617_v51 = vrot.slane %v3614_v50, 1  ;;  %3615 = vst [vmem:[#allocation5 + $0x10] sm:$0x1] %v3614_v50 }
 0x4fe   : > { %3619 = vst [vmem:[#allocation5 + $0x18] sm:$0x1] %v3617_v51 }
 0x501   : > { %v3620_v0 = vld [vmem:[#allocation5] sm:$0xff] }
 0x502   : > { %v3624_v36 = vpack.c.bf16 %v3620_v0, %v3620_v0 }
 0x503   : > { %v3621_v53 = vld [vmem:[#allocation5 + $0x8] sm:$0xff]  ;;  %v3622_v2 = vld [vmem:[#allocation5 + $0x10] sm:$0xff] }
 0x504   : > { %v3625_v1 = vpack.c.bf16 %v3621_v53, %v3621_v53  ;;  %v3626_v32 = vpack.c.bf16 %v3622_v2, %v3622_v2 }
 0x505   : > { %v3623_v6 = vld [vmem:[#allocation5 + $0x18] sm:$0xff] }
 0x506   : > { %3923 = vmatprep.mubr.bf16.mxu0 %v3625_v1  ;;  %v3627_v33 = vpack.c.bf16 %v3623_v6, %v3623_v6 }
 0x507   : > { %3924 = vmatmul.mubr.bf16.vlgmr.msra.gmra.mrb[24].mxu0 %v3624_v36 }
 0x508   : > { %3963 = vmatprep.mubr.bf16.mxu1 %v3627_v33  ;;  %5437 = vmatpush3.bf16.msra.mxu0 %v5755_v27 }
 0x509   : > { %3964 = vmatmul.mubr.bf16.vlgmr.msra.gmra.mrb[52].mxu1 %v3626_v32  ;;  %5438 = vmatprep.subr.bf16.mxu0 %v5766_v59 }
 0x50a   : > { %5452 = vmatprep.mubr.msk.bf16.mxu0 %vm5832_vm3, %v5766_v59 }
 0x50c   : > { %5439 = vmatpush3.bf16.msra.mxu0 %v5756_v49 }
 0x50d   : > { %5440 = vmatprep.subr.bf16.mxu0 %v5766_v59 }
 0x510   : > { %5441 = vmatpush3.bf16.msra.mxu0 %v5757_v60 }
 0x511   : > { %5442 = vmatprep.subr.bf16.mxu0 %v5766_v59 }
 0x514   : > { %5443 = vmatpush3.bf16.msra.mxu0 %v5758_v42 }
 0x515   : > { %5444 = vmatprep.subr.bf16.mxu0 %v5766_v59 }
 0x518   : > { %5445 = vmatpush3.bf16.msra.mxu0 %v5759_v17 }
 0x519   : > { %5446 = vmatprep.subr.bf16.mxu0 %v5766_v59 }
 0x51c   : > { %5447 = vmatpush3.bf16.msra.mxu0 %v5760_v34 }
 0x51d   : > { %5448 = vmatprep.subr.bf16.mxu0 %v5766_v59 }
 0x520   : > { %5449 = vmatpush3.bf16.msra.mxu0 %v5761_v45 }
 0x521   : > { %5450 = vmatprep.subr.bf16.mxu0 %v5766_v59 }
 0x524   : > { %5451 = vmatpush3.bf16.msra.mxu0 %v5762_v52 }
 0x5da   : > { %v4963_v13 = vpop.f32.mrb[24].mxu0 }
 0x5db   : > { %v4964_v26 = vpop.f32.mrb[25].mxu0 }
 0x5dc   : > { %v4965_v14 = vadd.f32 %v4964_v26, %v4963_v13  ;;  %v4966_v19 = vpop.f32.mrb[26].mxu0  ;;  %v4985_v20 = vpop.f32.mrb[52].mxu1 }
 0x5dd   : > { %v4967_v22 = vpop.f32.mrb[27].mxu0  ;;  %v4986_v18 = vpop.f32.mrb[53].mxu1 }
 0x5de   : > { %v3926_v25 = vadd.f32 %v4965_v14, %v4692_v16  ;;  %v4987_v29 = vadd.f32 %v4986_v18, %v4985_v20  ;;  %v4988_v30 = vpop.f32.mrb[54].mxu1 }
 0x5df   : > { %v4989_v56 = vpop.f32.mrb[55].mxu1 }
 0x5e0   : > { %v3966_v7 = vadd.f32 %v4987_v29, %v3926_v25 }
 0x5e2   : > { %v3971_v10 = vmax.f32 %v3966_v7, 0.0 }
 0x5e4   : > { %v3972_v11 = vpack.c.bf16 %v3971_v10, %v3971_v10 }
 0x5e6   : > { %5453 = vmatmul.mubr.bf16.vlgmr.msra.gmra.mrb[28].mxu0 %v3972_v11 }
 0x6b9   : > { %v4078_v63 = vpop.f32.mrb[28].mxu0 }
 0x6ba   : > { %v4079_v57 = vadd.f32 %v4725_v55, %v4078_v63  ;;  %v5454_v12 = vpop.f32.mrb[29].mxu0 }
 0x6bb   : > { %v4081_v23 = vpop.f32.mrb[30].mxu0 }
 0x6bc   : > { %v5455_v4 = vpop.f32.mrb[31].mxu0  ;;  %v4084_v21 = vmul.f32 %v4079_v57, %v4079_v57 }
 0x6be   : > { %4085 = vadd.xlane.f32.xlu0 %v4084_v21 }
 0x74b   : > { %v4086_v24 = vpop.xlane.xlu0 %4085 }
 0x74c   : > { %v4087_v37 = vmax.f32 %v4086_v24, 1e-24 }
 0x74e   : > { %5763 = vrsqrt.f32 %v4087_v37 }
 0x758   : > { %v5764_v28 = vpop.eup %5763 }
 0x759   : > { %v4089_v39 = vmul.f32 %v5764_v28, %v4079_v57 }
 0x75b   : > { %4090 = vst [vmem:[%s378_s25] sm:$0x1] %v4089_v39 }
 0x75c   : > { %5780 = shalt.err (!%p5777_p3)
}
 0x75d   : > { %s5781_s22 = scalar_lea.hbm %s7024_s13, 16  ;;  %s5785_s30 = scalar_lea.hbm %s7077_s11, 32 }
 0x75e   : > { %p5782_p4 = scmp.ne.s32.totalorder %s7024_s13, %s5781_s22  ;;  %p5786_p9 = scmp.lt.u32.totalorder %s7024_s13, %s7077_s11 }
 0x75f   : > { %p5787_p10 = scmp.lt.u32.totalorder %s5785_s30, %s5781_s22  ;;  %p5789_p12 = scmp.lt.u32.totalorder %s5781_s22, %s7024_s13 }
 0x760   : > { %p5783_p7 = pnand %p5782_p4, %p5932_p5 }
 0x761   : > { %p5788_p11 = por %p5787_p10, %p5786_p9 }
 0x762   : > { %p5784_p8 = pneg %p5783_p7 }
 0x763   : > { %p5790_p13 = por %p5789_p12, %p5788_p11 }
 0x765   : > { %p5791_p0 = pnand %p5790_p13, %p5784_p8 }
 0x767   : > { %5794 = shalt.err (!%p5791_p0)
}
 0x768   : > { %5520 = dma.vmem_to_hbm [thread:$0]  (%p5932_p5), %s7026_s29, 16, %s7024_s13, %s4092_s14  }
 0x769 PF: > { %p5526_p1 = scmp.ge.s32.totalorder %s5829_s20, 2  ;;  %s4116_s0 = sand.u32 1, %s5817_s17  }
 0x76a   : > { %s4117_s15 = scalar_lea.sflag [#allocation7], %s4116_s0 }
 0x76b   : > { %p5523_p2 = pnand %p5526_p1, %p5936_p6 }
 0x76d   : > { %5812 = dma.done.wait (!%p5523_p2), %s4117_s15, 16  }
 0x76e   : > { %5814 = vsyncadd (!%p5523_p2), %s4117_s15, 4294967280  ;;  %p21_p3 = scmp.ge.s32.totalorder %s5919_s23, 4   ;;  %s7106_s17 = smov %s5821_s18 }
 0x76f   : > { %s7107_s18 = smov %s5825_s19  ;;  %s7108_s19 = smov %s5930_s26 }
 0x770   : > { %s7109_s20 = smov %s5919_s23  ;;  %23 = sbr.rel (!%p21_p3) target bundleno = 5 (0x5), region = 158 }
 0x777   :  { %4121 = vsyncpa [#allocation7], 1 }
 0x778   :  { %4123 = vsyncpa [#allocation7 + $0x1], 1 }

</bundles_post_ra>
